<compile_context>
chip_gen: v6e
topology: v6e:2x2x1
jax: 0.10.0
libtpu: 0.0.40
codegen_flags: <defaults>
</compile_context>

<pallas_src>
import math

import jax
import jax.numpy as jnp
from jax.experimental import pallas as pl
from jax.experimental.pallas import tpu as pltpu

# ----------------------------- model config ---------------------------------
B = 2                 # batch size (example)
S = 16                # input_length == seq_len
D = 64                # d_model (module default)
NHEAD = 4             # module default
HEAD_DIM = D // NHEAD
NUM_LAYERS = 2        # module default
NUM_CLASSES = 2       # module default
DIM_FF = 2048         # nn.TransformerEncoderLayer default dim_feedforward
LN_EPS = 1e-5         # nn.TransformerEncoderLayer default layer_norm_eps


# ------------------------------ fused kernel ---------------------------------
def _layer_norm(x, w, b):
    mu = jnp.mean(x, axis=-1, keepdims=True)
    var = jnp.mean((x - mu) ** 2, axis=-1, keepdims=True)
    return (x - mu) * jax.lax.rsqrt(var + LN_EPS) * w + b


def fused_forward_kernel(x_ref, emb_w_ref, emb_bpe_ref,
                         wqkv_ref, bqkv_ref, wo_ref, bo_ref,
                         n1w_ref, n1b_ref,
                         w1_ref, b1_ref, w2_ref, b2_ref,
                         n2w_ref, n2b_ref,
                         fcw_ref, fcb_ref,
                         o_ref,
                         hf_ref, attn_ref):
    f32 = jnp.float32
    bf16 = jnp.bfloat16
    l = pl.program_id(0)

    # --- first grid step: embedding Linear(1, D) + (bias + positional enc) ---
    @pl.when(l == 0)
    def _embed():
        x = x_ref[...]                                           # (B, S)
        h = (x[:, :, None] * emb_w_ref[...][0][None, None, :]
             + emb_bpe_ref[...][None, :, :])                     # (B, S, D)
        hf_ref[...] = h.reshape(B * S, D)

    hf = hf_ref[...]                                             # (B*S, D) f32
    hbf = hf.astype(bf16)

    # ---- fused qkv projection: bf16 x bf16 -> f32 accumulate ----
    # 1/sqrt(HEAD_DIM) is pre-folded into the Q columns of wqkv/bqkv.
    qkv = jnp.dot(hbf, wqkv_ref[0], preferred_element_type=f32) + bqkv_ref[0]
    qkv3 = qkv.reshape(B, S, 3 * D)

    # ---- multi-head self-attention (S=16: latency-bound region) ----
    for hh in range(NHEAD):                                      # static unroll
        lo = hh * HEAD_DIM
        q = qkv3[:, :, lo:lo + HEAD_DIM]                         # (B, S, HD)
        k = qkv3[:, :, D + lo:D + lo + HEAD_DIM]
        v = qkv3[:, :, 2 * D + lo:2 * D + lo + HEAD_DIM]
        s = jnp.einsum('bqd,bkd->bqk', q, k,
                       preferred_element_type=f32)               # (B, S, S)
        s = s - jnp.max(s, axis=-1, keepdims=True)
        p = jnp.exp(s)
        p = p / jnp.sum(p, axis=-1, keepdims=True)               # exact divide
        oh = jnp.einsum('bqk,bkd->bqd', p, v,
                        preferred_element_type=f32)              # (B, S, HD)
        # static lane-offset store -> one full-width out-proj matmul below
        attn_ref[:, lo:lo + HEAD_DIM] = oh.reshape(B * S, HEAD_DIM)

    attn = (jnp.dot(attn_ref[...].astype(bf16), wo_ref[0],
                    preferred_element_type=f32) + bo_ref[0])

    # ---- residual + LayerNorm 1 (post-norm) ----
    y = _layer_norm(hf + attn, n1w_ref[0], n1b_ref[0])

    # ---- feed-forward (Linear -> ReLU -> Linear), bf16 operands ----
    ff = jnp.dot(y.astype(bf16), w1_ref[0], preferred_element_type=f32) + b1_ref[0]
    ff = jnp.maximum(ff, 0.0)
    ff = jnp.dot(ff.astype(bf16), w2_ref[0], preferred_element_type=f32) + b2_ref[0]

    # ---- residual + LayerNorm 2 ----
    z = _layer_norm(y + ff, n2w_ref[0], n2b_ref[0])
    hf_ref[...] = z

    # --- last grid step: mean pool over sequence + classifier Linear(D, C) ---
    @pl.when(l == NUM_LAYERS - 1)
    def _classify():
        pooled = jnp.mean(z.reshape(B, S, D), axis=1)            # (B, D)
        o_ref[...] = (jnp.dot(pooled, fcw_ref[...],
                              preferred_element_type=f32) + fcb_ref[...])


# --------------------------- pallas wrapper ----------------------------------
def ecg_transformer_forward(x, kp):
    args = (x, kp["emb_w"], kp["emb_bpe"],
            kp["wqkv"], kp["bqkv"], kp["wo"], kp["bo"],
            kp["n1w"], kp["n1b"],
            kp["w1"], kp["b1"], kp["w2"], kp["b2"],
            kp["n2w"], kp["n2b"],
            kp["fc_w"], kp["fc_b"])

    const2 = lambda l: (0, 0)           # shared (non-layer) tensors
    perlayer = lambda l: (l, 0, 0)      # layer-stacked tensors

    grid_spec = pltpu.PrefetchScalarGridSpec(
        num_scalar_prefetch=0,
        grid=(NUM_LAYERS,),
        in_specs=[
            pl.BlockSpec((B, S), const2),                     # x
            pl.BlockSpec((1, D), const2),                     # emb_w
            pl.BlockSpec((S, D), const2),                     # emb_bias + pe
            pl.BlockSpec((1, D, 3 * D), perlayer),            # wqkv (bf16)
            pl.BlockSpec((1, 1, 3 * D), perlayer),            # bqkv
            pl.BlockSpec((1, D, D), perlayer),                # wo (bf16)
            pl.BlockSpec((1, 1, D), perlayer),                # bo
            pl.BlockSpec((1, 1, D), perlayer),                # n1w
            pl.BlockSpec((1, 1, D), perlayer),                # n1b
            pl.BlockSpec((1, D, DIM_FF), perlayer),           # w1 (bf16)
            pl.BlockSpec((1, 1, DIM_FF), perlayer),           # b1
            pl.BlockSpec((1, DIM_FF, D), perlayer),           # w2 (bf16)
            pl.BlockSpec((1, 1, D), perlayer),                # b2
            pl.BlockSpec((1, 1, D), perlayer),                # n2w
            pl.BlockSpec((1, 1, D), perlayer),                # n2b
            pl.BlockSpec((D, NUM_CLASSES), const2),           # fc_w
            pl.BlockSpec((1, NUM_CLASSES), const2),           # fc_b
        ],
        out_specs=pl.BlockSpec((B, NUM_CLASSES), const2),
        scratch_shapes=[
            pltpu.VMEM((B * S, D), jnp.float32),              # residual stream
            pltpu.VMEM((B * S, D), jnp.float32),              # per-head attn out
        ],
    )
    return pl.pallas_call(
        fused_forward_kernel,
        out_shape=jax.ShapeDtypeStruct((B, NUM_CLASSES), jnp.float32),
        grid_spec=grid_spec,
        compiler_params=pltpu.CompilerParams(
            dimension_semantics=("arbitrary",)),
    )(*args)


# --------------------------- parameter setup ---------------------------------
def make_positional_encoding(max_len, d_model):
    position = jnp.arange(max_len, dtype=jnp.float32)[:, None]
    div_term = jnp.exp(jnp.arange(0, d_model, 2, dtype=jnp.float32)
                       * (-math.log(10000.0) / d_model))
    pe = jnp.zeros((max_len, d_model), jnp.float32)
    pe = pe.at[:, 0::2].set(jnp.sin(position * div_term))
    pe = pe.at[:, 1::2].set(jnp.cos(position * div_term))
    return pe


def init_params(key):
    """Torch-equivalent parameters.  Big matmul weights are stored bf16."""
    def nrm(k, shape, scale=0.02):
        return scale * jax.random.normal(k, shape, dtype=jnp.float32)

    keys = jax.random.split(key, 12)
    return {
        # nn.Linear(1, D): weight (D,1) transposed -> (1, D)
        "emb_w": nrm(keys[0], (1, D)),
        "emb_b": nrm(keys[1], (1, D)),
        "pe": make_positional_encoding(S, D),
        # nn.Linear(D, NUM_CLASSES): weight (C,D) transposed -> (D, C)
        "fc_w": nrm(keys[2], (D, NUM_CLASSES)),
        "fc_b": nrm(keys[3], (1, NUM_CLASSES)),
        # Encoder layer weights stacked over layers.
        # MHA in_proj (3D,D) transposed -> (D,3D); out_proj (D,D) transposed.
        "wqkv": nrm(keys[4], (NUM_LAYERS, D, 3 * D)).astype(jnp.bfloat16),
        "bqkv": nrm(keys[5], (NUM_LAYERS, 1, 3 * D)),
        "wo": nrm(keys[6], (NUM_LAYERS, D, D)).astype(jnp.bfloat16),
        "bo": nrm(keys[7], (NUM_LAYERS, 1, D)),
        "n1w": jnp.ones((NUM_LAYERS, 1, D), jnp.float32),
        "n1b": jnp.zeros((NUM_LAYERS, 1, D), jnp.float32),
        # FFN: linear1 (FF,D) -> (D,FF); linear2 (D,FF) -> (FF,D)
        "w1": nrm(keys[8], (NUM_LAYERS, D, DIM_FF)).astype(jnp.bfloat16),
        "b1": nrm(keys[9], (NUM_LAYERS, 1, DIM_FF)),
        "w2": nrm(keys[10], (NUM_LAYERS, DIM_FF, D)).astype(jnp.bfloat16),
        "b2": nrm(keys[11], (NUM_LAYERS, 1, D)),
        "n2w": jnp.ones((NUM_LAYERS, 1, D), jnp.float32),
        "n2b": jnp.zeros((NUM_LAYERS, 1, D), jnp.float32),
    }


def prepare_kernel_params(p):
    """Host-side constant folding for the kernel (semantics-preserving)."""
    scale = 1.0 / math.sqrt(HEAD_DIM)        # 0.25: exact power of two
    wqkv = p["wqkv"].astype(jnp.float32)
    wqkv = wqkv.at[:, :, :D].multiply(scale)       # fold scale into Q weights
    bqkv = p["bqkv"].at[:, :, :D].multiply(scale)  # ... and Q bias
    return {
        "emb_w": p["emb_w"],
        "emb_bpe": p["emb_b"] + p["pe"],           # (S, D): bias + pos-enc
        "wqkv": wqkv.astype(jnp.bfloat16),         # exact (x0.25 is lossless)
        "bqkv": bqkv,
        "wo": p["wo"], "bo": p["bo"],
        "n1w": p["n1w"], "n1b": p["n1b"],
        "w1": p["w1"], "b1": p["b1"],
        "w2": p["w2"], "b2": p["b2"],
        "n2w": p["n2w"], "n2b": p["n2b"],
        "fc_w": p["fc_w"], "fc_b": p["fc_b"],
    }


# ------------------------- pure-JAX reference --------------------------------
def reference_forward(x, params):
    f32 = jnp.float32
    h = x[:, :, None] * params["emb_w"][0] + params["emb_b"][0]
    h = h + params["pe"][None]
    for l in range(NUM_LAYERS):
        wqkv = params["wqkv"][l].astype(f32)
        bqkv = params["bqkv"][l, 0]
        wo = params["wo"][l].astype(f32)
        bo = params["bo"][l, 0]
        n1w, n1b = params["n1w"][l, 0], params["n1b"][l, 0]
        w1 = params["w1"][l].astype(f32)
        b1 = params["b1"][l, 0]
        w2 = params["w2"][l].astype(f32)
        b2 = params["b2"][l, 0]
        n2w, n2b = params["n2w"][l, 0], params["n2b"][l, 0]

        def one(xb, wqkv=wqkv, bqkv=bqkv, wo=wo, bo=bo, n1w=n1w, n1b=n1b,
                w1=w1, b1=b1, w2=w2, b2=b2, n2w=n2w, n2b=n2b):
            qkv = xb @ wqkv + bqkv
            q, k, v = qkv[:, :D], qkv[:, D:2 * D], qkv[:, 2 * D:]
            outs = []
            for hh in range(NHEAD):
                sl = slice(hh * HEAD_DIM, (hh + 1) * HEAD_DIM)
                s = (q[:, sl] / math.sqrt(HEAD_DIM)) @ k[:, sl].T
                a = jax.nn.softmax(s, axis=-1)
                outs.append(a @ v[:, sl])
            attn = jnp.concatenate(outs, -1) @ wo + bo
            y = xb + attn
            y = (y - y.mean(-1, keepdims=True)) / jnp.sqrt(y.var(-1, keepdims=True) + LN_EPS)
            y = y * n1w + n1b
            ff = jnp.maximum(y @ w1 + b1, 0.0) @ w2 + b2
            z = y + ff
            z = (z - z.mean(-1, keepdims=True)) / jnp.sqrt(z.var(-1, keepdims=True) + LN_EPS)
            return z * n2w + n2b

        h = jax.vmap(one)(h)
    return h.mean(axis=1) @ params["fc_w"] + params["fc_b"][0]


# ---------------------------------- main --------------------------------------
if __name__ == "__main__":
    key = jax.random.PRNGKey(0)
    kx, kp = jax.random.split(key)
    x = jax.random.normal(kx, (B, S), dtype=jnp.float32)   # (batch, seq_len)
    params = init_params(kp)
    kparams = prepare_kernel_params(params)

    logits = jax.block_until_ready(ecg_transformer_forward(x, kparams))
    assert logits.shape == (B, NUM_CLASSES) and logits.dtype == jnp.float32

    ref = jax.block_until_ready(reference_forward(x, params))
    # Kernel feeds bf16 operands to the MXU (weights already bf16); reference is
    # pure f32 math on the same bf16-rounded weights, hence the tolerance.
    assert jnp.allclose(logits, ref, rtol=5e-2, atol=5e-3), (logits, ref)

    print("KERNEL_OK")
</pallas_src>

<mosaic_0001>
module attributes {stable_mosaic.version = 11 : i64} {
  func.func @fused_forward_kernel(%arg0: i32, %arg1: memref<2x16xf32, #tpu.memory_space<vmem>>, %arg2: memref<1x64xf32, #tpu.memory_space<vmem>>, %arg3: memref<16x64xf32, #tpu.memory_space<vmem>>, %arg4: memref<1x64x192xbf16, #tpu.memory_space<vmem>>, %arg5: memref<1x1x192xf32, #tpu.memory_space<vmem>>, %arg6: memref<1x64x64xbf16, #tpu.memory_space<vmem>>, %arg7: memref<1x1x64xf32, #tpu.memory_space<vmem>>, %arg8: memref<1x1x64xf32, #tpu.memory_space<vmem>>, %arg9: memref<1x1x64xf32, #tpu.memory_space<vmem>>, %arg10: memref<1x64x2048xbf16, #tpu.memory_space<vmem>>, %arg11: memref<1x1x2048xf32, #tpu.memory_space<vmem>>, %arg12: memref<1x2048x64xbf16, #tpu.memory_space<vmem>>, %arg13: memref<1x1x64xf32, #tpu.memory_space<vmem>>, %arg14: memref<1x1x64xf32, #tpu.memory_space<vmem>>, %arg15: memref<1x1x64xf32, #tpu.memory_space<vmem>>, %arg16: memref<64x2xf32, #tpu.memory_space<vmem>>, %arg17: memref<1x2xf32, #tpu.memory_space<vmem>>, %arg18: memref<2x2xf32, #tpu.memory_space<vmem>>, %arg19: memref<32x64xf32, #tpu.memory_space<vmem>>, %arg20: memref<32x64xf32, #tpu.memory_space<vmem>>) attributes {dimension_semantics = [#tpu.dimension_semantics<arbitrary>], iteration_bounds = array<i64: 2>, scalar_prefetch = 0 : i64, scratch_operands = 2 : i64, tpu.core_type = #tpu.core_type<tc>, window_params = [{pipeline_mode = #tpu.pipeline_mode<synchronous>, transform_indices = @transform_0, window_bounds = array<i64: 2, 16>}, {pipeline_mode = #tpu.pipeline_mode<synchronous>, transform_indices = @transform_1, window_bounds = array<i64: 1, 64>}, {pipeline_mode = #tpu.pipeline_mode<synchronous>, transform_indices = @transform_2, window_bounds = array<i64: 16, 64>}, {transform_indices = @transform_3, window_bounds = array<i64: 1, 64, 192>}, {transform_indices = @transform_4, window_bounds = array<i64: 1, 1, 192>}, {transform_indices = @transform_5, window_bounds = array<i64: 1, 64, 64>}, {transform_indices = @transform_6, window_bounds = array<i64: 1, 1, 64>}, {transform_indices = @transform_7, window_bounds = array<i64: 1, 1, 64>}, {transform_indices = @transform_8, window_bounds = array<i64: 1, 1, 64>}, {transform_indices = @transform_9, window_bounds = array<i64: 1, 64, 2048>}, {transform_indices = @transform_10, window_bounds = array<i64: 1, 1, 2048>}, {transform_indices = @transform_11, window_bounds = array<i64: 1, 2048, 64>}, {transform_indices = @transform_12, window_bounds = array<i64: 1, 1, 64>}, {transform_indices = @transform_13, window_bounds = array<i64: 1, 1, 64>}, {transform_indices = @transform_14, window_bounds = array<i64: 1, 1, 64>}, {pipeline_mode = #tpu.pipeline_mode<synchronous>, transform_indices = @transform_15, window_bounds = array<i64: 64, 2>}, {pipeline_mode = #tpu.pipeline_mode<synchronous>, transform_indices = @transform_16, window_bounds = array<i64: 1, 2>}, {pipeline_mode = #tpu.pipeline_mode<synchronous>, transform_indices = @transform_17, window_bounds = array<i64: 2, 2>}]} {
    %c0_i32 = arith.constant 0 : i32
    %0 = arith.cmpi eq, %arg0, %c0_i32 : i32
    %1 = arith.extui %0 : i1 to i32
    %c0_i32_0 = arith.constant 0 : i32
    %2 = arith.cmpi ne, %1, %c0_i32_0 : i32
    scf.if %2 {
      %c0_78 = arith.constant 0 : index
      %c0_79 = arith.constant 0 : index
      %162 = vector.load %arg1[%c0_78, %c0_79] : memref<2x16xf32, #tpu.memory_space<vmem>>, vector<2x16xf32>
      %163 = vector.shape_cast %162 : vector<2x16xf32> to vector<2x16x1xf32>
      %c0_80 = arith.constant 0 : index
      %c0_81 = arith.constant 0 : index
      %164 = vector.load %arg2[%c0_80, %c0_81] : memref<1x64xf32, #tpu.memory_space<vmem>>, vector<1x64xf32>
      %165 = vector.shape_cast %164 : vector<1x64xf32> to vector<64xf32>
      %166 = vector.shape_cast %165 : vector<64xf32> to vector<1x1x64xf32>
      %167 = vector.broadcast %163 : vector<2x16x1xf32> to vector<2x16x64xf32>
      %168 = vector.broadcast %166 : vector<1x1x64xf32> to vector<2x16x64xf32>
      %169 = arith.mulf %167, %168 : vector<2x16x64xf32>
      %c0_82 = arith.constant 0 : index
      %c0_83 = arith.constant 0 : index
      %170 = vector.load %arg3[%c0_82, %c0_83] : memref<16x64xf32, #tpu.memory_space<vmem>>, vector<16x64xf32>
      %171 = vector.shape_cast %170 : vector<16x64xf32> to vector<1x16x64xf32>
      %172 = vector.broadcast %171 : vector<1x16x64xf32> to vector<2x16x64xf32>
      %173 = arith.addf %169, %172 : vector<2x16x64xf32>
      %174 = vector.shape_cast %173 : vector<2x16x64xf32> to vector<32x64xf32>
      %c0_84 = arith.constant 0 : index
      %c0_85 = arith.constant 0 : index
      %175 = vector.load %arg19[%c0_84, %c0_85] : memref<32x64xf32, #tpu.memory_space<vmem>>, vector<32x64xf32>
      tpu.vector_store %arg19[%c0_84, %c0_85], %174 {strides = array<i32>} : memref<32x64xf32, #tpu.memory_space<vmem>>, vector<32x64xf32>,
    } else {
    }
    %c0 = arith.constant 0 : index
    %c0_1 = arith.constant 0 : index
    %3 = vector.load %arg19[%c0, %c0_1] : memref<32x64xf32, #tpu.memory_space<vmem>>, vector<32x64xf32>
    %4 = arith.truncf %3 : vector<32x64xf32> to vector<32x64xbf16>
    %c0_2 = arith.constant 0 : index
    %c0_3 = arith.constant 0 : index
    %c0_4 = arith.constant 0 : index
    %5 = vector.load %arg4[%c0_2, %c0_3, %c0_4] : memref<1x64x192xbf16, #tpu.memory_space<vmem>>, vector<1x64x192xbf16>
    %6 = vector.shape_cast %5 : vector<1x64x192xbf16> to vector<64x192xbf16>
    %cst = arith.constant dense<0.000000e+00> : vector<32x192xf32>
    %7 = tpu.matmul %4, %6, %cst {dimension_numbers = #tpu.dot_dimension_numbers<[1], [0], [0], [1], [0, 0, 1, 1], [], []>} : vector<32x64xbf16>, vector<64x192xbf16>, vector<32x192xf32> -> vector<32x192xf32>
    %c0_5 = arith.constant 0 : index
    %c0_6 = arith.constant 0 : index
    %c0_7 = arith.constant 0 : index
    %8 = vector.load %arg5[%c0_5, %c0_6, %c0_7] : memref<1x1x192xf32, #tpu.memory_space<vmem>>, vector<1x1x192xf32>
    %9 = vector.shape_cast %8 : vector<1x1x192xf32> to vector<1x192xf32>
    %10 = vector.broadcast %9 : vector<1x192xf32> to vector<32x192xf32>
    %11 = arith.addf %7, %10 : vector<32x192xf32>
    %12 = vector.shape_cast %11 : vector<32x192xf32> to vector<2x16x192xf32>
    %13 = vector.extract_strided_slice %12 {offsets = [0, 0, 0], sizes = [2, 16, 16], strides = [1, 1, 1]} : vector<2x16x192xf32> to vector<2x16x16xf32>
    %14 = vector.extract_strided_slice %12 {offsets = [0, 0, 64], sizes = [2, 16, 16], strides = [1, 1, 1]} : vector<2x16x192xf32> to vector<2x16x16xf32>
    %15 = vector.extract_strided_slice %12 {offsets = [0, 0, 128], sizes = [2, 16, 16], strides = [1, 1, 1]} : vector<2x16x192xf32> to vector<2x16x16xf32>
    "tpu.trace_start"() <{level = 10 : i32, message = "bqd,bkd->bqk"}> : () -> ()
    %cst_8 = arith.constant dense<0.000000e+00> : vector<2x16x16xf32>
    %16 = tpu.matmul %13, %14, %cst_8 {dimension_numbers = #tpu.dot_dimension_numbers<[2], [2], [1], [1], [0, 0, 0, 1, 1, 1], [0], [0]>} : vector<2x16x16xf32>, vector<2x16x16xf32>, vector<2x16x16xf32> -> vector<2x16x16xf32>
    "tpu.trace_stop"() : () -> ()
    %cst_9 = arith.constant dense<0xFF800000> : vector<2x16xf32>
    %17 = vector.multi_reduction <maximumf>, %16, %cst_9 [2] : vector<2x16x16xf32> to vector<2x16xf32>
    %18 = vector.shape_cast %17 : vector<2x16xf32> to vector<2x16x1xf32>
    %19 = vector.broadcast %18 : vector<2x16x1xf32> to vector<2x16x16xf32>
    %20 = arith.subf %16, %19 : vector<2x16x16xf32>
    %21 = math.exp %20 : vector<2x16x16xf32>
    %cst_10 = arith.constant dense<0.000000e+00> : vector<2x16xf32>
    %22 = vector.multi_reduction <add>, %21, %cst_10 [2] : vector<2x16x16xf32> to vector<2x16xf32>
    %23 = vector.shape_cast %22 : vector<2x16xf32> to vector<2x16x1xf32>
    %24 = vector.broadcast %23 : vector<2x16x1xf32> to vector<2x16x16xf32>
    %25 = arith.divf %21, %24 : vector<2x16x16xf32>
    "tpu.trace_start"() <{level = 10 : i32, message = "bqk,bkd->bqd"}> : () -> ()
    %cst_11 = arith.constant dense<0.000000e+00> : vector<2x16x16xf32>
    %26 = tpu.matmul %25, %15, %cst_11 {dimension_numbers = #tpu.dot_dimension_numbers<[2], [1], [1], [2], [0, 0, 0, 1, 1, 2], [0], [0]>} : vector<2x16x16xf32>, vector<2x16x16xf32>, vector<2x16x16xf32> -> vector<2x16x16xf32>
    "tpu.trace_stop"() : () -> ()
    %27 = vector.shape_cast %26 : vector<2x16x16xf32> to vector<32x16xf32>
    %c0_12 = arith.constant 0 : index
    %c0_13 = arith.constant 0 : index
    %28 = vector.load %arg20[%c0_12, %c0_13] : memref<32x64xf32, #tpu.memory_space<vmem>>, vector<32x16xf32>
    tpu.vector_store %arg20[%c0_12, %c0_13], %27 {strides = array<i32>} : memref<32x64xf32, #tpu.memory_space<vmem>>, vector<32x16xf32>,
    %29 = vector.extract_strided_slice %12 {offsets = [0, 0, 16], sizes = [2, 16, 16], strides = [1, 1, 1]} : vector<2x16x192xf32> to vector<2x16x16xf32>
    %30 = vector.extract_strided_slice %12 {offsets = [0, 0, 80], sizes = [2, 16, 16], strides = [1, 1, 1]} : vector<2x16x192xf32> to vector<2x16x16xf32>
    %31 = vector.extract_strided_slice %12 {offsets = [0, 0, 144], sizes = [2, 16, 16], strides = [1, 1, 1]} : vector<2x16x192xf32> to vector<2x16x16xf32>
    "tpu.trace_start"() <{level = 10 : i32, message = "bqd,bkd->bqk"}> : () -> ()
    %cst_14 = arith.constant dense<0.000000e+00> : vector<2x16x16xf32>
    %32 = tpu.matmul %29, %30, %cst_14 {dimension_numbers = #tpu.dot_dimension_numbers<[2], [2], [1], [1], [0, 0, 0, 1, 1, 1], [0], [0]>} : vector<2x16x16xf32>, vector<2x16x16xf32>, vector<2x16x16xf32> -> vector<2x16x16xf32>
    "tpu.trace_stop"() : () -> ()
    %cst_15 = arith.constant dense<0xFF800000> : vector<2x16xf32>
    %33 = vector.multi_reduction <maximumf>, %32, %cst_15 [2] : vector<2x16x16xf32> to vector<2x16xf32>
    %34 = vector.shape_cast %33 : vector<2x16xf32> to vector<2x16x1xf32>
    %35 = vector.broadcast %34 : vector<2x16x1xf32> to vector<2x16x16xf32>
    %36 = arith.subf %32, %35 : vector<2x16x16xf32>
    %37 = math.exp %36 : vector<2x16x16xf32>
    %cst_16 = arith.constant dense<0.000000e+00> : vector<2x16xf32>
    %38 = vector.multi_reduction <add>, %37, %cst_16 [2] : vector<2x16x16xf32> to vector<2x16xf32>
    %39 = vector.shape_cast %38 : vector<2x16xf32> to vector<2x16x1xf32>
    %40 = vector.broadcast %39 : vector<2x16x1xf32> to vector<2x16x16xf32>
    %41 = arith.divf %37, %40 : vector<2x16x16xf32>
    "tpu.trace_start"() <{level = 10 : i32, message = "bqk,bkd->bqd"}> : () -> ()
    %cst_17 = arith.constant dense<0.000000e+00> : vector<2x16x16xf32>
    %42 = tpu.matmul %41, %31, %cst_17 {dimension_numbers = #tpu.dot_dimension_numbers<[2], [1], [1], [2], [0, 0, 0, 1, 1, 2], [0], [0]>} : vector<2x16x16xf32>, vector<2x16x16xf32>, vector<2x16x16xf32> -> vector<2x16x16xf32>
    "tpu.trace_stop"() : () -> ()
    %43 = vector.shape_cast %42 : vector<2x16x16xf32> to vector<32x16xf32>
    %c0_18 = arith.constant 0 : index
    %c16 = arith.constant 16 : index
    %44 = vector.load %arg20[%c0_18, %c16] : memref<32x64xf32, #tpu.memory_space<vmem>>, vector<32x16xf32>
    tpu.vector_store %arg20[%c0_18, %c16], %43 {strides = array<i32>} : memref<32x64xf32, #tpu.memory_space<vmem>>, vector<32x16xf32>,
    %45 = vector.extract_strided_slice %12 {offsets = [0, 0, 32], sizes = [2, 16, 16], strides = [1, 1, 1]} : vector<2x16x192xf32> to vector<2x16x16xf32>
    %46 = vector.extract_strided_slice %12 {offsets = [0, 0, 96], sizes = [2, 16, 16], strides = [1, 1, 1]} : vector<2x16x192xf32> to vector<2x16x16xf32>
    %47 = vector.extract_strided_slice %12 {offsets = [0, 0, 160], sizes = [2, 16, 16], strides = [1, 1, 1]} : vector<2x16x192xf32> to vector<2x16x16xf32>
    "tpu.trace_start"() <{level = 10 : i32, message = "bqd,bkd->bqk"}> : () -> ()
    %cst_19 = arith.constant dense<0.000000e+00> : vector<2x16x16xf32>
    %48 = tpu.matmul %45, %46, %cst_19 {dimension_numbers = #tpu.dot_dimension_numbers<[2], [2], [1], [1], [0, 0, 0, 1, 1, 1], [0], [0]>} : vector<2x16x16xf32>, vector<2x16x16xf32>, vector<2x16x16xf32> -> vector<2x16x16xf32>
    "tpu.trace_stop"() : () -> ()
    %cst_20 = arith.constant dense<0xFF800000> : vector<2x16xf32>
    %49 = vector.multi_reduction <maximumf>, %48, %cst_20 [2] : vector<2x16x16xf32> to vector<2x16xf32>
    %50 = vector.shape_cast %49 : vector<2x16xf32> to vector<2x16x1xf32>
    %51 = vector.broadcast %50 : vector<2x16x1xf32> to vector<2x16x16xf32>
    %52 = arith.subf %48, %51 : vector<2x16x16xf32>
    %53 = math.exp %52 : vector<2x16x16xf32>
    %cst_21 = arith.constant dense<0.000000e+00> : vector<2x16xf32>
    %54 = vector.multi_reduction <add>, %53, %cst_21 [2] : vector<2x16x16xf32> to vector<2x16xf32>
    %55 = vector.shape_cast %54 : vector<2x16xf32> to vector<2x16x1xf32>
    %56 = vector.broadcast %55 : vector<2x16x1xf32> to vector<2x16x16xf32>
    %57 = arith.divf %53, %56 : vector<2x16x16xf32>
    "tpu.trace_start"() <{level = 10 : i32, message = "bqk,bkd->bqd"}> : () -> ()
    %cst_22 = arith.constant dense<0.000000e+00> : vector<2x16x16xf32>
    %58 = tpu.matmul %57, %47, %cst_22 {dimension_numbers = #tpu.dot_dimension_numbers<[2], [1], [1], [2], [0, 0, 0, 1, 1, 2], [0], [0]>} : vector<2x16x16xf32>, vector<2x16x16xf32>, vector<2x16x16xf32> -> vector<2x16x16xf32>
    "tpu.trace_stop"() : () -> ()
    %59 = vector.shape_cast %58 : vector<2x16x16xf32> to vector<32x16xf32>
    %c0_23 = arith.constant 0 : index
    %c32 = arith.constant 32 : index
    %60 = vector.load %arg20[%c0_23, %c32] : memref<32x64xf32, #tpu.memory_space<vmem>>, vector<32x16xf32>
    tpu.vector_store %arg20[%c0_23, %c32], %59 {strides = array<i32>} : memref<32x64xf32, #tpu.memory_space<vmem>>, vector<32x16xf32>,
    %61 = vector.extract_strided_slice %12 {offsets = [0, 0, 48], sizes = [2, 16, 16], strides = [1, 1, 1]} : vector<2x16x192xf32> to vector<2x16x16xf32>
    %62 = vector.extract_strided_slice %12 {offsets = [0, 0, 112], sizes = [2, 16, 16], strides = [1, 1, 1]} : vector<2x16x192xf32> to vector<2x16x16xf32>
    %63 = vector.extract_strided_slice %12 {offsets = [0, 0, 176], sizes = [2, 16, 16], strides = [1, 1, 1]} : vector<2x16x192xf32> to vector<2x16x16xf32>
    "tpu.trace_start"() <{level = 10 : i32, message = "bqd,bkd->bqk"}> : () -> ()
    %cst_24 = arith.constant dense<0.000000e+00> : vector<2x16x16xf32>
    %64 = tpu.matmul %61, %62, %cst_24 {dimension_numbers = #tpu.dot_dimension_numbers<[2], [2], [1], [1], [0, 0, 0, 1, 1, 1], [0], [0]>} : vector<2x16x16xf32>, vector<2x16x16xf32>, vector<2x16x16xf32> -> vector<2x16x16xf32>
    "tpu.trace_stop"() : () -> ()
    %cst_25 = arith.constant dense<0xFF800000> : vector<2x16xf32>
    %65 = vector.multi_reduction <maximumf>, %64, %cst_25 [2] : vector<2x16x16xf32> to vector<2x16xf32>
    %66 = vector.shape_cast %65 : vector<2x16xf32> to vector<2x16x1xf32>
    %67 = vector.broadcast %66 : vector<2x16x1xf32> to vector<2x16x16xf32>
    %68 = arith.subf %64, %67 : vector<2x16x16xf32>
    %69 = math.exp %68 : vector<2x16x16xf32>
    %cst_26 = arith.constant dense<0.000000e+00> : vector<2x16xf32>
    %70 = vector.multi_reduction <add>, %69, %cst_26 [2] : vector<2x16x16xf32> to vector<2x16xf32>
    %71 = vector.shape_cast %70 : vector<2x16xf32> to vector<2x16x1xf32>
    %72 = vector.broadcast %71 : vector<2x16x1xf32> to vector<2x16x16xf32>
    %73 = arith.divf %69, %72 : vector<2x16x16xf32>
    "tpu.trace_start"() <{level = 10 : i32, message = "bqk,bkd->bqd"}> : () -> ()
    %cst_27 = arith.constant dense<0.000000e+00> : vector<2x16x16xf32>
    %74 = tpu.matmul %73, %63, %cst_27 {dimension_numbers = #tpu.dot_dimension_numbers<[2], [1], [1], [2], [0, 0, 0, 1, 1, 2], [0], [0]>} : vector<2x16x16xf32>, vector<2x16x16xf32>, vector<2x16x16xf32> -> vector<2x16x16xf32>
    "tpu.trace_stop"() : () -> ()
    %75 = vector.shape_cast %74 : vector<2x16x16xf32> to vector<32x16xf32>
    %c0_28 = arith.constant 0 : index
    %c48 = arith.constant 48 : index
    %76 = vector.load %arg20[%c0_28, %c48] : memref<32x64xf32, #tpu.memory_space<vmem>>, vector<32x16xf32>
    tpu.vector_store %arg20[%c0_28, %c48], %75 {strides = array<i32>} : memref<32x64xf32, #tpu.memory_space<vmem>>, vector<32x16xf32>,
    %c0_29 = arith.constant 0 : index
    %c0_30 = arith.constant 0 : index
    %77 = vector.load %arg20[%c0_29, %c0_30] : memref<32x64xf32, #tpu.memory_space<vmem>>, vector<32x64xf32>
    %78 = arith.truncf %77 : vector<32x64xf32> to vector<32x64xbf16>
    %c0_31 = arith.constant 0 : index
    %c0_32 = arith.constant 0 : index
    %c0_33 = arith.constant 0 : index
    %79 = vector.load %arg6[%c0_31, %c0_32, %c0_33] : memref<1x64x64xbf16, #tpu.memory_space<vmem>>, vector<1x64x64xbf16>
    %80 = vector.shape_cast %79 : vector<1x64x64xbf16> to vector<64x64xbf16>
    %cst_34 = arith.constant dense<0.000000e+00> : vector<32x64xf32>
    %81 = tpu.matmul %78, %80, %cst_34 {dimension_numbers = #tpu.dot_dimension_numbers<[1], [0], [0], [1], [0, 0, 1, 1], [], []>} : vector<32x64xbf16>, vector<64x64xbf16>, vector<32x64xf32> -> vector<32x64xf32>
    %c0_35 = arith.constant 0 : index
    %c0_36 = arith.constant 0 : index
    %c0_37 = arith.constant 0 : index
    %82 = vector.load %arg7[%c0_35, %c0_36, %c0_37] : memref<1x1x64xf32, #tpu.memory_space<vmem>>, vector<1x1x64xf32>
    %83 = vector.shape_cast %82 : vector<1x1x64xf32> to vector<1x64xf32>
    %84 = vector.broadcast %83 : vector<1x64xf32> to vector<32x64xf32>
    %85 = arith.addf %81, %84 : vector<32x64xf32>
    %86 = arith.addf %3, %85 : vector<32x64xf32>
    %c0_38 = arith.constant 0 : index
    %c0_39 = arith.constant 0 : index
    %c0_40 = arith.constant 0 : index
    %87 = vector.load %arg8[%c0_38, %c0_39, %c0_40] : memref<1x1x64xf32, #tpu.memory_space<vmem>>, vector<1x1x64xf32>
    %88 = vector.shape_cast %87 : vector<1x1x64xf32> to vector<1x64xf32>
    %c0_41 = arith.constant 0 : index
    %c0_42 = arith.constant 0 : index
    %c0_43 = arith.constant 0 : index
    %89 = vector.load %arg9[%c0_41, %c0_42, %c0_43] : memref<1x1x64xf32, #tpu.memory_space<vmem>>, vector<1x1x64xf32>
    %90 = vector.shape_cast %89 : vector<1x1x64xf32> to vector<1x64xf32>
    %cst_44 = arith.constant dense<0.000000e+00> : vector<32xf32>
    %91 = vector.multi_reduction <add>, %86, %cst_44 [1] : vector<32x64xf32> to vector<32xf32>
    %92 = vector.shape_cast %91 : vector<32xf32> to vector<32x1xf32>
    %cst_45 = arith.constant 6.400000e+01 : f32
    %93 = vector.broadcast %cst_45 : f32 to vector<32x1xf32>
    %94 = arith.divf %92, %93 : vector<32x1xf32>
    %95 = vector.broadcast %94 : vector<32x1xf32> to vector<32x64xf32>
    %96 = arith.subf %86, %95 : vector<32x64xf32>
    %97 = arith.mulf %96, %96 : vector<32x64xf32>
    %cst_46 = arith.constant dense<0.000000e+00> : vector<32xf32>
    %98 = vector.multi_reduction <add>, %97, %cst_46 [1] : vector<32x64xf32> to vector<32xf32>
    %99 = vector.shape_cast %98 : vector<32xf32> to vector<32x1xf32>
    %cst_47 = arith.constant 6.400000e+01 : f32
    %100 = vector.broadcast %cst_47 : f32 to vector<32x1xf32>
    %101 = arith.divf %99, %100 : vector<32x1xf32>
    %102 = vector.broadcast %94 : vector<32x1xf32> to vector<32x64xf32>
    %103 = arith.subf %86, %102 : vector<32x64xf32>
    %cst_48 = arith.constant 9.99999974E-6 : f32
    %104 = vector.broadcast %cst_48 : f32 to vector<32x1xf32>
    %105 = arith.addf %101, %104 : vector<32x1xf32>
    %106 = math.rsqrt %105 : vector<32x1xf32>
    %107 = vector.broadcast %106 : vector<32x1xf32> to vector<32x64xf32>
    %108 = arith.mulf %103, %107 : vector<32x64xf32>
    %109 = vector.broadcast %88 : vector<1x64xf32> to vector<32x64xf32>
    %110 = arith.mulf %108, %109 : vector<32x64xf32>
    %111 = vector.broadcast %90 : vector<1x64xf32> to vector<32x64xf32>
    %112 = arith.addf %110, %111 : vector<32x64xf32>
    %113 = arith.truncf %112 : vector<32x64xf32> to vector<32x64xbf16>
    %c0_49 = arith.constant 0 : index
    %c0_50 = arith.constant 0 : index
    %c0_51 = arith.constant 0 : index
    %114 = vector.load %arg10[%c0_49, %c0_50, %c0_51] : memref<1x64x2048xbf16, #tpu.memory_space<vmem>>, vector<1x64x2048xbf16>
    %115 = vector.shape_cast %114 : vector<1x64x2048xbf16> to vector<64x2048xbf16>
    %cst_52 = arith.constant dense<0.000000e+00> : vector<32x2048xf32>
    %116 = tpu.matmul %113, %115, %cst_52 {dimension_numbers = #tpu.dot_dimension_numbers<[1], [0], [0], [1], [0, 0, 1, 1], [], []>} : vector<32x64xbf16>, vector<64x2048xbf16>, vector<32x2048xf32> -> vector<32x2048xf32>
    %c0_53 = arith.constant 0 : index
    %c0_54 = arith.constant 0 : index
    %c0_55 = arith.constant 0 : index
    %117 = vector.load %arg11[%c0_53, %c0_54, %c0_55] : memref<1x1x2048xf32, #tpu.memory_space<vmem>>, vector<1x1x2048xf32>
    %118 = vector.shape_cast %117 : vector<1x1x2048xf32> to vector<1x2048xf32>
    %119 = vector.broadcast %118 : vector<1x2048xf32> to vector<32x2048xf32>
    %120 = arith.addf %116, %119 : vector<32x2048xf32>
    %cst_56 = arith.constant 0.000000e+00 : f32
    %121 = vector.broadcast %cst_56 : f32 to vector<32x2048xf32>
    %122 = arith.maximumf %120, %121 : vector<32x2048xf32>
    %123 = arith.truncf %122 : vector<32x2048xf32> to vector<32x2048xbf16>
    %c0_57 = arith.constant 0 : index
    %c0_58 = arith.constant 0 : index
    %c0_59 = arith.constant 0 : index
    %124 = vector.load %arg12[%c0_57, %c0_58, %c0_59] : memref<1x2048x64xbf16, #tpu.memory_space<vmem>>, vector<1x2048x64xbf16>
    %125 = vector.shape_cast %124 : vector<1x2048x64xbf16> to vector<2048x64xbf16>
    %cst_60 = arith.constant dense<0.000000e+00> : vector<32x64xf32>
    %126 = tpu.matmul %123, %125, %cst_60 {dimension_numbers = #tpu.dot_dimension_numbers<[1], [0], [0], [1], [0, 0, 1, 1], [], []>} : vector<32x2048xbf16>, vector<2048x64xbf16>, vector<32x64xf32> -> vector<32x64xf32>
    %c0_61 = arith.constant 0 : index
    %c0_62 = arith.constant 0 : index
    %c0_63 = arith.constant 0 : index
    %127 = vector.load %arg13[%c0_61, %c0_62, %c0_63] : memref<1x1x64xf32, #tpu.memory_space<vmem>>, vector<1x1x64xf32>
    %128 = vector.shape_cast %127 : vector<1x1x64xf32> to vector<1x64xf32>
    %129 = vector.broadcast %128 : vector<1x64xf32> to vector<32x64xf32>
    %130 = arith.addf %126, %129 : vector<32x64xf32>
    %131 = arith.addf %112, %130 : vector<32x64xf32>
    %c0_64 = arith.constant 0 : index
    %c0_65 = arith.constant 0 : index
    %c0_66 = arith.constant 0 : index
    %132 = vector.load %arg14[%c0_64, %c0_65, %c0_66] : memref<1x1x64xf32, #tpu.memory_space<vmem>>, vector<1x1x64xf32>
    %133 = vector.shape_cast %132 : vector<1x1x64xf32> to vector<1x64xf32>
    %c0_67 = arith.constant 0 : index
    %c0_68 = arith.constant 0 : index
    %c0_69 = arith.constant 0 : index
    %134 = vector.load %arg15[%c0_67, %c0_68, %c0_69] : memref<1x1x64xf32, #tpu.memory_space<vmem>>, vector<1x1x64xf32>
    %135 = vector.shape_cast %134 : vector<1x1x64xf32> to vector<1x64xf32>
    %cst_70 = arith.constant dense<0.000000e+00> : vector<32xf32>
    %136 = vector.multi_reduction <add>, %131, %cst_70 [1] : vector<32x64xf32> to vector<32xf32>
    %137 = vector.shape_cast %136 : vector<32xf32> to vector<32x1xf32>
    %cst_71 = arith.constant 6.400000e+01 : f32
    %138 = vector.broadcast %cst_71 : f32 to vector<32x1xf32>
    %139 = arith.divf %137, %138 : vector<32x1xf32>
    %140 = vector.broadcast %139 : vector<32x1xf32> to vector<32x64xf32>
    %141 = arith.subf %131, %140 : vector<32x64xf32>
    %142 = arith.mulf %141, %141 : vector<32x64xf32>
    %cst_72 = arith.constant dense<0.000000e+00> : vector<32xf32>
    %143 = vector.multi_reduction <add>, %142, %cst_72 [1] : vector<32x64xf32> to vector<32xf32>
    %144 = vector.shape_cast %143 : vector<32xf32> to vector<32x1xf32>
    %cst_73 = arith.constant 6.400000e+01 : f32
    %145 = vector.broadcast %cst_73 : f32 to vector<32x1xf32>
    %146 = arith.divf %144, %145 : vector<32x1xf32>
    %147 = vector.broadcast %139 : vector<32x1xf32> to vector<32x64xf32>
    %148 = arith.subf %131, %147 : vector<32x64xf32>
    %cst_74 = arith.constant 9.99999974E-6 : f32
    %149 = vector.broadcast %cst_74 : f32 to vector<32x1xf32>
    %150 = arith.addf %146, %149 : vector<32x1xf32>
    %151 = math.rsqrt %150 : vector<32x1xf32>
    %152 = vector.broadcast %151 : vector<32x1xf32> to vector<32x64xf32>
    %153 = arith.mulf %148, %152 : vector<32x64xf32>
    %154 = vector.broadcast %133 : vector<1x64xf32> to vector<32x64xf32>
    %155 = arith.mulf %153, %154 : vector<32x64xf32>
    %156 = vector.broadcast %135 : vector<1x64xf32> to vector<32x64xf32>
    %157 = arith.addf %155, %156 : vector<32x64xf32>
    %c0_75 = arith.constant 0 : index
    %c0_76 = arith.constant 0 : index
    %158 = vector.load %arg19[%c0_75, %c0_76] : memref<32x64xf32, #tpu.memory_space<vmem>>, vector<32x64xf32>
    tpu.vector_store %arg19[%c0_75, %c0_76], %157 {strides = array<i32>} : memref<32x64xf32, #tpu.memory_space<vmem>>, vector<32x64xf32>,
    %c1_i32 = arith.constant 1 : i32
    %159 = arith.cmpi eq, %arg0, %c1_i32 : i32
    %160 = arith.extui %159 : i1 to i32
    %c0_i32_77 = arith.constant 0 : i32
    %161 = arith.cmpi ne, %160, %c0_i32_77 : i32
    scf.if %161 {
      %162 = vector.shape_cast %157 : vector<32x64xf32> to vector<2x16x64xf32>
      %cst_78 = arith.constant dense<0.000000e+00> : vector<2x64xf32>
      %163 = vector.multi_reduction <add>, %162, %cst_78 [1] : vector<2x16x64xf32> to vector<2x64xf32>
      %cst_79 = arith.constant 1.600000e+01 : f32
      %164 = vector.broadcast %cst_79 : f32 to vector<2x64xf32>
      %165 = arith.divf %163, %164 : vector<2x64xf32>
      %c0_80 = arith.constant 0 : index
      %c0_81 = arith.constant 0 : index
      %166 = vector.load %arg16[%c0_80, %c0_81] : memref<64x2xf32, #tpu.memory_space<vmem>>, vector<64x2xf32>
      %cst_82 = arith.constant dense<0.000000e+00> : vector<2x2xf32>
      %167 = tpu.matmul %165, %166, %cst_82 {dimension_numbers = #tpu.dot_dimension_numbers<[1], [0], [0], [1], [0, 0, 1, 1], [], []>} : vector<2x64xf32>, vector<64x2xf32>, vector<2x2xf32> -> vector<2x2xf32>
      %c0_83 = arith.constant 0 : index
      %c0_84 = arith.constant 0 : index
      %168 = vector.load %arg17[%c0_83, %c0_84] : memref<1x2xf32, #tpu.memory_space<vmem>>, vector<1x2xf32>
      %169 = vector.broadcast %168 : vector<1x2xf32> to vector<2x2xf32>
      %170 = arith.addf %167, %169 : vector<2x2xf32>
      %c0_85 = arith.constant 0 : index
      %c0_86 = arith.constant 0 : index
      %171 = vector.load %arg18[%c0_85, %c0_86] : memref<2x2xf32, #tpu.memory_space<vmem>>, vector<2x2xf32>
      tpu.vector_store %arg18[%c0_85, %c0_86], %170 {strides = array<i32>} : memref<2x2xf32, #tpu.memory_space<vmem>>, vector<2x2xf32>,
    } else {
    }
    return
  }
  func.func @transform_0(%arg0: i32) -> (i32, i32) {
    %c0_i32 = arith.constant 0 : i32
    %c0_i32_0 = arith.constant 0 : i32
    %c0_i32_1 = arith.constant 0 : i32
    return %c0_i32, %c0_i32_0 : i32, i32
  }
  func.func @transform_1(%arg0: i32) -> (i32, i32) {
    %c0_i32 = arith.constant 0 : i32
    %c0_i32_0 = arith.constant 0 : i32
    %c0_i32_1 = arith.constant 0 : i32
    return %c0_i32, %c0_i32_0 : i32, i32
  }
  func.func @transform_2(%arg0: i32) -> (i32, i32) {
    %c0_i32 = arith.constant 0 : i32
    %c0_i32_0 = arith.constant 0 : i32
    %c0_i32_1 = arith.constant 0 : i32
    return %c0_i32, %c0_i32_0 : i32, i32
  }
  func.func @transform_3(%arg0: i32) -> (i32, i32, i32) {
    %c0_i32 = arith.constant 0 : i32
    %c0_i32_0 = arith.constant 0 : i32
    %c0_i32_1 = arith.constant 0 : i32
    return %arg0, %c0_i32, %c0_i32_0 : i32, i32, i32
  }
  func.func @transform_4(%arg0: i32) -> (i32, i32, i32) {
    %c0_i32 = arith.constant 0 : i32
    %c0_i32_0 = arith.constant 0 : i32
    %c0_i32_1 = arith.constant 0 : i32
    return %arg0, %c0_i32, %c0_i32_0 : i32, i32, i32
  }
  func.func @transform_5(%arg0: i32) -> (i32, i32, i32) {
    %c0_i32 = arith.constant 0 : i32
    %c0_i32_0 = arith.constant 0 : i32
    %c0_i32_1 = arith.constant 0 : i32
    return %arg0, %c0_i32, %c0_i32_0 : i32, i32, i32
  }
  func.func @transform_6(%arg0: i32) -> (i32, i32, i32) {
    %c0_i32 = arith.constant 0 : i32
    %c0_i32_0 = arith.constant 0 : i32
    %c0_i32_1 = arith.constant 0 : i32
    return %arg0, %c0_i32, %c0_i32_0 : i32, i32, i32
  }
  func.func @transform_7(%arg0: i32) -> (i32, i32, i32) {
    %c0_i32 = arith.constant 0 : i32
    %c0_i32_0 = arith.constant 0 : i32
    %c0_i32_1 = arith.constant 0 : i32
    return %arg0, %c0_i32, %c0_i32_0 : i32, i32, i32
  }
  func.func @transform_8(%arg0: i32) -> (i32, i32, i32) {
    %c0_i32 = arith.constant 0 : i32
    %c0_i32_0 = arith.constant 0 : i32
    %c0_i32_1 = arith.constant 0 : i32
    return %arg0, %c0_i32, %c0_i32_0 : i32, i32, i32
  }
  func.func @transform_9(%arg0: i32) -> (i32, i32, i32) {
    %c0_i32 = arith.constant 0 : i32
    %c0_i32_0 = arith.constant 0 : i32
    %c0_i32_1 = arith.constant 0 : i32
    return %arg0, %c0_i32, %c0_i32_0 : i32, i32, i32
  }
  func.func @transform_10(%arg0: i32) -> (i32, i32, i32) {
    %c0_i32 = arith.constant 0 : i32
    %c0_i32_0 = arith.constant 0 : i32
    %c0_i32_1 = arith.constant 0 : i32
    return %arg0, %c0_i32, %c0_i32_0 : i32, i32, i32
  }
  func.func @transform_11(%arg0: i32) -> (i32, i32, i32) {
    %c0_i32 = arith.constant 0 : i32
    %c0_i32_0 = arith.constant 0 : i32
    %c0_i32_1 = arith.constant 0 : i32
    return %arg0, %c0_i32, %c0_i32_0 : i32, i32, i32
  }
  func.func @transform_12(%arg0: i32) -> (i32, i32, i32) {
    %c0_i32 = arith.constant 0 : i32
    %c0_i32_0 = arith.constant 0 : i32
    %c0_i32_1 = arith.constant 0 : i32
    return %arg0, %c0_i32, %c0_i32_0 : i32, i32, i32
  }
  func.func @transform_13(%arg0: i32) -> (i32, i32, i32) {
    %c0_i32 = arith.constant 0 : i32
    %c0_i32_0 = arith.constant 0 : i32
    %c0_i32_1 = arith.constant 0 : i32
    return %arg0, %c0_i32, %c0_i32_0 : i32, i32, i32
  }
  func.func @transform_14(%arg0: i32) -> (i32, i32, i32) {
    %c0_i32 = arith.constant 0 : i32
    %c0_i32_0 = arith.constant 0 : i32
    %c0_i32_1 = arith.constant 0 : i32
    return %arg0, %c0_i32, %c0_i32_0 : i32, i32, i32
  }
  func.func @transform_15(%arg0: i32) -> (i32, i32) {
    %c0_i32 = arith.constant 0 : i32
    %c0_i32_0 = arith.constant 0 : i32
    %c0_i32_1 = arith.constant 0 : i32
    return %c0_i32, %c0_i32_0 : i32, i32
  }
  func.func @transform_16(%arg0: i32) -> (i32, i32) {
    %c0_i32 = arith.constant 0 : i32
    %c0_i32_0 = arith.constant 0 : i32
    %c0_i32_1 = arith.constant 0 : i32
    return %c0_i32, %c0_i32_0 : i32, i32
  }
  func.func @transform_17(%arg0: i32) -> (i32, i32) {
    %c0_i32 = arith.constant 0 : i32
    %c0_i32_0 = arith.constant 0 : i32
    %c0_i32_1 = arith.constant 0 : i32
    return %c0_i32, %c0_i32_0 : i32, i32
  }
}

</mosaic_0001>

<bundles_post_ra>
// kernel: tpu_custom_call.1
= control target key start
LH: loop header
LB: loop body
LE: loop exit
PB: predicated region body
PF: predicated region fallthrough
CT: control target
= control target key end

     0   :  { %s7556_s0 = inlined_call_operand.vmem [shape: f32[2,16], index: 0, kind: input, shape index: {}]   ;;  %s7557_s1 = inlined_call_operand.vmem [shape: f32[1,64], index: 1, kind: input, shape index: {}]   ;;  %s7558_s2 = inlined_call_operand.vmem [shape: f32[16,64], index: 2, kind: input, shape index: {}]   ;;  %s7559_s3 = inlined_call_operand.vmem [shape: bf16[2,64,192], index: 3, kind: input, shape index: {}]   ;;  %s7560_s4 = inlined_call_operand.vmem [shape: f32[2,1,192], index: 4, kind: input, shape index: {}]   ;;  %s7561_s5 = inlined_call_operand.vmem [shape: bf16[2,64,64], index: 5, kind: input, shape index: {}]   ;;  %s7562_s6 = inlined_call_operand.vmem [shape: f32[2,1,64], index: 6, kind: input, shape index: {}]   ;;  %s7563_s7 = inlined_call_operand.vmem [shape: f32[2,1,64], index: 7, kind: input, shape index: {}]   ;;  %s7564_s8 = inlined_call_operand.vmem [shape: f32[2,1,64], index: 8, kind: input, shape index: {}]   ;;  %s7565_s9 = inlined_call_operand.vmem [shape: bf16[2,64,2048], index: 9, kind: input, shape index: {}]   ;;  %s7566_s10 = inlined_call_operand.vmem [shape: f32[2,1,2048], index: 10, kind: input, shape index: {}]   ;;  %s7567_s11 = inlined_call_operand.vmem [shape: bf16[2,2048,64], index: 11, kind: input, shape index: {}]   ;;  %s7568_s12 = inlined_call_operand.vmem [shape: f32[2,1,64], index: 12, kind: input, shape index: {}]   ;;  %s7569_s13 = inlined_call_operand.vmem [shape: f32[2,1,64], index: 13, kind: input, shape index: {}]   ;;  %s7570_s14 = inlined_call_operand.vmem [shape: f32[2,1,64], index: 14, kind: input, shape index: {}]   ;;  %s7571_s15 = inlined_call_operand.vmem [shape: f32[64,2], index: 15, kind: input, shape index: {}]   ;;  %s7572_s16 = inlined_call_operand.vmem [shape: f32[1,2], index: 16, kind: input, shape index: {}]   ;;  %s7573_s17 = inlined_call_operand.hbm [shape: f32[2,2], index: 17, kind: output, shape index: {}]  }
   0x1   :  { %7577 = sst [smem:[#allocation10_spill]] %s7556_s0 }
   0x2   :  { %7578 = sst [smem:[#allocation11_spill]] %s7557_s1 }
   0x3   :  { %7579 = sst [smem:[#allocation12_spill]] %s7559_s3 }
   0x4   :  { %7580 = sst [smem:[#allocation13_spill]] %s7560_s4 }
   0x5   :  { %7581 = sst [smem:[#allocation14_spill]] %s7561_s5 }
   0x6   :  { %7582 = sst [smem:[#allocation15_spill]] %s7571_s15 }
   0x7   :  { %7583 = sst [smem:[#allocation16_spill]] %s7572_s16 }
   0x8   :  { %7584 = sst [smem:[#allocation17_spill]] %s7573_s17 }
   0x9   :  { %22 = vsyncpa [#allocation5], 0  ;;  %s6644_s24 = smov 0  }
   0xa LB: > { %7585 = sst [smem:[#allocation7_spill]] %s6541_s24  ;;  %s6650_s25 = sadd.s32 4294967295, %s6541_s24   ;;  %s6541_s24 = sphi %s6644_s24, %s28_s24  }
   0xb   : > { %p5506_p0 = scmp.ge.s32.totalorder %s6541_s24, 1  ;;  %p579_p1 = scmp.lt.s32.totalorder %s6541_s24, 3 }
   0xd   : > { %p580_p2 = pnand %p5506_p0, %p579_p1 }
   0xf   : > { %583 = sbr.rel (%p580_p2) target bundleno = 4732 (0x127c), region = 88 }
  0x14   : > { %p667_p3 = scmp.lt.s32.totalorder %s6650_s25, 1  ;;  %s7586_s3 = sld [smem:[#allocation12_spill]] }
  0x15   : > { %s7587_s4 = sld [smem:[#allocation13_spill]]  ;;  %p5517_p4 = scmp.ne.s32.totalorder %s6650_s25, 0 }
  0x16   : > { %s6656_s26 = scalar_select %p667_p3, %s6650_s25, 1 }
  0x17   : > { %s7589_s5 = sld [smem:[#allocation14_spill]] }
  0x18   : > { %s5804_s27 = sshll.u32 %s6656_s26, 6  ;;  %s5509_s28 = sshll.u32 %s6656_s26, 1 }
  0x19   : > { %s5805_s20 = sshll.u32 %s6656_s26, 5  ;;  %s5514_s21 = sshll.u32 %s6656_s26, 4 }
  0x1a   : > { %s6663_s30 = scalar_lea.vmem %s7586_s3, %s5804_s27  ;;  %s6698_s17 = scalar_lea.vmem %s7566_s10, %s5514_s21 }
  0x1b   : > { %s6668_s1 = scalar_lea.vmem %s7587_s4, %s5509_s28  ;;  %s5806_s28 = sshll.u32 %s6656_s26, 9 }
  0x1c   : > { %7588 = sst [smem:[#allocation8_spill]] %s6668_s1  ;;  %s6692_s1 = scalar_lea.vmem %s7565_s9, %s5806_s28 }
  0x1d   : > { %s6678_s16 = scalar_lea.vmem %s7589_s5, %s5805_s20  ;;  %s5807_s24 = sshll.u32 %s6656_s26, 10 }
  0x1e   : > { %s6704_s29 = scalar_lea.vmem %s7567_s11, %s5807_s24  ;;  %s706_s18 = scalar_lea.vmem %s7568_s12, %s6656_s26 }
  0x1f   : > { %s709_s28 = scalar_lea.vmem %s7569_s13, %s6656_s26  ;;  %s712_s23 = scalar_lea.vmem %s7570_s14, %s6656_s26 }
  0x20   : > { %717 = sbr.rel (%p5517_p4) target bundleno = 169 (0xa9), region = 92  ;;  %s7590_s24 = sld [smem:[#allocation10_spill]] (!%p5517_p4) }
  0x21   : > { %s7591_s20 = sld [smem:[#allocation11_spill]] (!%p5517_p4) }
  0x25   : > { %v719_v0 = vlaneseq  ;;  %v752_v8 = vld [vmem:[%s7558_s2] sm:$0xff]  ;;  %vm758_vm0 = vcmask 523264   ;;  %v753_v15 = vld [vmem:[%s7558_s2 + $0x8] sm:$0xff] }
  0x26   : > { %v718_v2 = vld [vmem:[%s7590_s24] sm:$0x3] }
  0x27   : > { %v720_v1 = vshrl.u32 %v719_v0, 7  ;;  %v5518_v7 = vld [vmem:[%s7591_s20] ss:$0 sm:$0xff] }
  0x29   : > { %v732_v3 = vsub.s32 1, %v720_v1  ;;  %v721_v4 = vsub.s32 0, %v720_v1 }
  0x2b   : > { %v733_v5 = vrot.slane %v718_v2, %v732_v3  ;;  %v722_v6 = vrot.slane %v718_v2, %v721_v4 }
  0x2d   : > { %735 = vbcast.lane.b32.xlu1 %v733_v5, 256  ;;  %724 = vbcast.lane.b32.xlu0 %v722_v6, 256 }
  0x31   : > { %739 = vbcast.lane.b32.xlu1 %v733_v5, 264  ;;  %728 = vbcast.lane.b32.xlu0 %v722_v6, 264 }
  0x9f   : > { %v736_v9 = vpop.permute.xlu1 %735  ;;  %v725_v10 = vpop.permute.xlu0 %724 }
  0xa0   : > { %v750_v11 = vmul.f32 %v5518_v7, %v736_v9  ;;  %v748_v12 = vmul.f32 %v5518_v7, %v725_v10 }
  0xa2   : > { %v756_v13 = vadd.f32 %v752_v8, %v750_v11  ;;  %v754_v14 = vadd.f32 %v752_v8, %v748_v12 }
  0xa3   : > { %v740_v16 = vpop.permute.xlu1 %739  ;;  %v729_v17 = vpop.permute.xlu0 %728 }
  0xa4   : > { %761 = vst.msk [vmem:[#allocation2 + $0x10] sm:$0xff] %vm758_vm0, %v756_v13  ;;  %759 = vst.msk [vmem:[#allocation2] sm:$0xff] %vm758_vm0, %v754_v14  ;;  %v751_v18 = vmul.f32 %v5518_v7, %v740_v16  ;;  %v749_v19 = vmul.f32 %v5518_v7, %v729_v17 }
  0xa6   : > { %v757_v20 = vadd.f32 %v753_v15, %v751_v18  ;;  %v755_v21 = vadd.f32 %v753_v15, %v749_v19 }
  0xa8   : > { %762 = vst.msk [vmem:[#allocation2 + $0x18] sm:$0xff] %vm758_vm0, %v757_v20  ;;  %760 = vst.msk [vmem:[#allocation2 + $0x8] sm:$0xff] %vm758_vm0, %v755_v21 }
  0xa9 PF: > { %v6279_v22 = vld [vmem:[%s6663_s30 + $0x34] ss:$8 sps:$4 sm:$0xff]   ;;  %v6281_v23 = vld [vmem:[%s6663_s30 + $0x30] ss:$8 sps:$4 sm:$0xff]   ;;  %v6543_v24 = vmov 0   ;;  %vm829_vm1 = vcmask 523264   ;;  %v779_v37 = vlaneseq  ;;  %s7593_s3 = scalar_lea.vmem %s7562_s6, %s6656_s26 }
  0xaa   : > { %868 = vmatprep.mubr.bf16.mxu0 %v6543_v24  ;;  %844 = vmatprep.subr.bf16.mxu0 %v6279_v22  ;;  %v6282_v25 = vld [vmem:[%s6663_s30 + $0x24] ss:$8 sps:$4 sm:$0xff]   ;;  %v6284_v26 = vld [vmem:[%s6663_s30 + $0x20] ss:$8 sps:$4 sm:$0xff]   ;;  %v6285_v27 = vld [vmem:[%s6663_s30 + $0x14] ss:$8 sps:$4 sm:$0xff]  }
  0xab   : > { %845 = vmatpush1.bf16.msra.mxu0 %v6281_v23  ;;  %v6287_v28 = vld [vmem:[%s6663_s30 + $0x10] ss:$8 sps:$4 sm:$0xff]   ;;  %v6288_v29 = vld [vmem:[%s6663_s30 + $0x4] ss:$8 sps:$4 sm:$0xff]   ;;  %v6290_v30 = vld [vmem:[%s6663_s30] ss:$8 sps:$4 sm:$0xff]  }
  0xac   : > { %846 = vmatprep.subr.bf16.mxu0 %v6282_v25  ;;  %s7592_s19 = sld [smem:[#allocation8_spill]]  ;;  %v763_v31 = vld [vmem:[#allocation2] sm:$0xff]  ;;  %v765_v34 = vld [vmem:[#allocation2 + $0x10] sm:$0xff]  ;;  %v6743_v38 = vshrl.u32 %v779_v37, 7  ;;  %vm895_vm2 = vcmask 130048   ;;  %s6544_s30 = smov 64  }
  0xad   : > { %s6545_s21 = smov 48   ;;  %s6546_s22 = smov 112   ;;  %vm1698_vm3 = vcmask 261248   ;;  %vm2119_vm4 = vcmask 392448   ;;  %vm2540_vm5 = vcmask 523648  }
  0xae   : > { %v6746_v39 = vsub.s32 0, %v6743_v38  ;;  %v6755_v46 = vsub.s32 1, %v6743_v38  ;;  %s6547_s24 = smov 32   ;;  %s6548_s27 = smov 96  }
  0xaf   : > { %847 = vmatpush1.bf16.msra.mxu0 %v6284_v26  ;;  %v764_v32 = vld [vmem:[#allocation2 + $0x8] sm:$0xff]  ;;  %v766_v35 = vld [vmem:[#allocation2 + $0x18] sm:$0xff]  ;;  %s6549_s5 = smov 16   ;;  %s6550_s20 = smov 80  }
  0xb0   : > { %848 = vmatprep.subr.bf16.mxu0 %v6285_v27  ;;  %v767_v33 = vpack.c.bf16 %v764_v32, %v763_v31  ;;  %v768_v36 = vpack.c.bf16 %v766_v35, %v765_v34  ;;  %p5797_p5 = scmp.ne.s32.totalorder %s6650_s25, 1 }
  0xb2   : > { %v777_v40 = vld [vmem:[%s7592_s19] sm:$0x3]  ;;  %s7594_s19 = scalar_lea.vmem %s7563_s7, %s6656_s26 }
  0xb3   : > { %849 = vmatpush1.bf16.msra.mxu0 %v6287_v28  ;;  %v782_v41 = vrot.slane %v777_v40, %v6746_v39  ;;  %v786_v50 = vrot.slane %v777_v40, %v6755_v46 }
  0xb4   : > { %850 = vmatprep.subr.bf16.mxu0 %v6288_v29 }
  0xb7   : > { %851 = vmatpush1.bf16.msra.mxu0 %v6290_v30 }
  0xba   : > { %5527 = vmatmul.mubr.msk.bf16.vlgmr.msra.gmra.mxu0 %vm829_vm1, %v767_v33 }
  0xbb   : > { %878 = vmatprep.mubr.bf16.mxu0 %v6543_v24 }
  0xc2   : > { %5528 = vmatmul.mubr.msk.bf16.gmra.mxu0 %vm829_vm1, %v768_v36 }
 0x17a   : > { %v870_v42 = vpop.f32.mrf.mxu0 }
 0x17b   : > { %v6750_v43 = vadd.f32 %v870_v42, %v782_v41 }
 0x17c   : > { %v872_v44 = vpop.f32.mrf.mxu0 }
 0x17d   : > { %6115 = vmatprep.mubr.msk.f32.mxu1 %vm895_vm2, %v6750_v43  ;;  %v6785_v62 = vadd.f32 %v872_v44, %v786_v50 }
 0x17e   : > { %v874_v45 = vpop.f32.mrf.mxu0 }
 0x17f   : > { %v6757_v47 = vadd.f32 %v874_v45, %v782_v41 }
 0x180   : > { %v876_v48 = vpop.f32.mrf.mxu0 }
 0x181   : > { %893 = vrot.lane.b32.xlu0 %v6757_v47, %s6544_s30  ;;  %v6780_v60 = vadd.f32 %v876_v48, %v786_v50 }
 0x182   : > { %v880_v49 = vpop.f32.mrf.mxu0 }
 0x183   : > { %v6766_v55 = vadd.f32 %v880_v49, %v782_v41 }
 0x184   : > { %v882_v51 = vpop.f32.mrf.mxu0 }
 0x185   : > { %v6761_v52 = vadd.f32 %v882_v51, %v786_v50  ;;  %891 = vrot.lane.b32.xlu0 %v6750_v43, %s6544_s30 }
 0x186   : > { %v884_v53 = vpop.f32.mrf.mxu0 }
 0x187   : > { %v6764_v54 = vadd.f32 %v884_v53, %v782_v41 }
 0x188   : > { %v886_v61 = vpop.f32.mrf.mxu0 }
 0x189   : > { %983 = vrot.lane.b32.xlu1 %v6764_v54, %s6544_s30  ;;  %v6790_v63 = vadd.f32 %v886_v61, %v786_v50 }
 0x18d   : > { %981 = vrot.lane.b32.xlu1 %v6766_v55, %s6544_s30 }
 0x1f3   : > { %v894_v56 = vpop.permute.xlu0 %893 }
 0x1f4   : > { %6111 = vmatprep.subr.msk.mxu1 %vm895_vm2, %v894_v56 }
 0x1f5   : > { %6112 = vmatpush3.xpose.msk.msra.mxu1 %vm895_vm2, %v894_v56 }
 0x1f7   : > { %v892_v57 = vpop.permute.xlu0 %891 }
 0x1f8   : > { %6113 = vmatprep.subr.msk.mxu1 %vm895_vm2, %v892_v57 }
 0x1f9   : > { %6114 = vmatpush3.xpose.msk.msra.mxu1 %vm895_vm2, %v892_v57 }
 0x1fb   : > { %v984_v58 = vpop.permute.xlu1 %983 }
 0x1fc   : > { %6116 = vmatmul.mubr.msk.f32.vlgmr.msra.gmra.mxu1 %vm895_vm2, %v6757_v47  ;;  %6118 = vmatprep.subr.msk.mxu1 %vm895_vm2, %v984_v58 }
 0x1fd   : > { %6119 = vmatpush3.xpose.msk.msra.mxu1 %vm895_vm2, %v984_v58  ;;  %6122 = vmatprep.mubr.msk.f32.mxu1 %vm895_vm2, %v6766_v55 }
 0x1ff   : > { %v982_v59 = vpop.permute.xlu1 %981 }
 0x200   : > { %6120 = vmatprep.subr.msk.mxu1 %vm895_vm2, %v982_v59 }
 0x201   : > { %6121 = vmatpush3.xpose.msk.msra.mxu1 %vm895_vm2, %v982_v59 }
 0x202   : > { %6125 = vmatprep.subr.mxu1 %v6780_v60 }
 0x204   : > { %6123 = vmatmul.mubr.msk.f32.vlgmr.msra.gmra.mxu1 %vm895_vm2, %v6764_v54 }
 0x205   : > { %6126 = vmatpush3.msra.mxu1 %v6780_v60 }
 0x206   : > { %6127 = vmatprep.subr.mxu1 %v6785_v62 }
 0x207   : > { %6128 = vmatpush3.msra.mxu1 %v6785_v62 }
 0x208   : > { %6132 = vmatprep.subr.mxu1 %v6790_v63 }
 0x2bc   : > { %v6117_v0 = vpop.f32.mrf.mxu1 }
 0x2bd   : > { %v1071_v1 = vsel %vm895_vm2, %v6117_v0, -inf }
 0x2be   : > { %1072 = vmax.xlane.f32.xlu1 %v1071_v1  ;;  %v970_v2 = vpop.f32.mrf.mxu1 }
 0x2bf   : > { %v1068_v3 = vsel %vm895_vm2, %v970_v2, -inf }
 0x2c0   : > { %1069 = vmax.xlane.f32.xlu0 %v1068_v3 }
 0x2c4   : > { %v6124_v4 = vpop.f32.mrf.mxu1 }
 0x2c5   : > { %v1077_v7 = vsel %vm895_vm2, %v6124_v4, -inf }
 0x2c6   : > { %v1059_v5 = vpop.f32.mrf.mxu1 }
 0x2c7   : > { %v1074_v6 = vsel %vm895_vm2, %v1059_v5, -inf }
 0x2c8   : > { %1075 = vmax.xlane.f32.xlu0 %v1074_v6 }
 0x2cc   : > { %1078 = vmax.xlane.f32.xlu0 %v1077_v7 }
 0x2cf   : > { %1375 = vrot.lane.b32.xlu1 %v6764_v54, %s6545_s21 }
 0x347   : > { %v1073_v8 = vpop.xlane.xlu1 %1072 }
 0x348   : > { %v1081_v9 = vsub.f32 %v6117_v0, %v1073_v8 }
 0x349   : > { %v1070_v10 = vpop.xlane.xlu0 %1069 }
 0x34a   : > { %v1086_v11 = vmul.f32 1.442695, %v1081_v9  ;;  %v1080_v12 = vsub.f32 %v970_v2, %v1070_v10 }
 0x34b   : > { %v1376_v29 = vpop.permute.xlu1 %1375 }
 0x34c   : > { %6423 = vpow2.f32 %v1086_v11  ;;  %v1084_v13 = vmul.f32 1.442695, %v1080_v12 }
 0x34e   : > { %6425 = vpow2.f32 %v1084_v13 }
 0x351   : > { %v1076_v14 = vpop.xlane.xlu0 %1075 }
 0x352   : > { %v1082_v25 = vsub.f32 %v1059_v5, %v1076_v14 }
 0x354   : > { %v1088_v26 = vmul.f32 1.442695, %v1082_v25 }
 0x355   : > { %v1079_v15 = vpop.xlane.xlu0 %1078 }
 0x356   : > { %v1083_v16 = vsub.f32 %v6124_v4, %v1079_v15 }
 0x358   : > { %v1090_v17 = vmul.f32 1.442695, %v1083_v16 }
 0x359   : > { %v6424_v18 = vpop.eup %6423 }
 0x35a   : > { %6427 = vpow2.f32 %v1090_v17  ;;  %v1095_v19 = vsel %vm895_vm2, %v6424_v18, 0.0 }
 0x35b   : > { %v6426_v20 = vpop.eup %6425  ;;  %1096 = vadd.xlane.f32.xlu0 %v1095_v19  ;;  %6429 = vpow2.f32 %v1088_v26 }
 0x35c   : > { %v1092_v21 = vsel %vm895_vm2, %v6426_v20, 0.0 }
 0x35d   : > { %1093 = vadd.xlane.f32.xlu1 %v1092_v21 }
 0x367   : > { %v6428_v22 = vpop.eup %6427 }
 0x368   : > { %v1101_v23 = vsel %vm895_vm2, %v6428_v22, 0.0  ;;  %v6430_v27 = vpop.eup %6429 }
 0x369   : > { %1102 = vadd.xlane.f32.xlu0 %v1101_v23  ;;  %v1098_v28 = vsel %vm895_vm2, %v6430_v27, 0.0 }
 0x36e   : > { %1369 = vrot.lane.b32.xlu1 %v6766_v55, %s6546_s22 }
 0x37f   : > { %1373 = vrot.lane.b32.xlu0 %v6766_v55, %s6545_s21 }
 0x392   : > { %1099 = vadd.xlane.f32.xlu1 %v1098_v28 }
 0x3a3   : > { %1371 = vrot.lane.b32.xlu1 %v6764_v54, %s6546_s22 }
 0x3e4   : > { %v1097_v30 = vpop.xlane.xlu0 %1096 }
 0x3e5   : > { %6431 = vrcp.f32 %v1097_v30 }
 0x3e6   : > { %v1094_v31 = vpop.xlane.xlu1 %1093 }
 0x3e7   : > { %6433 = vrcp.f32 %v1094_v31 }
 0x3ea   : > { %v1370_v36 = vpop.permute.xlu1 %1369 }
 0x3f2   : > { %v6432_v32 = vpop.eup %6431  ;;  %v1103_v37 = vpop.xlane.xlu0 %1102 }
 0x3f3   : > { %v1107_v35 = vmul.f32 %v6432_v32, %v6424_v18  ;;  %6435 = vrcp.f32 %v1103_v37 }
 0x3f4   : > { %v6434_v33 = vpop.eup %6433 }
 0x3f5   : > { %v1105_v34 = vmul.f32 %v6434_v33, %v6426_v20 }
 0x3f6   : > { %v1374_v48 = vpop.permute.xlu0 %1373 }
 0x3f7   : > { %6129 = vmatprep.mubr.msk.f32.mxu1 %vm895_vm2, %v1105_v34 }
 0x3f8   : > { %6130 = vmatmul.mubr.msk.f32.vlgmr.msra.gmra.mxu1 %vm895_vm2, %v1107_v35 }
 0x3f9   : > { %6133 = vmatpush3.msra.mxu1 %v6790_v63 }
 0x3fa   : > { %6134 = vmatprep.subr.mxu1 %v6761_v52 }
 0x3fb   : > { %6135 = vmatpush3.msra.mxu1 %v6761_v52 }
 0x3fc   : > { %6146 = vmatprep.subr.msk.mxu1 %vm895_vm2, %v1376_v29 }
 0x400   : > { %v6436_v41 = vpop.eup %6435 }
 0x401   : > { %v1111_v45 = vmul.f32 %v6436_v41, %v6428_v22 }
 0x41b   : > { %v1100_v40 = vpop.xlane.xlu1 %1099 }
 0x41c   : > { %6437 = vrcp.f32 %v1100_v40 }
 0x41f   : > { %v1372_v49 = vpop.permute.xlu1 %1371 }
 0x429   : > { %v6438_v42 = vpop.eup %6437 }
 0x42a   : > { %v1109_v44 = vmul.f32 %v6438_v42, %v6430_v27 }
 0x42c   : > { %6136 = vmatprep.mubr.msk.f32.mxu1 %vm895_vm2, %v1109_v44 }
 0x42d   : > { %6137 = vmatmul.mubr.msk.f32.vlgmr.msra.gmra.mxu1 %vm895_vm2, %v1111_v45 }
 0x42e   : > { %6147 = vmatpush3.xpose.msk.msra.mxu1 %vm895_vm2, %v1376_v29  ;;  %6150 = vmatprep.mubr.msk.f32.mxu1 %vm895_vm2, %v1370_v36 }
 0x42f   : > { %6148 = vmatprep.subr.msk.mxu1 %vm895_vm2, %v1374_v48 }
 0x432   : > { %6149 = vmatpush3.xpose.msk.msra.mxu1 %vm895_vm2, %v1374_v48 }
 0x435   : > { %6151 = vmatmul.mubr.msk.f32.vlgmr.msra.gmra.mxu1 %vm895_vm2, %v1372_v49 }
 0x4b8   : > { %v6131_v50 = vpop.f32.mrf.mxu1 }
 0x4b9   : > { %1275 = vst.msk [vmem:[#allocation3 + $0x8] sm:$0xff] %vm895_vm2, %v6131_v50 }
 0x4ba   : > { %v1184_v51 = vpop.f32.mrf.mxu1 }
 0x4bb   : > { %1274 = vst.msk [vmem:[#allocation3] sm:$0xff] %vm895_vm2, %v1184_v51 }
 0x4ed   : > { %v6138_v53 = vpop.f32.mrf.mxu1 }
 0x4ee   : > { %1277 = vst.msk [vmem:[#allocation3 + $0x18] sm:$0xff] %vm895_vm2, %v6138_v53 }
 0x4ef   : > { %v1265_v56 = vpop.f32.mrf.mxu1 }
 0x4f0   : > { %1276 = vst.msk [vmem:[#allocation3 + $0x10] sm:$0xff] %vm895_vm2, %v1265_v56 }
 0x4f5   : > { %v6152_v57 = vpop.f32.mrf.mxu1 }
 0x4f6   : > { %v1469_v58 = vsel %vm895_vm2, %v6152_v57, -inf }
 0x4f7   : > { %1470 = vmax.xlane.f32.xlu1 %v1469_v58  ;;  %v1451_v59 = vpop.f32.mrf.mxu1 }
 0x4f8   : > { %v1466_v61 = vsel %vm895_vm2, %v1451_v59, -inf }
 0x4f9   : > { %1467 = vmax.xlane.f32.xlu0 %v1466_v61 }
 0x508   : > { %1597 = vrot.lane.b32.xlu1 %v6790_v63, %s6546_s22 }
 0x50c   : > { %1709 = vrot.lane.b32.xlu1 %v6757_v47, %s6547_s24 }
 0x50f   : > { %1595 = vrot.lane.b32.xlu0 %v6761_v52, %s6546_s22 }
 0x510   : > { %1284 = vrot.lane.b32.xlu1 %v6757_v47, %s6545_s21 }
 0x513   : > { %1707 = vrot.lane.b32.xlu0 %v6750_v43, %s6547_s24 }
 0x514   : > { %1282 = vrot.lane.b32.xlu1 %v6750_v43, %s6545_s21 }
 0x518   : > { %1800 = vrot.lane.b32.xlu1 %v6764_v54, %s6547_s24 }
 0x51c   : > { %1278 = vrot.lane.b32.xlu1 %v6750_v43, %s6546_s22 }
 0x520   : > { %1798 = vrot.lane.b32.xlu1 %v6766_v55, %s6547_s24 }
 0x524   : > { %1796 = vrot.lane.b32.xlu1 %v6764_v54, %s6548_s27 }
 0x580   : > { %v1471_v0 = vpop.xlane.xlu1 %1470 }
 0x581   : > { %v1475_v1 = vsub.f32 %v6152_v57, %v1471_v0 }
 0x582   : > { %v1468_v2 = vpop.xlane.xlu0 %1467 }
 0x583   : > { %v1482_v3 = vmul.f32 1.442695, %v1475_v1  ;;  %v1474_v4 = vsub.f32 %v1451_v59, %v1468_v2 }
 0x584   : > { %v1598_v5 = vpop.permute.xlu1 %1597 }
 0x585   : > { %6439 = vpow2.f32 %v1482_v3  ;;  %v1480_v6 = vmul.f32 1.442695, %v1474_v4  ;;  %6160 = vmatprep.subr.mxu1 %v1598_v5 }
 0x586   : > { %6161 = vmatpush3.msra.mxu1 %v1598_v5  ;;  %v1596_v7 = vpop.permute.xlu0 %1595 }
 0x587   : > { %6441 = vpow2.f32 %v1480_v6  ;;  %6162 = vmatprep.subr.mxu1 %v1596_v7 }
 0x588   : > { %v1710_v8 = vpop.permute.xlu1 %1709  ;;  %6163 = vmatpush3.msra.mxu1 %v1596_v7 }
 0x589   : > { %6167 = vmatprep.subr.msk.mxu1 %vm895_vm2, %v1710_v8 }
 0x58a   : > { %v1708_v17 = vpop.permute.xlu0 %1707 }
 0x58c   : > { %v1285_v9 = vpop.permute.xlu1 %1284 }
 0x58d   : > { %6139 = vmatprep.subr.msk.mxu0 %vm895_vm2, %v1285_v9 }
 0x58e   : > { %6140 = vmatpush3.xpose.msk.msra.mxu0 %vm895_vm2, %v1285_v9 }
 0x590   : > { %v1283_v10 = vpop.permute.xlu1 %1282 }
 0x591   : > { %6141 = vmatprep.subr.msk.mxu0 %vm895_vm2, %v1283_v10 }
 0x592   : > { %v6440_v11 = vpop.eup %6439  ;;  %6142 = vmatpush3.xpose.msk.msra.mxu0 %vm895_vm2, %v1283_v10 }
 0x593   : > { %v1493_v12 = vsel %vm895_vm2, %v6440_v11, 0.0 }
 0x594   : > { %v6442_v13 = vpop.eup %6441  ;;  %v1801_v14 = vpop.permute.xlu1 %1800  ;;  %1494 = vadd.xlane.f32.xlu0 %v1493_v12 }
 0x595   : > { %v1490_v15 = vsel %vm895_vm2, %v6442_v13, 0.0 }
 0x598   : > { %v1279_v16 = vpop.permute.xlu1 %1278  ;;  %1491 = vadd.xlane.f32.xlu0 %v1490_v15 }
 0x599   : > { %6143 = vmatprep.mubr.msk.f32.mxu0 %vm895_vm2, %v1279_v16 }
 0x59c   : > { %v1799_v29 = vpop.permute.xlu1 %1798 }
 0x5a0   : > { %v1797_v30 = vpop.permute.xlu1 %1796 }
 0x5ae   : > { %1703 = vrot.lane.b32.xlu0 %v6750_v43, %s6548_s27 }
 0x5b2   : > { %1705 = vrot.lane.b32.xlu0 %v6757_v47, %s6548_s27 }
 0x5b6   : > { %1280 = vrot.lane.b32.xlu0 %v6757_v47, %s6546_s22 }
 0x5ba   : > { %1794 = vrot.lane.b32.xlu0 %v6766_v55, %s6548_s27 }
 0x61d   : > { %v1495_v18 = vpop.xlane.xlu0 %1494 }
 0x61e   : > { %6443 = vrcp.f32 %v1495_v18 }
 0x621   : > { %v1492_v19 = vpop.xlane.xlu0 %1491 }
 0x622   : > { %6445 = vrcp.f32 %v1492_v19 }
 0x625   : > { %v1704_v20 = vpop.permute.xlu0 %1703 }
 0x629   : > { %v1706_v21 = vpop.permute.xlu0 %1705 }
 0x62b   : > { %v6444_v23 = vpop.eup %6443 }
 0x62c   : > { %v1503_v27 = vmul.f32 %v6444_v23, %v6440_v11 }
 0x62d   : > { %v1281_v22 = vpop.permute.xlu0 %1280 }
 0x62e   : > { %6144 = vmatmul.mubr.msk.f32.vlgmr.msra.gmra.mxu0 %vm895_vm2, %v1281_v22 }
 0x62f   : > { %v6446_v25 = vpop.eup %6445 }
 0x630   : > { %v1501_v26 = vmul.f32 %v6446_v25, %v6442_v13 }
 0x631   : > { %v1795_v28 = vpop.permute.xlu0 %1794 }
 0x632   : > { %6164 = vmatprep.mubr.msk.f32.mxu1 %vm895_vm2, %v1501_v26 }
 0x633   : > { %6165 = vmatmul.mubr.msk.f32.vlgmr.msra.gmra.mxu1 %vm895_vm2, %v1503_v27 }
 0x634   : > { %6168 = vmatpush3.xpose.msk.msra.mxu1 %vm895_vm2, %v1710_v8  ;;  %6171 = vmatprep.mubr.msk.f32.mxu1 %vm895_vm2, %v1704_v20 }
 0x635   : > { %6169 = vmatprep.subr.msk.mxu1 %vm895_vm2, %v1708_v17 }
 0x638   : > { %6170 = vmatpush3.xpose.msk.msra.mxu1 %vm895_vm2, %v1708_v17 }
 0x639   : > { %6174 = vmatprep.subr.msk.mxu1 %vm895_vm2, %v1801_v14 }
 0x63b   : > { %6172 = vmatmul.mubr.msk.f32.vlgmr.msra.gmra.mxu1 %vm895_vm2, %v1706_v21 }
 0x63c   : > { %6175 = vmatpush3.xpose.msk.msra.mxu1 %vm895_vm2, %v1801_v14  ;;  %6178 = vmatprep.mubr.msk.f32.mxu1 %vm895_vm2, %v1795_v28 }
 0x63d   : > { %6176 = vmatprep.subr.msk.mxu1 %vm895_vm2, %v1799_v29 }
 0x640   : > { %6177 = vmatpush3.xpose.msk.msra.mxu1 %vm895_vm2, %v1799_v29 }
 0x643   : > { %6179 = vmatmul.mubr.msk.f32.vlgmr.msra.gmra.mxu1 %vm895_vm2, %v1797_v30 }
 0x6ee   : > { %v6145_v31 = vpop.f32.mrf.mxu0 }
 0x6ef   : > { %v1463_v32 = vsel %vm895_vm2, %v6145_v31, -inf }
 0x6f0   : > { %1464 = vmax.xlane.f32.xlu1 %v1463_v32  ;;  %v1360_v33 = vpop.f32.mrf.mxu0 }
 0x6f1   : > { %v1460_v34 = vsel %vm895_vm2, %v1360_v33, -inf }
 0x6f2   : > { %1461 = vmax.xlane.f32.xlu0 %v1460_v34 }
 0x6f3   : > { %v6882_v35 = vpop.f32.mrf.mxu1 }
 0x6f5   : > { %v6884_v36 = vpop.f32.mrf.mxu1 }
 0x6fb   : > { %v6173_v37 = vpop.f32.mrf.mxu1 }
 0x6fc   : > { %v1888_v40 = vsel %vm895_vm2, %v6173_v37, -inf }
 0x6fd   : > { %v1785_v41 = vpop.f32.mrf.mxu1  ;;  %1889 = vmax.xlane.f32.xlu0 %v1888_v40 }
 0x6fe   : > { %v1885_v42 = vsel %vm895_vm2, %v1785_v41, -inf }
 0x701   : > { %1886 = vmax.xlane.f32.xlu0 %v1885_v42 }
 0x703   : > { %v6180_v44 = vpop.f32.mrf.mxu1 }
 0x704   : > { %v1894_v45 = vsel %vm895_vm2, %v6180_v44, -inf }
 0x705   : > { %1895 = vmax.xlane.f32.xlu0 %v1894_v45  ;;  %v1876_v10 = vpop.f32.mrf.mxu1 }
 0x706   : > { %v1891_v12 = vsel %vm895_vm2, %v1876_v10, -inf }
 0x779   : > { %v1465_v48 = vpop.xlane.xlu1 %1464 }
 0x77a   : > { %v1473_v49 = vsub.f32 %v6145_v31, %v1465_v48 }
 0x77b   : > { %v1462_v50 = vpop.xlane.xlu0 %1461 }
 0x77c   : > { %v1478_v51 = vmul.f32 1.442695, %v1473_v49  ;;  %v1472_v53 = vsub.f32 %v1360_v33, %v1462_v50 }
 0x77e   : > { %6447 = vpow2.f32 %v1478_v51  ;;  %v1476_v56 = vmul.f32 1.442695, %v1472_v53 }
 0x780   : > { %6449 = vpow2.f32 %v1476_v56 }
 0x786   : > { %v1890_v0 = vpop.xlane.xlu0 %1889 }
 0x787   : > { %v1898_v2 = vsub.f32 %v6173_v37, %v1890_v0 }
 0x789   : > { %v1903_v4 = vmul.f32 1.442695, %v1898_v2 }
 0x78a   : > { %v1887_v1 = vpop.xlane.xlu0 %1886 }
 0x78b   : > { %v6889_v57 = vpop.eup %6447  ;;  %6451 = vpow2.f32 %v1903_v4  ;;  %v1897_v13 = vsub.f32 %v1785_v41, %v1887_v1 }
 0x78c   : > { %v1487_v58 = vsel %vm895_vm2, %v6889_v57, 0.0 }
 0x78d   : > { %v6450_v59 = vpop.eup %6449  ;;  %1488 = vadd.xlane.f32.xlu0 %v1487_v58  ;;  %v1901_v14 = vmul.f32 1.442695, %v1897_v13 }
 0x78e   : > { %v1484_v61 = vsel %vm895_vm2, %v6450_v59, 0.0  ;;  %v1896_v3 = vpop.xlane.xlu0 %1895 }
 0x78f   : > { %1485 = vadd.xlane.f32.xlu1 %v1484_v61  ;;  %v1900_v5 = vsub.f32 %v6180_v44, %v1896_v3 }
 0x791   : > { %v1907_v6 = vmul.f32 1.442695, %v1900_v5 }
 0x793   : > { %6453 = vpow2.f32 %v1907_v6 }
 0x794   : > { %6455 = vpow2.f32 %v1901_v14 }
 0x798   : > { %v6912_v7 = vpop.eup %6451 }
 0x799   : > { %v1912_v8 = vsel %vm895_vm2, %v6912_v7, 0.0 }
 0x7a0   : > { %1508 = vrot.lane.b32.xlu1 %v6780_v60, %s6546_s22  ;;  %v6916_v9 = vpop.eup %6453 }
 0x7a1   : > { %v1918_v11 = vsel %vm895_vm2, %v6916_v9, 0.0  ;;  %v6456_v15 = vpop.eup %6455 }
 0x7a2   : > { %v1909_v16 = vsel %vm895_vm2, %v6456_v15, 0.0 }
 0x7a3   : > { %1506 = vrot.lane.b32.xlu0 %v6785_v62, %s6546_s22  ;;  %s7595_s22 = scalar_lea.vmem %s7564_s8, %s6656_s26 }
 0x7a4   : > { %1931 = vrot.lane.b32.xlu1 %v6780_v60, %s6548_s27 }
 0x7a7   : > { %1929 = vrot.lane.b32.xlu0 %v6785_v62, %s6548_s27 }
 0x7a8   : > { %2018 = vrot.lane.b32.xlu1 %v6790_v63, %s6548_s27 }
 0x7ab   : > { %2130 = vrot.lane.b32.xlu0 %v6757_v47, %s6549_s5 }
 0x7ac   : > { %2016 = vrot.lane.b32.xlu1 %v6761_v52, %s6548_s27  ;;  %s7599_s27 = sld [smem:[#allocation16_spill]] (!%p5797_p5) }
 0x7af   : > { %2128 = vrot.lane.b32.xlu0 %v6750_v43, %s6549_s5 }
 0x7b0   : > { %2221 = vrot.lane.b32.xlu1 %v6764_v54, %s6549_s5 }
 0x7ce   : > { %1913 = vadd.xlane.f32.xlu0 %v1912_v8 }
 0x7d2   : > { %1919 = vadd.xlane.f32.xlu0 %v1918_v11 }
 0x7d4   : > { %1892 = vmax.xlane.f32.xlu1 %v1891_v12 }
 0x7e5   : > { %2219 = vrot.lane.b32.xlu1 %v6766_v55, %s6549_s5 }
 0x7e8   : > { %2124 = vrot.lane.b32.xlu0 %v6750_v43, %s6550_s20 }
 0x7ec   : > { %2215 = vrot.lane.b32.xlu0 %v6766_v55, %s6550_s20 }
 0x809   : > { %1910 = vadd.xlane.f32.xlu1 %v1909_v16 }
 0x816   : > { %v1489_v17 = vpop.xlane.xlu0 %1488 }
 0x817   : > { %6457 = vrcp.f32 %v1489_v17 }
 0x818   : > { %v1486_v18 = vpop.xlane.xlu1 %1485 }
 0x819   : > { %6459 = vrcp.f32 %v1486_v18 }
 0x81a   : > { %2126 = vrot.lane.b32.xlu1 %v6757_v47, %s6550_s20  ;;  %v1507_v43 = vpop.permute.xlu0 %1506 }
 0x81c   : > { %v1509_v19 = vpop.permute.xlu1 %1508 }
 0x81d   : > { %6153 = vmatprep.subr.mxu0 %v1509_v19 }
 0x81e   : > { %6154 = vmatpush3.msra.mxu0 %v1509_v19  ;;  %v1930_v23 = vpop.permute.xlu0 %1929 }
 0x81f   : > { %6155 = vmatprep.subr.mxu0 %v1507_v43 }
 0x820   : > { %v1932_v55 = vpop.permute.xlu1 %1931  ;;  %6156 = vmatpush3.msra.mxu0 %v1507_v43 }
 0x821   : > { %6181 = vmatprep.subr.mxu0 %v1932_v55 }
 0x822   : > { %v2131_v28 = vpop.permute.xlu0 %2130 }
 0x824   : > { %v2019_v20 = vpop.permute.xlu1 %2018  ;;  %v6458_v21 = vpop.eup %6457 }
 0x825   : > { %6188 = vmatprep.subr.mxu1 %v2019_v20  ;;  %v1499_v27 = vmul.f32 %v6458_v21, %v6889_v57 }
 0x826   : > { %v6460_v22 = vpop.eup %6459  ;;  %6189 = vmatpush3.msra.mxu1 %v2019_v20  ;;  %v2129_v34 = vpop.permute.xlu0 %2128 }
 0x827   : > { %v1497_v25 = vmul.f32 %v6460_v22, %v6450_v59 }
 0x828   : > { %v2017_v26 = vpop.permute.xlu1 %2016 }
 0x829   : > { %6157 = vmatprep.mubr.msk.f32.mxu0 %vm895_vm2, %v1497_v25  ;;  %6190 = vmatprep.subr.mxu1 %v2017_v26 }
 0x82a   : > { %6158 = vmatmul.mubr.msk.f32.vlgmr.msra.gmra.mxu0 %vm895_vm2, %v1499_v27  ;;  %6191 = vmatpush3.msra.mxu1 %v2017_v26 }
 0x82b   : > { %6182 = vmatpush3.msra.mxu0 %v1932_v55 }
 0x82c   : > { %6183 = vmatprep.subr.mxu0 %v1930_v23  ;;  %v2222_v47 = vpop.permute.xlu1 %2221 }
 0x82d   : > { %6184 = vmatpush3.msra.mxu0 %v1930_v23  ;;  %6202 = vmatprep.subr.msk.mxu1 %vm895_vm2, %v2222_v47 }
 0x82e   : > { %6195 = vmatprep.subr.msk.mxu0 %vm895_vm2, %v2131_v28 }
 0x857   : > { %v1914_v40 = vpop.xlane.xlu0 %1913 }
 0x85b   : > { %v1920_v42 = vpop.xlane.xlu0 %1919 }
 0x85d   : > { %v1893_v29 = vpop.xlane.xlu1 %1892 }
 0x85e   : > { %v1899_v30 = vsub.f32 %v1876_v10, %v1893_v29 }
 0x85f   : > { %v2125_v50 = vpop.permute.xlu0 %2124 }
 0x860   : > { %v1905_v31 = vmul.f32 1.442695, %v1899_v30 }
 0x861   : > { %v2220_v37 = vpop.permute.xlu1 %2219 }
 0x862   : > { %6461 = vpow2.f32 %v1905_v31 }
 0x863   : > { %6463 = vrcp.f32 %v1914_v40  ;;  %v2216_v59 = vpop.permute.xlu0 %2215 }
 0x86f   : > { %v6462_v32 = vpop.eup %6461 }
 0x870   : > { %v1915_v33 = vsel %vm895_vm2, %v6462_v32, 0.0  ;;  %v6464_v44 = vpop.eup %6463 }
 0x871   : > { %1916 = vadd.xlane.f32.xlu1 %v1915_v33  ;;  %v1924_v49 = vmul.f32 %v6464_v44, %v6912_v7 }
 0x882   : > { %2217 = vrot.lane.b32.xlu1 %v6764_v54, %s6550_s20 }
 0x892   : > { %v1911_v41 = vpop.xlane.xlu1 %1910 }
 0x893   : > { %6465 = vrcp.f32 %v1911_v41 }
 0x894   : > { %6467 = vrcp.f32 %v1920_v42 }
 0x896   : > { %v2127_v54 = vpop.permute.xlu1 %2126 }
 0x8a0   : > { %v6466_v45 = vpop.eup %6465 }
 0x8a1   : > { %v1922_v48 = vmul.f32 %v6466_v45, %v6456_v15  ;;  %v6468_v53 = vpop.eup %6467 }
 0x8a2   : > { %v1928_v58 = vmul.f32 %v6468_v53, %v6916_v9 }
 0x8a3   : > { %6185 = vmatprep.mubr.msk.f32.mxu0 %vm895_vm2, %v1922_v48 }
 0x8a4   : > { %6186 = vmatmul.mubr.msk.f32.vlgmr.msra.gmra.mxu0 %vm895_vm2, %v1924_v49 }
 0x8a5   : > { %6196 = vmatpush3.xpose.msk.msra.mxu0 %vm895_vm2, %v2131_v28  ;;  %6199 = vmatprep.mubr.msk.f32.mxu0 %vm895_vm2, %v2125_v50 }
 0x8a6   : > { %6197 = vmatprep.subr.msk.mxu0 %vm895_vm2, %v2129_v34 }
 0x8a9   : > { %6198 = vmatpush3.xpose.msk.msra.mxu0 %vm895_vm2, %v2129_v34 }
 0x8ac   : > { %6200 = vmatmul.mubr.msk.f32.vlgmr.msra.gmra.mxu0 %vm895_vm2, %v2127_v54 }
 0x8ea   : > { %v6159_v0 = vpop.f32.mrf.mxu0 }
 0x8ec   : > { %v1584_v1 = vpop.f32.mrf.mxu0 }
 0x8fa   : > { %v1917_v51 = vpop.xlane.xlu1 %1916 }
 0x8fb   : > { %6469 = vrcp.f32 %v1917_v51 }
 0x8fe   : > { %v2218_v61 = vpop.permute.xlu1 %2217 }
 0x908   : > { %v6470_v56 = vpop.eup %6469 }
 0x909   : > { %v1926_v57 = vmul.f32 %v6470_v56, %v6462_v32 }
 0x90b   : > { %6192 = vmatprep.mubr.msk.f32.mxu1 %vm895_vm2, %v1926_v57 }
 0x90c   : > { %6193 = vmatmul.mubr.msk.f32.vlgmr.msra.gmra.mxu1 %vm895_vm2, %v1928_v58 }
 0x90d   : > { %6203 = vmatpush3.xpose.msk.msra.mxu1 %vm895_vm2, %v2222_v47  ;;  %6206 = vmatprep.mubr.msk.f32.mxu1 %vm895_vm2, %v2216_v59 }
 0x90e   : > { %6204 = vmatprep.subr.msk.mxu1 %vm895_vm2, %v2220_v37 }
 0x911   : > { %6205 = vmatpush3.xpose.msk.msra.mxu1 %vm895_vm2, %v2220_v37 }
 0x914   : > { %6207 = vmatmul.mubr.msk.f32.vlgmr.msra.gmra.mxu1 %vm895_vm2, %v2218_v61  ;;  %v6291_v61 = vld [vmem:[%s6678_s16 + $0x18] sm:$0xff]  }
 0x964   : > { %v6187_v2 = vpop.f32.mrf.mxu0 }
 0x966   : > { %v2007_v3 = vpop.f32.mrf.mxu0 }
 0x96c   : > { %v6201_v4 = vpop.f32.mrf.mxu0 }
 0x96d   : > { %v2309_v5 = vsel %vm895_vm2, %v6201_v4, -inf }
 0x96e   : > { %2310 = vmax.xlane.f32.xlu1 %v2309_v5  ;;  %v2206_v6 = vpop.f32.mrf.mxu0 }
 0x96f   : > { %v2306_v7 = vsel %vm895_vm2, %v2206_v6, -inf }
 0x970   : > { %2307 = vmax.xlane.f32.xlu0 %v2306_v7 }
 0x97f   : > { %2352 = vrot.lane.b32.xlu1 %v6780_v60, %s6550_s20 }
 0x9cc   : > { %v6194_v8 = vpop.f32.mrf.mxu1 }
 0x9ce   : > { %v2094_v9 = vpop.f32.mrf.mxu1 }
 0x9d4   : > { %v6208_v10 = vpop.f32.mrf.mxu1 }
 0x9d5   : > { %v2315_v13 = vsel %vm895_vm2, %v6208_v10, -inf }
 0x9d6   : > { %v2297_v11 = vpop.f32.mrf.mxu1 }
 0x9d7   : > { %v2312_v12 = vsel %vm895_vm2, %v2297_v11, -inf }
 0x9d8   : > { %2313 = vmax.xlane.f32.xlu0 %v2312_v12 }
 0x9dc   : > { %2316 = vmax.xlane.f32.xlu0 %v2315_v13 }
 0x9f7   : > { %v2311_v14 = vpop.xlane.xlu1 %2310 }
 0x9f8   : > { %v2319_v15 = vsub.f32 %v6201_v4, %v2311_v14 }
 0x9f9   : > { %v2308_v16 = vpop.xlane.xlu0 %2307 }
 0x9fa   : > { %v2324_v17 = vmul.f32 1.442695, %v2319_v15  ;;  %v2318_v18 = vsub.f32 %v2206_v6, %v2308_v16 }
 0x9fb   : > { %v2353_v19 = vpop.permute.xlu1 %2352 }
 0x9fc   : > { %6471 = vpow2.f32 %v2324_v17  ;;  %v2322_v43 = vmul.f32 1.442695, %v2318_v18  ;;  %6209 = vmatprep.subr.mxu0 %v2353_v19  ;;  %v5577_v17 = vld [vmem:[%s7593_s3] ss:$0 sm:$0xff] }
 0x9fd   : > { %6210 = vmatpush3.msra.mxu0 %v2353_v19 }
 0x9fe   : > { %6473 = vpow2.f32 %v2322_v43 }
 0xa09   : > { %v6472_v60 = vpop.eup %6471 }
 0xa0a   : > { %v2333_v55 = vsel %vm895_vm2, %v6472_v60, 0.0 }
 0xa0b   : > { %v6474_v20 = vpop.eup %6473  ;;  %2334 = vadd.xlane.f32.xlu0 %v2333_v55  ;;  %v6503_v55 = vld [vmem:[#allocation2] sm:$0xff] }
 0xa0c   : > { %v2330_v21 = vsel %vm895_vm2, %v6474_v20, 0.0 }
 0xa0d   : > { %2331 = vadd.xlane.f32.xlu1 %v2330_v21 }
 0xa1e   : > { %2350 = vrot.lane.b32.xlu1 %v6785_v62, %s6550_s20 }
 0xa61   : > { %v2314_v22 = vpop.xlane.xlu0 %2313 }
 0xa62   : > { %v2320_v23 = vsub.f32 %v2297_v11, %v2314_v22 }
 0xa64   : > { %v2326_v25 = vmul.f32 1.442695, %v2320_v23 }
 0xa65   : > { %v2317_v26 = vpop.xlane.xlu0 %2316 }
 0xa66   : > { %6475 = vpow2.f32 %v2326_v25  ;;  %v2321_v27 = vsub.f32 %v6208_v10, %v2317_v26  ;;  %v6504_v26 = vld [vmem:[#allocation2 + $0x10] sm:$0xff] }
 0xa68   : > { %v2328_v47 = vmul.f32 1.442695, %v2321_v27 }
 0xa6a   : > { %6477 = vpow2.f32 %v2328_v47  ;;  %v6505_v47 = vld [vmem:[#allocation2 + $0x8] sm:$0xff] }
 0xa73   : > { %v6476_v28 = vpop.eup %6475 }
 0xa74   : > { %v2336_v29 = vsel %vm895_vm2, %v6476_v28, 0.0 }
 0xa75   : > { %2337 = vadd.xlane.f32.xlu1 %v2336_v29 }
 0xa77   : > { %v6478_v30 = vpop.eup %6477 }
 0xa78   : > { %v2339_v31 = vsel %vm895_vm2, %v6478_v30, 0.0 }
 0xa79   : > { %2340 = vadd.xlane.f32.xlu0 %v2339_v31  ;;  %v6506_v31 = vld [vmem:[#allocation2 + $0x18] sm:$0xff] }
 0xa86   : > { %2437 = vrot.lane.b32.xlu1 %v6761_v52, %s6550_s20 }
 0xa8a   : > { %1688 = vrot.lane.b32.xlu1 %v6159_v0, %s6549_s5 }
 0xa8e   : > { %1692 = vrot.lane.b32.xlu1 %v6882_v35, %s6549_s5 }
 0xa8f   : > { %2439 = vrot.lane.b32.xlu0 %v6790_v63, %s6550_s20 }
 0xa92   : > { %2109 = vrot.lane.b32.xlu1 %v6187_v2, %s6547_s24  ;;  %v6293_v2 = vld [vmem:[%s6678_s16 + $0x8] sm:$0xff]  }
 0xa93   : > { %1686 = vrot.lane.b32.xlu0 %v1584_v1, %s6549_s5  ;;  %v6292_v1 = vld [vmem:[%s6678_s16 + $0x10] sm:$0xff]  }
 0xa94   : > { %v2335_v62 = vpop.xlane.xlu0 %2334 }
 0xa95   : > { %6479 = vrcp.f32 %v2335_v62 }
 0xa96   : > { %v2332_v32 = vpop.xlane.xlu1 %2331  ;;  %2113 = vrot.lane.b32.xlu1 %v6194_v8, %s6547_s24 }
 0xa97   : > { %6481 = vrcp.f32 %v2332_v32  ;;  %1690 = vrot.lane.b32.xlu0 %v6884_v36, %s6549_s5 }
 0xa9a   : > { %v2351_v52 = vpop.permute.xlu1 %2350 }
 0xa9b   : > { %6211 = vmatprep.subr.mxu0 %v2351_v52  ;;  %2107 = vrot.lane.b32.xlu0 %v2007_v3, %s6547_s24  ;;  %v6294_v3 = vld [vmem:[%s6678_s16] sm:$0xff]  }
 0xa9c   : > { %6212 = vmatpush3.msra.mxu0 %v2351_v52 }
 0xa9d   : > { %6223 = vmatprep.subr.bf16.mxu0 %v6291_v61 }
 0xa9f   : > { %2111 = vrot.lane.b32.xlu0 %v2094_v9, %s6547_s24 }
 0xaa2   : > { %v6480_v63 = vpop.eup %6479 }
 0xaa3   : > { %v2345_v34 = vmul.f32 %v6480_v63, %v6472_v60 }
 0xaa4   : > { %v6482_v35 = vpop.eup %6481 }
 0xaa5   : > { %v2343_v33 = vmul.f32 %v6482_v35, %v6474_v20 }
 0xaa7   : > { %6213 = vmatprep.mubr.msk.f32.mxu0 %vm895_vm2, %v2343_v33 }
 0xaa8   : > { %6214 = vmatmul.mubr.msk.f32.vlgmr.msra.gmra.mxu0 %vm895_vm2, %v2345_v34 }
 0xaa9   : > { %6224 = vmatpush3.bf16.msra.mxu0 %v6291_v61  ;;  %v2775_v61 = vld [vmem:[%s6692_s1 + $0x188] sm:$0xff] }
 0xaaa   : > { %6225 = vmatprep.subr.bf16.mxu0 %v6292_v1 }
 0xaad   : > { %6226 = vmatpush3.bf16.msra.mxu0 %v6292_v1  ;;  %v2783_v1 = vld [vmem:[%s6692_s1 + $0x1c8] sm:$0xff] }
 0xaae   : > { %6227 = vmatprep.subr.bf16.mxu0 %v6293_v2 }
 0xab1   : > { %6228 = vmatpush3.bf16.msra.mxu0 %v6293_v2 }
 0xab2   : > { %6229 = vmatprep.subr.bf16.mxu0 %v6294_v3 }
 0xab5   : > { %6230 = vmatpush3.bf16.msra.mxu0 %v6294_v3  ;;  %v5636_v3 = vcombine.low %v2775_v61, %v2783_v1 }
 0xafe   : > { %v2338_v37 = vpop.xlane.xlu1 %2337 }
 0xaff   : > { %6483 = vrcp.f32 %v2338_v37 }
 0xb02   : > { %v2438_v40 = vpop.permute.xlu1 %2437  ;;  %v2341_v41 = vpop.xlane.xlu0 %2340 }
 0xb03   : > { %6485 = vrcp.f32 %v2341_v41 }
 0xb06   : > { %v1689_v36 = vpop.permute.xlu1 %1688  ;;  %v2440_v42 = vpop.permute.xlu0 %2439 }
 0xb07   : > { %1700 = vst.msk [vmem:[#allocation3 + $0x8] sm:$0xff] %vm1698_vm3, %v1689_v36  ;;  %6216 = vmatprep.subr.mxu1 %v2440_v42 }
 0xb08   : > { %6217 = vmatpush3.msra.mxu1 %v2440_v42 }
 0xb09   : > { %6218 = vmatprep.subr.mxu1 %v2438_v40 }
 0xb0a   : > { %v1693_v44 = vpop.permute.xlu1 %1692  ;;  %6219 = vmatpush3.msra.mxu1 %v2438_v40  ;;  %v1687_v45 = vpop.permute.xlu0 %1686 }
 0xb0b   : > { %1702 = vst.msk [vmem:[#allocation3 + $0x18] sm:$0xff] %vm1698_vm3, %v1693_v44  ;;  %1699 = vst.msk [vmem:[#allocation3] sm:$0xff] %vm1698_vm3, %v1687_v45 }
 0xb0c   : > { %v6484_v48 = vpop.eup %6483 }
 0xb0d   : > { %v2347_v49 = vmul.f32 %v6484_v48, %v6476_v28 }
 0xb0e   : > { %v2110_v50 = vpop.permute.xlu1 %2109  ;;  %v1691_v54 = vpop.permute.xlu0 %1690 }
 0xb0f   : > { %2121 = vst.msk [vmem:[#allocation3 + $0x8] sm:$0xff] %vm2119_vm4, %v2110_v50  ;;  %6220 = vmatprep.mubr.msk.f32.mxu1 %vm895_vm2, %v2347_v49 }
 0xb10   : > { %1701 = vst.msk [vmem:[#allocation3 + $0x10] sm:$0xff] %vm1698_vm3, %v1691_v54  ;;  %v6486_v51 = vpop.eup %6485 }
 0xb11   : > { %v2349_v53 = vmul.f32 %v6486_v51, %v6478_v30 }
 0xb12   : > { %v2114_v56 = vpop.permute.xlu1 %2113  ;;  %v2108_v57 = vpop.permute.xlu0 %2107 }
 0xb13   : > { %2123 = vst.msk [vmem:[#allocation3 + $0x18] sm:$0xff] %vm2119_vm4, %v2114_v56  ;;  %2120 = vst.msk [vmem:[#allocation3] sm:$0xff] %vm2119_vm4, %v2108_v57  ;;  %6221 = vmatmul.mubr.msk.f32.vlgmr.msra.gmra.mxu1 %vm895_vm2, %v2349_v53 }
 0xb14   : > { %3232 = vmatprep.mubr.bf16.mxu1 %v6543_v24 }
 0xb16   : > { %v2112_v58 = vpop.permute.xlu0 %2111 }
 0xb17   : > { %2122 = vst.msk [vmem:[#allocation3 + $0x10] sm:$0xff] %vm2119_vm4, %v2112_v58  ;;  %v2774_v58 = vld [vmem:[%s6692_s1 + $0x180] sm:$0xff] }
 0xb68   : > { %v6215_v59 = vpop.f32.mrf.mxu0 }
 0xb69   : > { %2530 = vrot.lane.b32.xlu1 %v6215_v59, %s6545_s21  ;;  %v2782_v59 = vld [vmem:[%s6692_s1 + $0x1c0] sm:$0xff] }
 0xb6a   : > { %v2428_v0 = vpop.f32.mrf.mxu0  ;;  %v5634_v2 = vcombine.low %v2774_v58, %v2782_v59 }
 0xb6b   : > { %2528 = vrot.lane.b32.xlu0 %v2428_v0, %s6545_s21  ;;  %v5635_v0 = vcombine.high %v2774_v58, %v2782_v59 }
 0xb6d   : > { %3208 = vmatprep.subr.bf16.mxu1 %v5635_v0  ;;  %v5585_v0 = vld [vmem:[%s7595_s22] ss:$0 sm:$0xff] }
 0xb6e   : > { %3209 = vmatpush1.bf16.msra.mxu1 %v5634_v2  ;;  %v2760_v2 = vld [vmem:[%s6692_s1 + $0x110] sm:$0xff] }
 0xbd3   : > { %v6222_v4 = vpop.f32.mrf.mxu1 }
 0xbd4   : > { %2534 = vrot.lane.b32.xlu1 %v6222_v4, %s6545_s21  ;;  %v5637_v4 = vcombine.high %v2775_v61, %v2783_v1 }
 0xbd5   : > { %v2515_v5 = vpop.f32.mrf.mxu1 }
 0xbd6   : > { %2532 = vrot.lane.b32.xlu0 %v2515_v5, %s6545_s21  ;;  %3261 = vmatprep.subr.bf16.mxu0 %v5637_v4  ;;  %v2758_v5 = vld [vmem:[%s6692_s1 + $0x100] sm:$0xff]  ;;  %v2768_v4 = vld [vmem:[%s6692_s1 + $0x150] sm:$0xff] }
 0xbdb   : > { %v2531_v6 = vpop.permute.xlu1 %2530 }
 0xbdc   : > { %2542 = vst.msk [vmem:[#allocation3 + $0x8] sm:$0xff] %vm2540_vm5, %v2531_v6  ;;  %v2766_v6 = vld [vmem:[%s6692_s1 + $0x140] sm:$0xff] }
 0xbdd   : > { %v2529_v7 = vpop.permute.xlu0 %2528 }
 0xbde   : > { %2541 = vst.msk [vmem:[#allocation3] sm:$0xff] %vm2540_vm5, %v2529_v7  ;;  %v2759_v7 = vld [vmem:[%s6692_s1 + $0x108] sm:$0xff] }
 0xbe3   : > { %v2546_v9 = vld [vmem:[#allocation3 + $0x8] sm:$0xff] }
 0xbe5   : > { %v2545_v8 = vld [vmem:[#allocation3] sm:$0xff] }
 0xbe6   : > { %v2549_v10 = vpack.c.bf16 %v2546_v9, %v2545_v8  ;;  %v5619_v8 = vcombine.high %v2758_v5, %v2766_v6  ;;  %v2767_v9 = vld [vmem:[%s6692_s1 + $0x148] sm:$0xff] }
 0xbe8   : > { %6231 = vmatprep.mubr.msk.bf16.mxu0 %vm829_vm1, %v2549_v10  ;;  %v5618_v10 = vcombine.low %v2758_v5, %v2766_v6  ;;  %3210 = vmatprep.subr.bf16.mxu1 %v5619_v8  ;;  %v2761_v5 = vld [vmem:[%s6692_s1 + $0x118] sm:$0xff] }
 0xbe9   : > { %v2769_v6 = vld [vmem:[%s6692_s1 + $0x158] sm:$0xff] }
 0xbea   : > { %3211 = vmatpush1.bf16.msra.mxu1 %v5618_v10 }
 0xc46   : > { %v2535_v11 = vpop.permute.xlu1 %2534 }
 0xc47   : > { %2544 = vst.msk [vmem:[#allocation3 + $0x18] sm:$0xff] %vm2540_vm5, %v2535_v11  ;;  %v5620_v11 = vcombine.low %v2759_v7, %v2767_v9 }
 0xc48   : > { %v2533_v12 = vpop.permute.xlu0 %2532 }
 0xc49   : > { %2543 = vst.msk [vmem:[#allocation3 + $0x10] sm:$0xff] %vm2540_vm5, %v2533_v12  ;;  %v5621_v12 = vcombine.high %v2759_v7, %v2767_v9 }
 0xc4e   : > { %v2548_v14 = vld [vmem:[#allocation3 + $0x18] sm:$0xff] }
 0xc50   : > { %v2547_v13 = vld [vmem:[#allocation3 + $0x10] sm:$0xff] }
 0xc51   : > { %v2550_v15 = vpack.c.bf16 %v2548_v14, %v2547_v13  ;;  %v2742_v13 = vld [vmem:[%s6692_s1 + $0x80] sm:$0xff] }
 0xc52   : > { %v2750_v14 = vld [vmem:[%s6692_s1 + $0xc0] sm:$0xff] }
 0xc53   : > { %6232 = vmatmul.mubr.msk.bf16.vlgmr.msra.gmra.mxu0 %vm829_vm1, %v2550_v15  ;;  %v2743_v15 = vld [vmem:[%s6692_s1 + $0x88] sm:$0xff] }
 0xc54   : > { %3285 = vmatprep.mubr.bf16.mxu0 %v6543_v24  ;;  %3262 = vmatpush1.bf16.msra.mxu0 %v5636_v3 }
 0xc55   : > { %3263 = vmatprep.subr.bf16.mxu0 %v5621_v12  ;;  %v5625_v12 = vcombine.high %v2761_v5, %v2769_v6 }
 0xc58   : > { %3264 = vmatpush1.bf16.msra.mxu0 %v5620_v11  ;;  %v5623_v11 = vcombine.high %v2760_v2, %v2768_v4 }
 0xd13   : > { %v6233_v16 = vpop.f32.mrf.mxu0 }
 0xd14   : > { %v2639_v19 = vadd.f32 %v6233_v16, %v5577_v17  ;;  %v5603_v16 = vcombine.high %v2742_v13, %v2750_v14 }
 0xd15   : > { %v2630_v18 = vpop.f32.mrf.mxu0 }
 0xd16   : > { %v2631_v43 = vadd.f32 %v5577_v17, %v2630_v18  ;;  %v2647_v27 = vadd.f32 %v6504_v26, %v2639_v19  ;;  %v5602_v18 = vcombine.low %v2742_v13, %v2750_v14  ;;  %3212 = vmatprep.subr.bf16.mxu1 %v5603_v16  ;;  %v2744_v13 = vld [vmem:[%s6692_s1 + $0x90] sm:$0xff] }
 0xd17   : > { %v6234_v60 = vpop.f32.mrf.mxu0  ;;  %v2752_v14 = vld [vmem:[%s6692_s1 + $0xd0] sm:$0xff] }
 0xd18   : > { %v2645_v20 = vadd.f32 %v6503_v55, %v2631_v43  ;;  %v2642_v22 = vadd.f32 %v6234_v60, %v5577_v17  ;;  %v2657_v30 = vsel %vm829_vm1, %v2647_v27, 0.0  ;;  %3213 = vmatpush1.bf16.msra.mxu1 %v5602_v18  ;;  %v2726_v60 = vld [vmem:[%s6692_s1] sm:$0xff] }
 0xd19   : > { %v2633_v21 = vpop.f32.mrf.mxu0  ;;  %v2734_v55 = vld [vmem:[%s6692_s1 + $0x40] sm:$0xff] }
 0xd1a   : > { %v2634_v23 = vadd.f32 %v5577_v17, %v2633_v21  ;;  %v2651_v25 = vsel %vm829_vm1, %v2645_v20, 0.0  ;;  %v2648_v62 = vadd.f32 %v6506_v31, %v2642_v22  ;;  %v2751_v17 = vld [vmem:[%s6692_s1 + $0xc8] sm:$0xff]  ;;  %v5587_v21 = vcombine.high %v2726_v60, %v2734_v55 }
 0xd1b   : > { %2652 = vadd.xlane.f32.xlu0 %v2651_v25  ;;  %v5604_v19 = vcombine.low %v2743_v15, %v2751_v17  ;;  %v5605_v43 = vcombine.high %v2743_v15, %v2751_v17  ;;  %v2735_v22 = vld [vmem:[%s6692_s1 + $0x48] sm:$0xff]  ;;  %v2753_v15 = vld [vmem:[%s6692_s1 + $0xd8] sm:$0xff]  ;;  %v5624_v17 = vcombine.low %v2761_v5, %v2769_v6  ;;  %v2780_v6 = vld [vmem:[%s6692_s1 + $0x1b0] sm:$0xff] }
 0xd1c   : > { %v2646_v28 = vadd.f32 %v6505_v47, %v2634_v23  ;;  %v2660_v32 = vsel %vm829_vm1, %v2648_v62, 0.0  ;;  %v5586_v23 = vcombine.low %v2726_v60, %v2734_v55  ;;  %3214 = vmatprep.subr.bf16.mxu1 %v5587_v21  ;;  %v2784_v47 = vld [vmem:[%s6692_s1 + $0x1d0] sm:$0xff]  ;;  %v2737_v21 = vld [vmem:[%s6692_s1 + $0x58] sm:$0xff] }
 0xd1d   : > { %3265 = vmatprep.subr.bf16.mxu0 %v5605_v43  ;;  %v2728_v60 = vld [vmem:[%s6692_s1 + $0x10] sm:$0xff] }
 0xd1e   : > { %v2654_v29 = vsel %vm829_vm1, %v2646_v28, 0.0  ;;  %3266 = vmatpush1.bf16.msra.mxu0 %v5604_v19  ;;  %3215 = vmatpush1.bf16.msra.mxu1 %v5586_v23  ;;  %v5607_v19 = vcombine.high %v2744_v13, %v2752_v14  ;;  %v2736_v55 = vld [vmem:[%s6692_s1 + $0x50] sm:$0xff]  ;;  %v5606_v23 = vcombine.low %v2744_v13, %v2752_v14 }
 0xd1f   : > { %2655 = vadd.xlane.f32.xlu1 %v2654_v29  ;;  %2658 = vadd.xlane.f32.xlu0 %v2657_v30  ;;  %v2785_v30 = vld [vmem:[%s6692_s1 + $0x1d8] sm:$0xff] }
 0xd23   : > { %2661 = vadd.xlane.f32.xlu0 %v2660_v32 }
 0xda4   : > { %v2653_v52 = vpop.xlane.xlu0 %2652 }
 0xda5   : > { %v2664_v63 = vmul.f32 0.015625, %v2653_v52 }
 0xda7   : > { %v7013_v35 = vsub.f32 %v2645_v20, %v2664_v63  ;;  %v2727_v20 = vld [vmem:[%s6692_s1 + $0x8] sm:$0xff] }
 0xda8   : > { %v2656_v33 = vpop.xlane.xlu1 %2655  ;;  %v2659_v34 = vpop.xlane.xlu0 %2658  ;;  %v5588_v25 = vcombine.low %v2727_v20, %v2735_v22  ;;  %v5589_v26 = vcombine.high %v2727_v20, %v2735_v22  ;;  %v2729_v20 = vld [vmem:[%s6692_s1 + $0x18] sm:$0xff] }
 0xda9   : > { %v2665_v37 = vmul.f32 0.015625, %v2656_v33  ;;  %v2666_v40 = vmul.f32 0.015625, %v2659_v34  ;;  %v2672_v41 = vmul.f32 %v7013_v35, %v7013_v35 }
 0xdaa   : > { %3267 = vmatprep.subr.bf16.mxu0 %v5589_v26 }
 0xdab   : > { %v7017_v36 = vsub.f32 %v2646_v28, %v2665_v37  ;;  %v7019_v42 = vsub.f32 %v2647_v27, %v2666_v40  ;;  %v2676_v44 = vsel %vm829_vm1, %v2672_v41, 0.0  ;;  %v2776_v27 = vld [vmem:[%s6692_s1 + $0x190] sm:$0xff]  ;;  %v2777_v28 = vld [vmem:[%s6692_s1 + $0x198] sm:$0xff]  ;;  %3268 = vmatpush1.bf16.msra.mxu0 %v5588_v25 }
 0xdac   : > { %2677 = vadd.xlane.f32.xlu1 %v2676_v44  ;;  %v2662_v45 = vpop.xlane.xlu0 %2661  ;;  %v5639_v29 = vcombine.high %v2776_v27, %v2784_v47  ;;  %v5638_v31 = vcombine.low %v2776_v27, %v2784_v47  ;;  %v5641_v32 = vcombine.high %v2777_v28, %v2785_v30  ;;  %v5591_v27 = vcombine.high %v2728_v60, %v2736_v55 }
 0xdad   : > { %v2667_v48 = vmul.f32 0.015625, %v2662_v45  ;;  %v2673_v49 = vmul.f32 %v7017_v36, %v7017_v36  ;;  %v2674_v50 = vmul.f32 %v7019_v42, %v7019_v42  ;;  %v5593_v47 = vcombine.high %v2729_v20, %v2737_v21 }
 0xdae   : > { %3314 = vmatprep.subr.bf16.mxu1 %v5639_v29  ;;  %3367 = vmatprep.subr.bf16.mxu0 %v5641_v32  ;;  %v2786_v29 = vld [vmem:[%s6692_s1 + $0x1e0] sm:$0xff]  ;;  %v5592_v32 = vcombine.low %v2729_v20, %v2737_v21  ;;  %v2748_v20 = vld [vmem:[%s6692_s1 + $0xb0] sm:$0xff] }
 0xdaf   : > { %v7026_v54 = vsub.f32 %v2648_v62, %v2667_v48  ;;  %v2679_v51 = vsel %vm829_vm1, %v2673_v49, 0.0  ;;  %v2682_v53 = vsel %vm829_vm1, %v2674_v50, 0.0  ;;  %v5640_v62 = vcombine.low %v2777_v28, %v2785_v30  ;;  %v2778_v28 = vld [vmem:[%s6692_s1 + $0x1a0] sm:$0xff]  ;;  %v2779_v30 = vld [vmem:[%s6692_s1 + $0x1a8] sm:$0xff]  ;;  %v2756_v21 = vld [vmem:[%s6692_s1 + $0xf0] sm:$0xff] }
 0xdb0   : > { %2680 = vadd.xlane.f32.xlu0 %v2679_v51  ;;  %2683 = vadd.xlane.f32.xlu1 %v2682_v53 }
 0xdb1   : > { %v2675_v56 = vmul.f32 %v7026_v54, %v7026_v54 }
 0xdb3   : > { %v2685_v57 = vsel %vm829_vm1, %v2675_v56, 0.0  ;;  %v5584_v56 = vld [vmem:[%s7594_s19] ss:$0 sm:$0xff] }
 0xdb4   : > { %2686 = vadd.xlane.f32.xlu0 %v2685_v57 }
 0xe35   : > { %v2678_v52 = vpop.xlane.xlu1 %2677 }
 0xe36   : > { %v2688_v63 = vmul.f32 0.015625, %v2678_v52  ;;  %v5643_v52 = vcombine.high %v2778_v28, %v2786_v29 }
 0xe38   : > { %v2692_v33 = vadd.f32 1e-05, %v2688_v63 }
 0xe39   : > { %v2684_v34 = vpop.xlane.xlu1 %2683  ;;  %v2681_v37 = vpop.xlane.xlu0 %2680 }
 0xe3a   : > { %6487 = vrsqrt.f32 %v2692_v33  ;;  %v2690_v40 = vmul.f32 0.015625, %v2684_v34  ;;  %v2689_v41 = vmul.f32 0.015625, %v2681_v37  ;;  %v2762_v33 = vld [vmem:[%s6692_s1 + $0x120] sm:$0xff]  ;;  %v2763_v37 = vld [vmem:[%s6692_s1 + $0x128] sm:$0xff] }
 0xe3b   : > { %v2770_v34 = vld [vmem:[%s6692_s1 + $0x160] sm:$0xff] }
 0xe3c   : > { %v2693_v44 = vadd.f32 1e-05, %v2689_v41  ;;  %v2694_v45 = vadd.f32 1e-05, %v2690_v40  ;;  %v2771_v40 = vld [vmem:[%s6692_s1 + $0x168] sm:$0xff]  ;;  %v5642_v41 = vcombine.low %v2778_v28, %v2786_v29  ;;  %v5615_v28 = vcombine.high %v2748_v20, %v2756_v21 }
 0xe3d   : > { %v2687_v48 = vpop.xlane.xlu0 %2686 }
 0xe3e   : > { %v2691_v49 = vmul.f32 0.015625, %v2687_v48  ;;  %6489 = vrsqrt.f32 %v2693_v44  ;;  %v5629_v48 = vcombine.high %v2763_v37, %v2771_v40 }
 0xe3f   : > { %6491 = vrsqrt.f32 %v2694_v45  ;;  %v5627_v45 = vcombine.high %v2762_v33, %v2770_v34 }
 0xe40   : > { %v2695_v50 = vadd.f32 1e-05, %v2691_v49  ;;  %v2746_v49 = vld [vmem:[%s6692_s1 + $0xa0] sm:$0xff] }
 0xe42   : > { %6493 = vrsqrt.f32 %v2695_v50  ;;  %v2754_v50 = vld [vmem:[%s6692_s1 + $0xe0] sm:$0xff] }
 0xe47   : > { %v6488_v51 = vpop.eup %6487 }
 0xe48   : > { %v2700_v53 = vmul.f32 %v6488_v51, %v7013_v35  ;;  %v2747_v51 = vld [vmem:[%s6692_s1 + $0xa8] sm:$0xff] }
 0xe4a   : > { %v2710_v58 = vmul.f32 %v5584_v56, %v2700_v53  ;;  %v2755_v53 = vld [vmem:[%s6692_s1 + $0xe8] sm:$0xff] }
 0xe4b   : > { %v6490_v57 = vpop.eup %6489 }
 0xe4c   : > { %v2701_v59 = vmul.f32 %v6490_v57, %v7017_v36  ;;  %v6492_v61 = vpop.eup %6491  ;;  %v7070_v7 = vadd.f32 %v5585_v0, %v2710_v58  ;;  %v5628_v57 = vcombine.low %v2763_v37, %v2771_v40  ;;  %v5611_v58 = vcombine.high %v2746_v49, %v2754_v50 }
 0xe4d   : > { %v2702_v36 = vmul.f32 %v6492_v61, %v7019_v42  ;;  %v5622_v42 = vcombine.low %v2760_v2, %v2768_v4  ;;  %v2730_v61 = vld [vmem:[%s6692_s1 + $0x20] sm:$0xff]  ;;  %v5610_v2 = vcombine.low %v2746_v49, %v2754_v50  ;;  %v6299_v49 = vld [vmem:[%s6704_s29 + $0x70] sm:$0xff]  }
 0xe4e   : > { %v2711_v35 = vmul.f32 %v5584_v56, %v2701_v59  ;;  %v5613_v59 = vcombine.high %v2747_v51, %v2755_v53  ;;  %v6300_v50 = vld [vmem:[%s6704_s29 + $0xf0] sm:$0xff]  }
 0xe4f   : > { %v6494_v1 = vpop.eup %6493  ;;  %v2712_v16 = vmul.f32 %v5584_v56, %v2702_v36  ;;  %v2788_v36 = vld [vmem:[%s6692_s1 + $0x1f0] sm:$0xff] }
 0xe50   : > { %v2703_v3 = vmul.f32 %v6494_v1, %v7026_v54  ;;  %v7073_v8 = vadd.f32 %v5585_v0, %v2711_v35  ;;  %v2745_v54 = vld [vmem:[%s6692_s1 + $0x98] sm:$0xff]  ;;  %v2731_v1 = vld [vmem:[%s6692_s1 + $0x28] sm:$0xff]  ;;  %v5647_v14 = vcombine.high %v2780_v6, %v2788_v36 }
 0xe51   : > { %v5609_v43 = vcombine.high %v2745_v54, %v2753_v15  ;;  %v7095_v22 = vadd.f32 %v5585_v0, %v2712_v16  ;;  %v5608_v25 = vcombine.low %v2745_v54, %v2753_v15  ;;  %v2739_v35 = vld [vmem:[%s6692_s1 + $0x68] sm:$0xff]  ;;  %v2764_v15 = vld [vmem:[%s6692_s1 + $0x130] sm:$0xff] }
 0xe52   : > { %v7077_v9 = vpack.c.bf16 %v7073_v8, %v7070_v7  ;;  %v2713_v10 = vmul.f32 %v5584_v56, %v2703_v3  ;;  %v5626_v56 = vcombine.low %v2762_v33, %v2770_v34  ;;  %v5612_v3 = vcombine.low %v2747_v51, %v2755_v53  ;;  %v2772_v16 = vld [vmem:[%s6692_s1 + $0x170] sm:$0xff] }
 0xe53   : > { %v5597_v5 = vcombine.high %v2731_v1, %v2739_v35  ;;  %v5596_v13 = vcombine.low %v2731_v1, %v2739_v35  ;;  %v6301_v51 = vld [vmem:[%s6704_s29 + $0x30] sm:$0xff]   ;;  %v6311_v1 = vld [vmem:[%s6704_s29 + $0x58] sm:$0xff]  }
 0xe54   : > { %5650 = vmatmul.mubr.msk.bf16.vlgmr.msra.gmra.mxu1 %vm829_vm1, %v7077_v9  ;;  %5652 = vmatmul.mubr.msk.bf16.vlgmr.msra.gmra.mxu0 %vm829_vm1, %v7077_v9  ;;  %v7087_v18 = vadd.f32 %v5585_v0, %v2713_v10  ;;  %v2738_v0 = vld [vmem:[%s6692_s1 + $0x60] sm:$0xff]  ;;  %v2781_v10 = vld [vmem:[%s6692_s1 + $0x1b8] sm:$0xff]  ;;  %v6302_v53 = vld [vmem:[%s6704_s29 + $0xb0] sm:$0xff]  }
 0xe55   : > { %3315 = vmatpush1.bf16.msra.mxu1 %v5638_v31  ;;  %3368 = vmatpush1.bf16.msra.mxu0 %v5640_v62  ;;  %v2787_v31 = vld [vmem:[%s6692_s1 + $0x1e8] sm:$0xff]  ;;  %v5590_v62 = vcombine.low %v2728_v60, %v2736_v55  ;;  %v5595_v4 = vcombine.high %v2730_v61, %v2738_v0  ;;  %v5631_v60 = vcombine.high %v2764_v15, %v2772_v16  ;;  %v6312_v35 = vld [vmem:[%s6704_s29 + $0xd8] sm:$0xff]  }
 0xe56   : > { %7596 = vst [vmem:[#allocation9_spill] sm:$0xff] %v7087_v18  ;;  %3316 = vmatprep.subr.bf16.mxu1 %v5623_v11  ;;  %3369 = vmatprep.subr.bf16.mxu0 %v5625_v12  ;;  %v7099_v26 = vpack.c.bf16 %v7087_v18, %v7095_v22  ;;  %v5645_v63 = vcombine.high %v2779_v30, %v2787_v31  ;;  %v2789_v11 = vld [vmem:[%s6692_s1 + $0x1f8] sm:$0xff] }
 0xe57   : > { %3242 = vmatprep.mubr.bf16.mxu1 %v6543_v24  ;;  %3295 = vmatprep.mubr.bf16.mxu0 %v6543_v24  ;;  %v5644_v44 = vcombine.low %v2779_v30, %v2787_v31  ;;  %v5594_v12 = vcombine.low %v2730_v61, %v2738_v0  ;;  %v5649_v54 = vcombine.high %v2781_v10, %v2789_v11  ;;  %v2732_v30 = vld [vmem:[%s6692_s1 + $0x30] sm:$0xff]  ;;  %v6309_v61 = vld [vmem:[%s6704_s29 + $0x20] sm:$0xff]  }
 0xe58   : > { %v2740_v31 = vld [vmem:[%s6692_s1 + $0x70] sm:$0xff]  ;;  %v6310_v0 = vld [vmem:[%s6704_s29 + $0xa0] sm:$0xff]  }
 0xe59   : > { %3317 = vmatpush1.bf16.msra.mxu1 %v5622_v42  ;;  %3370 = vmatpush1.bf16.msra.mxu0 %v5624_v17  ;;  %v2765_v42 = vld [vmem:[%s6692_s1 + $0x138] sm:$0xff]  ;;  %v5599_v33 = vcombine.high %v2732_v30, %v2740_v31  ;;  %v5598_v37 = vcombine.low %v2732_v30, %v2740_v31 }
 0xe5a   : > { %3318 = vmatprep.subr.bf16.mxu1 %v5607_v19  ;;  %3371 = vmatprep.subr.bf16.mxu0 %v5609_v43  ;;  %v2773_v17 = vld [vmem:[%s6692_s1 + $0x178] sm:$0xff]  ;;  %v5646_v19 = vcombine.low %v2780_v6, %v2788_v36  ;;  %v5648_v43 = vcombine.low %v2781_v10, %v2789_v11  ;;  %v6318_v6 = vld [vmem:[%s6704_s29 + $0x90] sm:$0xff]   ;;  %v6319_v36 = vld [vmem:[%s6704_s29 + $0x48] sm:$0xff]  }
 0xe5b   : > { %v5633_v55 = vcombine.high %v2765_v42, %v2773_v17  ;;  %v6320_v10 = vld [vmem:[%s6704_s29 + $0xc8] sm:$0xff]  }
 0xe5c   : > { %5651 = vmatmul.mubr.msk.bf16.gmra.mxu1 %vm829_vm1, %v7099_v26  ;;  %5653 = vmatmul.mubr.msk.bf16.gmra.mxu0 %vm829_vm1, %v7099_v26  ;;  %v6321_v11 = vld [vmem:[%s6704_s29 + $0x8] sm:$0xff]  }
 0xe5d   : > { %3319 = vmatpush1.bf16.msra.mxu1 %v5606_v23  ;;  %3372 = vmatpush1.bf16.msra.mxu0 %v5608_v25  ;;  %v2749_v23 = vld [vmem:[%s6692_s1 + $0xb8] sm:$0xff] }
 0xe5e   : > { %3320 = vmatprep.subr.bf16.mxu1 %v5591_v27  ;;  %3373 = vmatprep.subr.bf16.mxu0 %v5593_v47  ;;  %v2757_v25 = vld [vmem:[%s6692_s1 + $0xf8] sm:$0xff]  ;;  %v5630_v27 = vcombine.low %v2764_v15, %v2772_v16  ;;  %v5632_v47 = vcombine.low %v2765_v42, %v2773_v17  ;;  %v6326_v15 = vld [vmem:[%s6704_s29 + $0x80] sm:$0xff]   ;;  %v2808_v17 = vsub.s32 3, %v6743_v38 }
 0xe5f   : > { %3338 = vmatprep.mubr.bf16.mxu1 %v6543_v24  ;;  %3391 = vmatprep.mubr.bf16.mxu0 %v6543_v24  ;;  %v5617_v29 = vcombine.high %v2749_v23, %v2757_v25  ;;  %v6327_v16 = vld [vmem:[%s6704_s29 + $0x178] sm:$0xff]  }
 0xe60   : > { %v6328_v42 = vld [vmem:[%s6704_s29 + $0x1f8] sm:$0xff]  }
 0xe61   : > { %3321 = vmatpush1.bf16.msra.mxu1 %v5590_v62  ;;  %3374 = vmatpush1.bf16.msra.mxu0 %v5592_v32  ;;  %v2733_v62 = vld [vmem:[%s6692_s1 + $0x38] sm:$0xff] }
 0xe62   : > { %3420 = vmatprep.subr.bf16.mxu1 %v5643_v52  ;;  %3473 = vmatprep.subr.bf16.mxu0 %v5645_v63  ;;  %v2741_v32 = vld [vmem:[%s6692_s1 + $0x78] sm:$0xff]  ;;  %v5614_v52 = vcombine.low %v2748_v20, %v2756_v21  ;;  %v5616_v63 = vcombine.low %v2749_v23, %v2757_v25 }
 0xe63   : > { %v5601_v34 = vcombine.high %v2733_v62, %v2741_v32  ;;  %v5600_v40 = vcombine.low %v2733_v62, %v2741_v32 }
 0xe64   : > { %5654 = vmatmul.mubr.msk.bf16.vlgmr.msra.gmra.mxu1 %vm829_vm1, %v7077_v9  ;;  %5656 = vmatmul.mubr.msk.bf16.vlgmr.msra.gmra.mxu0 %vm829_vm1, %v7077_v9 }
 0xe65   : > { %3421 = vmatpush1.bf16.msra.mxu1 %v5642_v41  ;;  %3474 = vmatpush1.bf16.msra.mxu0 %v5644_v44  ;;  %v6295_v41 = vld [vmem:[%s6704_s29 + $0x78] sm:$0xff]  }
 0xe66   : > { %3422 = vmatprep.subr.bf16.mxu1 %v5627_v45  ;;  %3475 = vmatprep.subr.bf16.mxu0 %v5629_v48  ;;  %v6296_v44 = vld [vmem:[%s6704_s29 + $0xf8] sm:$0xff]  }
 0xe67   : > { %3348 = vmatprep.mubr.bf16.mxu1 %v6543_v24  ;;  %3401 = vmatprep.mubr.bf16.mxu0 %v6543_v24  ;;  %v6297_v45 = vld [vmem:[%s6704_s29 + $0x38] sm:$0xff]  }
 0xe68   : > { %v6298_v48 = vld [vmem:[%s6704_s29 + $0xb8] sm:$0xff]  }
 0xe69   : > { %3423 = vmatpush1.bf16.msra.mxu1 %v5626_v56  ;;  %3476 = vmatpush1.bf16.msra.mxu0 %v5628_v57  ;;  %v6303_v56 = vld [vmem:[%s6704_s29 + $0x68] sm:$0xff]  }
 0xe6a   : > { %3424 = vmatprep.subr.bf16.mxu1 %v5611_v58  ;;  %3477 = vmatprep.subr.bf16.mxu0 %v5613_v59  ;;  %v6304_v57 = vld [vmem:[%s6704_s29 + $0xe8] sm:$0xff]   ;;  %v6308_v59 = vld [vmem:[%s6704_s29 + $0xe0] sm:$0xff]  }
 0xe6b   : > { %v6306_v58 = vld [vmem:[%s6704_s29 + $0xa8] sm:$0xff]  }
 0xe6c   : > { %5655 = vmatmul.mubr.msk.bf16.gmra.mxu1 %vm829_vm1, %v7099_v26  ;;  %5657 = vmatmul.mubr.msk.bf16.gmra.mxu0 %vm829_vm1, %v7099_v26 }
 0xe6d   : > { %3425 = vmatpush1.bf16.msra.mxu1 %v5610_v2  ;;  %3478 = vmatpush1.bf16.msra.mxu0 %v5612_v3  ;;  %v6313_v2 = vld [vmem:[%s6704_s29 + $0x18] sm:$0xff]  }
 0xe6e   : > { %3426 = vmatprep.subr.bf16.mxu1 %v5595_v4  ;;  %3479 = vmatprep.subr.bf16.mxu0 %v5597_v5  ;;  %v6314_v3 = vld [vmem:[%s6704_s29 + $0x98] sm:$0xff]   ;;  %v6316_v4 = vld [vmem:[%s6704_s29 + $0xd0] sm:$0xff]  }
 0xe6f   : > { %3444 = vmatprep.mubr.bf16.mxu1 %v6543_v24  ;;  %3497 = vmatprep.mubr.bf16.mxu0 %v6543_v24  ;;  %v6317_v5 = vld [vmem:[%s6704_s29 + $0x10] sm:$0xff]  }
 0xe71   : > { %3427 = vmatpush1.bf16.msra.mxu1 %v5594_v12  ;;  %3480 = vmatpush1.bf16.msra.mxu0 %v5596_v13  ;;  %v6322_v12 = vld [vmem:[%s6704_s29 + $0x88] sm:$0xff]   ;;  %v6323_v13 = vld [vmem:[%s6704_s29 + $0x40] sm:$0xff]  }
 0xe72   : > { %3526 = vmatprep.subr.bf16.mxu1 %v5647_v14  ;;  %3579 = vmatprep.subr.bf16.mxu0 %v5649_v54  ;;  %v6324_v14 = vld [vmem:[%s6704_s29 + $0xc0] sm:$0xff]  }
 0xe73   : > { %v6325_v54 = vld [vmem:[%s6704_s29] sm:$0xff]  }
 0xe74   : > { %5658 = vmatmul.mubr.msk.bf16.vlgmr.msra.gmra.mxu1 %vm829_vm1, %v7077_v9  ;;  %5660 = vmatmul.mubr.msk.bf16.vlgmr.msra.gmra.mxu0 %vm829_vm1, %v7077_v9 }
 0xe75   : > { %3527 = vmatpush1.bf16.msra.mxu1 %v5646_v19  ;;  %3580 = vmatpush1.bf16.msra.mxu0 %v5648_v43  ;;  %v2804_v19 = vsub.s32 2, %v6743_v38  ;;  %v7210_v43 = vld [vmem:[%s6698_s17] sm:$0xff] }
 0xe76   : > { %3528 = vmatprep.subr.bf16.mxu1 %v5631_v60  ;;  %3581 = vmatprep.subr.bf16.mxu0 %v5633_v55  ;;  %v2801_v20 = vrot.slane %v7210_v43, %v6755_v46  ;;  %v2809_v21 = vrot.slane %v7210_v43, %v2808_v17  ;;  %v2797_v23 = vrot.slane %v7210_v43, %v6746_v39 }
 0xe77   : > { %3454 = vmatprep.mubr.bf16.mxu1 %v6543_v24  ;;  %3507 = vmatprep.mubr.bf16.mxu0 %v6543_v24  ;;  %v2805_v25 = vrot.slane %v7210_v43, %v2804_v19 }
 0xe79   : > { %3529 = vmatpush1.bf16.msra.mxu1 %v5630_v27  ;;  %3582 = vmatpush1.bf16.msra.mxu0 %v5632_v47 }
 0xe7a   : > { %3530 = vmatprep.subr.bf16.mxu1 %v5615_v28  ;;  %3583 = vmatprep.subr.bf16.mxu0 %v5617_v29 }
 0xe7c   : > { %5659 = vmatmul.mubr.msk.bf16.gmra.mxu1 %vm829_vm1, %v7099_v26  ;;  %5661 = vmatmul.mubr.msk.bf16.gmra.mxu0 %vm829_vm1, %v7099_v26 }
 0xe7d   : > { %3531 = vmatpush1.bf16.msra.mxu1 %v5614_v52  ;;  %3584 = vmatpush1.bf16.msra.mxu0 %v5616_v63 }
 0xe7e   : > { %3532 = vmatprep.subr.bf16.mxu1 %v5599_v33  ;;  %3585 = vmatprep.subr.bf16.mxu0 %v5601_v34 }
 0xe7f   : > { %3550 = vmatprep.mubr.bf16.mxu1 %v6543_v24  ;;  %3603 = vmatprep.mubr.bf16.mxu0 %v6543_v24 }
 0xe81   : > { %3533 = vmatpush1.bf16.msra.mxu1 %v5598_v37  ;;  %3586 = vmatpush1.bf16.msra.mxu0 %v5600_v40 }
 0xe82   : > { %5878 = vmatprep.subr.bf16.mxu1 %v6295_v41  ;;  %5906 = vmatprep.subr.bf16.mxu0 %v6296_v44 }
 0xe84   : > { %5662 = vmatmul.mubr.msk.bf16.vlgmr.msra.gmra.mxu1 %vm829_vm1, %v7077_v9  ;;  %5664 = vmatmul.mubr.msk.bf16.vlgmr.msra.gmra.mxu0 %vm829_vm1, %v7077_v9  ;;  %v6305_v9 = vld [vmem:[%s6704_s29 + $0x28] sm:$0xff]  }
 0xe85   : > { %3560 = vmatprep.mubr.bf16.mxu1 %v6543_v24  ;;  %3613 = vmatprep.mubr.bf16.mxu0 %v6543_v24  ;;  %v6307_v24 = vld [vmem:[%s6704_s29 + $0x60] sm:$0xff]  }
 0xe86   : > { %5879 = vmatpush3.bf16.msra.mxu1 %v6297_v45  ;;  %5907 = vmatpush3.bf16.msra.mxu0 %v6298_v48 }
 0xe87   : > { %5880 = vmatprep.subr.bf16.mxu1 %v6299_v49  ;;  %5908 = vmatprep.subr.bf16.mxu0 %v6300_v50 }
 0xe8a   : > { %5881 = vmatpush3.bf16.msra.mxu1 %v6301_v51  ;;  %5909 = vmatpush3.bf16.msra.mxu0 %v6302_v53 }
 0xe8b   : > { %5882 = vmatprep.subr.bf16.mxu1 %v6303_v56  ;;  %5910 = vmatprep.subr.bf16.mxu0 %v6304_v57 }
 0xe8c   : > { %5663 = vmatmul.mubr.msk.bf16.gmra.mxu1 %vm829_vm1, %v7099_v26  ;;  %5665 = vmatmul.mubr.msk.bf16.gmra.mxu0 %vm829_vm1, %v7099_v26  ;;  %v6315_v26 = vld [vmem:[%s6704_s29 + $0x50] sm:$0xff]  }
 0xe8e   : > { %5883 = vmatpush3.bf16.msra.mxu1 %v6305_v9  ;;  %5911 = vmatpush3.bf16.msra.mxu0 %v6306_v58 }
 0xe8f   : > { %5884 = vmatprep.subr.bf16.mxu1 %v6307_v24  ;;  %5912 = vmatprep.subr.bf16.mxu0 %v6308_v59 }
 0xe92   : > { %5885 = vmatpush3.bf16.msra.mxu1 %v6309_v61  ;;  %5913 = vmatpush3.bf16.msra.mxu0 %v6310_v0  ;;  %v6329_v61 = vld [vmem:[%s6704_s29 + $0x138] sm:$0xff]  }
 0xe93   : > { %5886 = vmatprep.subr.bf16.mxu1 %v6311_v1  ;;  %5914 = vmatprep.subr.bf16.mxu0 %v6312_v35  ;;  %v6330_v0 = vld [vmem:[%s6704_s29 + $0x1b8] sm:$0xff]   ;;  %v2816_v1 = vsub.s32 5, %v6743_v38 }
 0xe96   : > { %5887 = vmatpush3.bf16.msra.mxu1 %v6313_v2  ;;  %5915 = vmatpush3.bf16.msra.mxu0 %v6314_v3 }
 0xe97   : > { %5888 = vmatprep.subr.bf16.mxu1 %v6315_v26  ;;  %5916 = vmatprep.subr.bf16.mxu0 %v6316_v4 }
 0xe9a   : > { %5889 = vmatpush3.bf16.msra.mxu1 %v6317_v5  ;;  %5917 = vmatpush3.bf16.msra.mxu0 %v6318_v6  ;;  %v6331_v5 = vld [vmem:[%s6704_s29 + $0x170] sm:$0xff]  }
 0xe9b   : > { %5890 = vmatprep.subr.bf16.mxu1 %v6319_v36  ;;  %5918 = vmatprep.subr.bf16.mxu0 %v6320_v10  ;;  %v6332_v6 = vld [vmem:[%s6704_s29 + $0x1f0] sm:$0xff]   ;;  %v2824_v36 = vsub.s32 7, %v6743_v38 }
 0xe9e   : > { %5891 = vmatpush3.bf16.msra.mxu1 %v6321_v11  ;;  %5919 = vmatpush3.bf16.msra.mxu0 %v6322_v12 }
 0xe9f   : > { %5892 = vmatprep.subr.bf16.mxu1 %v6323_v13  ;;  %5920 = vmatprep.subr.bf16.mxu0 %v6324_v14 }
 0xea2   : > { %5893 = vmatpush3.bf16.msra.mxu1 %v6325_v54  ;;  %5921 = vmatpush3.bf16.msra.mxu0 %v6326_v15 }
 0xea3   : > { %5934 = vmatprep.subr.bf16.mxu1 %v6327_v16  ;;  %5962 = vmatprep.subr.bf16.mxu0 %v6328_v42 }
 0xf14   : > { %v3234_v60 = vpop.f32.mrf.mxu1  ;;  %v3287_v55 = vpop.f32.mrf.mxu0 }
 0xf15   : > { %v3235_v52 = vadd.f32 %v3234_v60, %v2797_v23  ;;  %v3288_v63 = vadd.f32 %v3287_v55, %v2805_v25  ;;  %v6333_v60 = vld [vmem:[%s6704_s29 + $0x130] sm:$0xff]  }
 0xf16   : > { %v3236_v27 = vpop.f32.mrf.mxu1  ;;  %v3289_v47 = vpop.f32.mrf.mxu0 }
 0xf17   : > { %v3237_v30 = vadd.f32 %v3236_v27, %v2801_v20  ;;  %v3290_v31 = vadd.f32 %v3289_v47, %v2809_v21  ;;  %v3624_v56 = vmax.f32 %v3235_v52, 0.0  ;;  %v3626_v57 = vmax.f32 %v3288_v63, 0.0 }
 0xf18   : > { %v3238_v28 = vpop.f32.mrf.mxu1  ;;  %v3291_v29 = vpop.f32.mrf.mxu0 }
 0xf19   : > { %v3239_v62 = vadd.f32 %v3238_v28, %v2797_v23  ;;  %v3292_v32 = vadd.f32 %v3291_v29, %v2805_v25  ;;  %v3625_v49 = vmax.f32 %v3237_v30, 0.0  ;;  %v3627_v50 = vmax.f32 %v3290_v31, 0.0 }
 0xf1a   : > { %v3240_v33 = vpop.f32.mrf.mxu1  ;;  %v3293_v34 = vpop.f32.mrf.mxu0 }
 0xf1b   : > { %v3241_v37 = vadd.f32 %v3240_v33, %v2801_v20  ;;  %v3294_v40 = vadd.f32 %v3293_v34, %v2809_v21  ;;  %v3640_v41 = vmax.f32 %v3239_v62, 0.0  ;;  %v3642_v44 = vmax.f32 %v3292_v32, 0.0  ;;  %v6336_v33 = vld [vmem:[%s6704_s29 + $0x1e8] sm:$0xff]  }
 0xf1c   : > { %v3244_v45 = vpop.f32.mrf.mxu1  ;;  %v3297_v48 = vpop.f32.mrf.mxu0 }
 0xf1d   : > { %v3641_v51 = vmax.f32 %v3241_v37, 0.0  ;;  %v3643_v53 = vmax.f32 %v3294_v40, 0.0  ;;  %v3688_v35 = vpack.c.bf16 %v3640_v41, %v3624_v56  ;;  %v3690_v2 = vpack.c.bf16 %v3642_v44, %v3626_v57  ;;  %v6337_v41 = vld [vmem:[%s6704_s29 + $0x128] sm:$0xff]   ;;  %v6340_v57 = vld [vmem:[%s6704_s29 + $0x1e0] sm:$0xff]  }
 0xf1e   : > { %v3246_v9 = vpop.f32.mrf.mxu1  ;;  %v3299_v58 = vpop.f32.mrf.mxu0  ;;  %v3245_v13 = vadd.f32 %v3244_v45, %v2797_v23  ;;  %v3298_v15 = vadd.f32 %v3297_v48, %v2805_v25 }
 0xf1f   : > { %v3689_v24 = vpack.c.bf16 %v3641_v51, %v3625_v49  ;;  %v3691_v59 = vpack.c.bf16 %v3643_v53, %v3627_v50  ;;  %v3247_v3 = vadd.f32 %v3246_v9, %v2801_v20  ;;  %v3300_v10 = vadd.f32 %v3299_v58, %v2809_v21  ;;  %v6338_v49 = vld [vmem:[%s6704_s29 + $0x1a8] sm:$0xff]   ;;  %v6339_v50 = vld [vmem:[%s6704_s29 + $0x160] sm:$0xff]  }
 0xf20   : > { %v3248_v26 = vpop.f32.mrf.mxu1  ;;  %v3301_v4 = vpop.f32.mrf.mxu0  ;;  %v3656_v32 = vmax.f32 %v3245_v13, 0.0  ;;  %v3658_v34 = vmax.f32 %v3298_v15, 0.0 }
 0xf21   : > { %v3249_v11 = vadd.f32 %v3248_v26, %v2797_v23  ;;  %v3302_v12 = vadd.f32 %v3301_v4, %v2805_v25  ;;  %4783 = vmatprep.mubr.bf16.mxu1 %v3689_v24  ;;  %4832 = vmatprep.mubr.bf16.mxu0 %v3691_v59  ;;  %v3657_v55 = vmax.f32 %v3247_v3, 0.0  ;;  %v7236_v23 = vrot.slane %v7210_v43, %v2816_v1  ;;  %v6335_v25 = vld [vmem:[%s6704_s29 + $0x168] sm:$0xff]   ;;  %v6343_v3 = vld [vmem:[%s6704_s29 + $0x158] sm:$0xff]  }
 0xf22   : > { %v3250_v14 = vpop.f32.mrf.mxu1  ;;  %v3303_v54 = vpop.f32.mrf.mxu0  ;;  %4784 = vmatmul.mubr.bf16.vlgmr.msra.gmra.mxu1 %v3688_v35  ;;  %4833 = vmatmul.mubr.bf16.vlgmr.msra.gmra.mxu0 %v3690_v2  ;;  %v3659_v29 = vmax.f32 %v3300_v10, 0.0  ;;  %v6342_v2 = vld [vmem:[%s6704_s29 + $0x1a0] sm:$0xff]   ;;  %v6344_v10 = vld [vmem:[%s6704_s29 + $0x1d8] sm:$0xff]  }
 0xf23   : > { %v3251_v16 = vadd.f32 %v3250_v14, %v2801_v20  ;;  %v3304_v42 = vadd.f32 %v3303_v54, %v2809_v21  ;;  %5935 = vmatpush3.bf16.msra.mxu1 %v6329_v61  ;;  %5963 = vmatpush3.bf16.msra.mxu0 %v6330_v0  ;;  %v3672_v27 = vmax.f32 %v3249_v11, 0.0  ;;  %v7241_v20 = vrot.slane %v7210_v43, %v2824_v36  ;;  %v6334_v21 = vld [vmem:[%s6704_s29 + $0x1b0] sm:$0xff]   ;;  %v6341_v61 = vld [vmem:[%s6704_s29 + $0x120] sm:$0xff]   ;;  %v6345_v54 = vld [vmem:[%s6704_s29 + $0x118] sm:$0xff]  }
 0xf24   : > { %v7229_v47 = vpop.f32.mrf.mxu1  ;;  %v7231_v28 = vpop.f32.mrf.mxu0  ;;  %5936 = vmatprep.subr.bf16.mxu1 %v6331_v5  ;;  %5964 = vmatprep.subr.bf16.mxu0 %v6332_v6  ;;  %v3674_v30 = vmax.f32 %v3302_v12, 0.0 }
 0xf25   : > { %v3673_v31 = vmax.f32 %v3251_v16, 0.0  ;;  %v3675_v62 = vmax.f32 %v3304_v42, 0.0  ;;  %v3704_v44 = vpack.c.bf16 %v3672_v27, %v3656_v32  ;;  %v6346_v42 = vld [vmem:[%s6704_s29 + $0x198] sm:$0xff]   ;;  %v2812_v27 = vsub.s32 4, %v6743_v38  ;;  %v6350_v32 = vld [vmem:[%s6704_s29 + $0x190] sm:$0xff]  }
 0xf26   : > { %v3342_v52 = vpop.f32.mrf.mxu1  ;;  %v3395_v63 = vpop.f32.mrf.mxu0  ;;  %v3706_v51 = vpack.c.bf16 %v3674_v30, %v3658_v34  ;;  %v6349_v30 = vld [vmem:[%s6704_s29 + $0x110] sm:$0xff]  }
 0xf27   : > { %v3705_v37 = vpack.c.bf16 %v3673_v31, %v3657_v55  ;;  %v3707_v40 = vpack.c.bf16 %v3675_v62, %v3659_v29  ;;  %5937 = vmatpush3.bf16.msra.mxu1 %v6333_v60  ;;  %5965 = vmatpush3.bf16.msra.mxu0 %v6334_v21  ;;  %v3343_v53 = vadd.f32 %v3342_v52, %v7236_v23  ;;  %v6347_v60 = vld [vmem:[%s6704_s29 + $0x150] sm:$0xff]   ;;  %v2820_v29 = vsub.s32 6, %v6743_v38  ;;  %v6351_v52 = vld [vmem:[%s6704_s29 + $0x148] sm:$0xff]  }
 0xf28   : > { %v7247_v45 = vpop.f32.mrf.mxu1  ;;  %v7249_v48 = vpop.f32.mrf.mxu0  ;;  %5938 = vmatprep.subr.bf16.mxu1 %v6335_v25  ;;  %v3396_v56 = vadd.f32 %v3395_v63, %v7241_v20  ;;  %5966 = vmatprep.subr.bf16.mxu0 %v6336_v33  ;;  %v6348_v55 = vld [vmem:[%s6704_s29 + $0x1d0] sm:$0xff]   ;;  %v6352_v63 = vld [vmem:[%s6704_s29 + $0x1c8] sm:$0xff]   ;;  %v2813_v33 = vrot.slane %v7210_v43, %v2812_v27 }
 0xf29   : > { %4791 = vmatprep.mubr.bf16.mxu1 %v3705_v37  ;;  %4840 = vmatprep.mubr.bf16.mxu0 %v3707_v40  ;;  %v3629_v26 = vmax.f32 %v3343_v53, 0.0  ;;  %v2821_v37 = vrot.slane %v7210_v43, %v2820_v29 }
 0xf2a   : > { %v3346_v9 = vpop.f32.mrf.mxu1  ;;  %v3399_v58 = vpop.f32.mrf.mxu0  ;;  %4792 = vmatmul.mubr.bf16.gmra.mxu1 %v3704_v44  ;;  %4841 = vmatmul.mubr.bf16.gmra.mxu0 %v3706_v51  ;;  %v3631_v4 = vmax.f32 %v3396_v56, 0.0  ;;  %v3345_v44 = vadd.f32 %v7247_v45, %v2813_v33  ;;  %v6356_v56 = vld [vmem:[%s6704_s29 + $0x1c0] sm:$0xff]   ;;  %v3341_v43 = vadd.f32 %v7229_v47, %v2813_v33 }
 0xf2b   : > { %v3347_v24 = vadd.f32 %v3346_v9, %v7236_v23  ;;  %v3400_v59 = vadd.f32 %v3399_v58, %v7241_v20  ;;  %5939 = vmatpush3.bf16.msra.mxu1 %v6337_v41  ;;  %5967 = vmatpush3.bf16.msra.mxu0 %v6338_v49  ;;  %v6353_v41 = vld [vmem:[%s6704_s29 + $0x108] sm:$0xff]   ;;  %v3398_v51 = vadd.f32 %v7249_v48, %v2821_v37  ;;  %v6357_v48 = vld [vmem:[%s6704_s29 + $0x100] sm:$0xff]  }
 0xf2c   : > { %v7259_v0 = vpop.f32.mrf.mxu1  ;;  %v7261_v35 = vpop.f32.mrf.mxu0  ;;  %5940 = vmatprep.subr.bf16.mxu1 %v6339_v50  ;;  %5968 = vmatprep.subr.bf16.mxu0 %v6340_v57  ;;  %v6354_v49 = vld [vmem:[%s6704_s29 + $0x188] sm:$0xff]   ;;  %v6355_v50 = vld [vmem:[%s6704_s29 + $0x140] sm:$0xff]   ;;  %v3394_v45 = vadd.f32 %v7231_v28, %v2821_v37  ;;  %v3628_v28 = vmax.f32 %v3341_v43, 0.0 }
 0xf2d   : > { %v3645_v5 = vmax.f32 %v3347_v24, 0.0  ;;  %v3647_v6 = vmax.f32 %v3400_v59, 0.0  ;;  %v3644_v59 = vmax.f32 %v3345_v44, 0.0  ;;  %v6358_v47 = vld [vmem:[%s6704_s29 + $0x180] sm:$0xff]   ;;  %v6368_v43 = vld [vmem:[%s6704_s29 + $0x2e8] sm:$0xff]  }
 0xf2e   : > { %v3352_v11 = vpop.f32.mrf.mxu1  ;;  %v3405_v12 = vpop.f32.mrf.mxu0 }
 0xf2f   : > { %v3693_v13 = vpack.c.bf16 %v3645_v5, %v3629_v26  ;;  %v3695_v14 = vpack.c.bf16 %v3647_v6, %v3631_v4  ;;  %5941 = vmatpush3.bf16.msra.mxu1 %v6341_v61  ;;  %5969 = vmatpush3.bf16.msra.mxu0 %v6342_v2  ;;  %v3353_v58 = vadd.f32 %v3352_v11, %v7236_v23  ;;  %v6359_v2 = vld [vmem:[%s6704_s29 + $0x278] sm:$0xff]  }
 0xf30   : > { %v7267_v15 = vpop.f32.mrf.mxu1  ;;  %v7269_v16 = vpop.f32.mrf.mxu0  ;;  %5942 = vmatprep.subr.bf16.mxu1 %v6343_v3  ;;  %5970 = vmatprep.subr.bf16.mxu0 %v6344_v10  ;;  %v3406_v61 = vadd.f32 %v3405_v12, %v7241_v20  ;;  %v3646_v3 = vmax.f32 %v3398_v51, 0.0  ;;  %v6360_v4 = vld [vmem:[%s6704_s29 + $0x2f8] sm:$0xff]   ;;  %v3630_v10 = vmax.f32 %v3394_v45, 0.0 }
 0xf31   : > { %4881 = vmatprep.mubr.bf16.mxu1 %v3693_v13  ;;  %4930 = vmatprep.mubr.bf16.mxu0 %v3695_v14  ;;  %v3661_v11 = vmax.f32 %v3353_v58, 0.0  ;;  %v3692_v13 = vpack.c.bf16 %v3644_v59, %v3628_v28  ;;  %v6372_v28 = vld [vmem:[%s6704_s29 + $0x2e0] sm:$0xff]  }
 0xf32   : > { %v3356_v21 = vpop.f32.mrf.mxu1  ;;  %v3409_v25 = vpop.f32.mrf.mxu0  ;;  %v3663_v14 = vmax.f32 %v3406_v61, 0.0  ;;  %v6369_v61 = vld [vmem:[%s6704_s29 + $0x228] sm:$0xff]  }
 0xf33   : > { %5943 = vmatpush3.bf16.msra.mxu1 %v6345_v54  ;;  %5971 = vmatpush3.bf16.msra.mxu0 %v6346_v42  ;;  %v3357_v53 = vadd.f32 %v3356_v21, %v7236_v23  ;;  %v3410_v57 = vadd.f32 %v3409_v25, %v7241_v20  ;;  %v7313_v23 = vld [vmem:[%s6698_s17 + $0x8] sm:$0xff]  ;;  %v3355_v54 = vadd.f32 %v7267_v15, %v2813_v33 }
 0xf34   : > { %v7277_v31 = vpop.f32.mrf.mxu1  ;;  %v7279_v62 = vpop.f32.mrf.mxu0  ;;  %5944 = vmatprep.subr.bf16.mxu1 %v6347_v60  ;;  %5972 = vmatprep.subr.bf16.mxu0 %v6348_v55  ;;  %v7317_v20 = vrot.slane %v7313_v23, %v6755_v46  ;;  %v7323_v42 = vrot.slane %v7313_v23, %v2808_v17  ;;  %v6361_v60 = vld [vmem:[%s6704_s29 + $0x238] sm:$0xff]   ;;  %v3694_v55 = vpack.c.bf16 %v3646_v3, %v3630_v10  ;;  %v6364_v17 = vld [vmem:[%s6704_s29 + $0x2f0] sm:$0xff]   ;;  %v6370_v3 = vld [vmem:[%s6704_s29 + $0x2a8] sm:$0xff]  }
 0xf35   : > { %v3677_v26 = vmax.f32 %v3357_v53, 0.0  ;;  %v3679_v5 = vmax.f32 %v3410_v57, 0.0  ;;  %v3408_v46 = vadd.f32 %v7269_v16, %v2821_v37  ;;  %v3351_v15 = vadd.f32 %v7259_v0, %v2813_v33  ;;  %v6373_v10 = vld [vmem:[%s6704_s29 + $0x220] sm:$0xff]  }
 0xf36   : > { %v3448_v34 = vpop.f32.mrf.mxu1  ;;  %v7290_v40 = vpop.f32.mrf.mxu0 }
 0xf37   : > { %5945 = vmatpush3.bf16.msra.mxu1 %v6349_v30  ;;  %5973 = vmatpush3.bf16.msra.mxu0 %v6350_v32  ;;  %v3709_v21 = vpack.c.bf16 %v3677_v26, %v3661_v11  ;;  %v6362_v30 = vld [vmem:[%s6704_s29 + $0x2b8] sm:$0xff]   ;;  %v6363_v32 = vld [vmem:[%s6704_s29 + $0x270] sm:$0xff]   ;;  %v3449_v16 = vadd.f32 %v3448_v34, %v7317_v20  ;;  %v3502_v0 = vadd.f32 %v7290_v40, %v7323_v42  ;;  %v3678_v51 = vmax.f32 %v3408_v46, 0.0  ;;  %v6367_v34 = vld [vmem:[%s6704_s29 + $0x268] sm:$0xff]  }
 0xf38   : > { %5946 = vmatprep.subr.bf16.mxu1 %v6351_v52  ;;  %5974 = vmatprep.subr.bf16.mxu0 %v6352_v63  ;;  %v7301_v9 = vpop.f32.mrf.mxu1  ;;  %v7305_v24 = vpop.f32.mrf.mxu0  ;;  %v3711_v52 = vpack.c.bf16 %v3679_v5, %v3663_v14  ;;  %v6371_v26 = vld [vmem:[%s6704_s29 + $0x260] sm:$0xff]   ;;  %v6379_v46 = vld [vmem:[%s6704_s29 + $0x250] sm:$0xff]  }
 0xf39   : > { %v3633_v40 = vmax.f32 %v3449_v16, 0.0  ;;  %v6374_v11 = vld [vmem:[%s6704_s29 + $0x2a0] sm:$0xff]   ;;  %v2837_v16 = vrot.slane %v7313_v23, %v2804_v19 }
 0xf3a   : > { %v3452_v6 = vpop.f32.mrf.mxu1  ;;  %v3505_v12 = vpop.f32.mrf.mxu0 }
 0xf3b   : > { %5947 = vmatpush3.bf16.msra.mxu1 %v6353_v41  ;;  %5975 = vmatpush3.bf16.msra.mxu0 %v6354_v49  ;;  %v3453_v25 = vadd.f32 %v3452_v6, %v7317_v20  ;;  %v3506_v63 = vadd.f32 %v3505_v12, %v7323_v42  ;;  %v3404_v41 = vadd.f32 %v7261_v35, %v2821_v37  ;;  %v3676_v49 = vmax.f32 %v3355_v54, 0.0  ;;  %v6366_v35 = vld [vmem:[%s6704_s29 + $0x2b0] sm:$0xff]   ;;  %v6375_v12 = vld [vmem:[%s6704_s29 + $0x258] sm:$0xff]  }
 0xf3c   : > { %5948 = vmatprep.subr.bf16.mxu1 %v6355_v50  ;;  %5976 = vmatprep.subr.bf16.mxu0 %v6356_v56  ;;  %v7335_v44 = vpop.f32.mrf.mxu1  ;;  %v7339_v33 = vpop.f32.mrf.mxu0  ;;  %v6365_v50 = vld [vmem:[%s6704_s29 + $0x230] sm:$0xff]   ;;  %v3660_v37 = vmax.f32 %v3351_v15, 0.0 }
 0xf3d   : > { %v3649_v53 = vmax.f32 %v3453_v25, 0.0  ;;  %v3651_v56 = vmax.f32 %v3506_v63, 0.0  ;;  %v3662_v57 = vmax.f32 %v3404_v41, 0.0  ;;  %v6382_v15 = vld [vmem:[%s6704_s29 + $0x290] sm:$0xff]   ;;  %v6384_v63 = vld [vmem:[%s6704_s29 + $0x2c8] sm:$0xff]  }
 0xf3e   : > { %v7345_v45 = vpop.f32.mrf.mxu1  ;;  %v3708_v58 = vpack.c.bf16 %v3676_v49, %v3660_v37  ;;  %v7347_v59 = vpop.f32.mrf.mxu0 }
 0xf3f   : > { %5949 = vmatpush3.bf16.msra.mxu1 %v6357_v48  ;;  %5977 = vmatpush3.bf16.msra.mxu0 %v6358_v47  ;;  %v3635_v48 = vmax.f32 %v3502_v0, 0.0  ;;  %v3710_v47 = vpack.c.bf16 %v3678_v51, %v3662_v57  ;;  %v6385_v0 = vld [vmem:[%s6704_s29 + $0x208] sm:$0xff]  }
 0xf40   : > { %5990 = vmatprep.subr.bf16.mxu1 %v6359_v2  ;;  %6018 = vmatprep.subr.bf16.mxu0 %v6360_v4  ;;  %v3697_v2 = vpack.c.bf16 %v3649_v53, %v3633_v40  ;;  %v7353_v5 = vpop.f32.mrf.mxu1  ;;  %v7355_v6 = vpop.f32.mrf.mxu0  ;;  %v6386_v51 = vld [vmem:[%s6704_s29 + $0x288] sm:$0xff]   ;;  %v6387_v53 = vld [vmem:[%s6704_s29 + $0x240] sm:$0xff]  }
 0xf41   : > { %v3699_v4 = vpack.c.bf16 %v3651_v56, %v3635_v48  ;;  %v6391_v48 = vld [vmem:[%s6704_s29 + $0x378] sm:$0xff]  }
 0xf42   : > { %4882 = vmatmul.mubr.bf16.vlgmr.msra.gmra.mxu1 %v3692_v13  ;;  %4931 = vmatmul.mubr.bf16.vlgmr.msra.gmra.mxu0 %v3694_v55  ;;  %v6376_v13 = vld [vmem:[%s6704_s29 + $0x2d8] sm:$0xff]   ;;  %v3462_v14 = vpop.f32.mrf.mxu1  ;;  %v3515_v54 = vpop.f32.mrf.mxu0 }
 0xf43   : > { %4889 = vmatprep.mubr.bf16.mxu1 %v3709_v21  ;;  %4938 = vmatprep.mubr.bf16.mxu0 %v3711_v52  ;;  %v6378_v55 = vld [vmem:[%s6704_s29 + $0x298] sm:$0xff]   ;;  %v6380_v21 = vld [vmem:[%s6704_s29 + $0x2d0] sm:$0xff]   ;;  %v6383_v52 = vld [vmem:[%s6704_s29 + $0x248] sm:$0xff]   ;;  %v3516_v37 = vadd.f32 %v3515_v54, %v7323_v42 }
 0xf44   : > { %5991 = vmatpush3.bf16.msra.mxu1 %v6361_v60  ;;  %6019 = vmatpush3.bf16.msra.mxu0 %v6362_v30  ;;  %v6377_v60 = vld [vmem:[%s6704_s29 + $0x218] sm:$0xff]   ;;  %v7365_v25 = vpop.f32.mrf.mxu1  ;;  %v7367_v30 = vpop.f32.mrf.mxu0 }
 0xf45   : > { %5992 = vmatprep.subr.bf16.mxu1 %v6363_v32  ;;  %6020 = vmatprep.subr.bf16.mxu0 %v6364_v17  ;;  %v6381_v32 = vld [vmem:[%s6704_s29 + $0x210] sm:$0xff]   ;;  %v2829_v17 = vrot.slane %v7313_v23, %v6746_v39  ;;  %v3463_v39 = vadd.f32 %v3462_v14, %v7317_v20 }
 0xf46   : > { %v3554_v41 = vpop.f32.mrf.mxu1  ;;  %v3607_v49 = vpop.f32.mrf.mxu0 }
 0xf47   : > { %v3447_v19 = vadd.f32 %v7277_v31, %v2829_v17  ;;  %v6390_v31 = vld [vmem:[%s6704_s29 + $0x280] sm:$0xff]  }
 0xf48   : > { %5993 = vmatpush3.bf16.msra.mxu1 %v6365_v50  ;;  %6021 = vmatpush3.bf16.msra.mxu0 %v6366_v35  ;;  %v3451_v50 = vadd.f32 %v7301_v9, %v2829_v17  ;;  %v3504_v35 = vadd.f32 %v7305_v24, %v2837_v16  ;;  %v7387_v56 = vpop.f32.mrf.mxu1  ;;  %v3500_v9 = vadd.f32 %v7279_v62, %v2837_v16  ;;  %v7392_v57 = vpop.f32.mrf.mxu0  ;;  %v6389_v24 = vld [vmem:[%s6704_s29 + $0x200] sm:$0xff]   ;;  %v6392_v62 = vld [vmem:[%s6704_s29 + $0x3f8] sm:$0xff]  }
 0xf49   : > { %5994 = vmatprep.subr.bf16.mxu1 %v6367_v34  ;;  %6022 = vmatprep.subr.bf16.mxu0 %v6368_v43  ;;  %v6388_v34 = vld [vmem:[%s6704_s29 + $0x2c0] sm:$0xff]   ;;  %v3459_v43 = vadd.f32 %v7345_v45, %v7317_v20 }
 0xf4a   : > { %4890 = vmatmul.mubr.bf16.gmra.mxu1 %v3708_v58  ;;  %4939 = vmatmul.mubr.bf16.gmra.mxu0 %v3710_v47  ;;  %v3648_v40 = vmax.f32 %v3451_v50, 0.0  ;;  %v3512_v58 = vadd.f32 %v7347_v59, %v7323_v42  ;;  %v3681_v47 = vmax.f32 %v3463_v39, 0.0  ;;  %v3558_v20 = vpop.f32.mrf.mxu1  ;;  %v3634_v45 = vmax.f32 %v3500_v9, 0.0  ;;  %v3611_v42 = vpop.f32.mrf.mxu0  ;;  %v6399_v50 = vld [vmem:[%s6704_s29 + $0x368] sm:$0xff]   ;;  %v6403_v9 = vld [vmem:[%s6704_s29 + $0x360] sm:$0xff]  }
 0xf4b   : > { %4979 = vmatprep.mubr.bf16.mxu1 %v3697_v2  ;;  %5028 = vmatprep.mubr.bf16.mxu0 %v3699_v4  ;;  %v3632_v2 = vmax.f32 %v3447_v19, 0.0  ;;  %v7403_v4 = vrot.slane %v7313_v23, %v2816_v1  ;;  %v3514_v1 = vadd.f32 %v7355_v6, %v2837_v16  ;;  %v6401_v39 = vld [vmem:[%s6704_s29 + $0x328] sm:$0xff]  }
 0xf4c   : > { %5995 = vmatpush3.bf16.msra.mxu1 %v6369_v61  ;;  %6023 = vmatpush3.bf16.msra.mxu0 %v6370_v3  ;;  %v3650_v61 = vmax.f32 %v3504_v35, 0.0  ;;  %v3683_v3 = vmax.f32 %v3516_v37, 0.0  ;;  %v6402_v37 = vld [vmem:[%s6704_s29 + $0x3a8] sm:$0xff]  }
 0xf4d   : > { %5996 = vmatprep.subr.bf16.mxu1 %v6371_v26  ;;  %6024 = vmatprep.subr.bf16.mxu0 %v6372_v28  ;;  %v3665_v26 = vmax.f32 %v3459_v43, 0.0  ;;  %v3696_v59 = vpack.c.bf16 %v3648_v40, %v3632_v2  ;;  %v3667_v28 = vmax.f32 %v3512_v58, 0.0  ;;  %v3559_v54 = vadd.f32 %v3558_v20, %v7403_v4  ;;  %v7430_v40 = vpop.f32.mrf.mxu1  ;;  %v7432_v58 = vpop.f32.mrf.mxu0  ;;  %v6410_v20 = vld [vmem:[%s6704_s29 + $0x398] sm:$0xff]  }
 0xf4e   : > { %v3555_v6 = vadd.f32 %v3554_v41, %v7403_v4 }
 0xf4f   : > { %v3713_v14 = vpack.c.bf16 %v3681_v47, %v3665_v26  ;;  %v6408_v47 = vld [vmem:[%s6704_s29 + $0x3d8] sm:$0xff]   ;;  %v3617_v2 = vpop.f32.mrf.mxu0  ;;  %v6412_v26 = vld [vmem:[%s6704_s29 + $0x3d0] sm:$0xff]  }
 0xf50   : > { %5997 = vmatpush3.bf16.msra.mxu1 %v6373_v10  ;;  %6025 = vmatpush3.bf16.msra.mxu0 %v6374_v11  ;;  %v3461_v10 = vadd.f32 %v7353_v5, %v2829_v17  ;;  %v7409_v11 = vrot.slane %v7313_v23, %v2824_v36  ;;  %v3457_v5 = vadd.f32 %v7335_v44, %v2829_v17  ;;  %v6396_v36 = vld [vmem:[%s6704_s29 + $0x3f0] sm:$0xff]   ;;  %v3653_v17 = vmax.f32 %v3559_v54, 0.0 }
 0xf51   : > { %5998 = vmatprep.subr.bf16.mxu1 %v6375_v12  ;;  %6026 = vmatprep.subr.bf16.mxu0 %v6376_v13  ;;  %v6393_v12 = vld [vmem:[%s6704_s29 + $0x338] sm:$0xff]   ;;  %v3698_v13 = vpack.c.bf16 %v3650_v61, %v3634_v45  ;;  %v6397_v44 = vld [vmem:[%s6704_s29 + $0x330] sm:$0xff]   ;;  %v2853_v54 = vrot.slane %v7313_v23, %v2820_v29 }
 0xf52   : > { %v6407_v61 = vld [vmem:[%s6704_s29 + $0x358] sm:$0xff]   ;;  %v6411_v45 = vld [vmem:[%s6704_s29 + $0x350] sm:$0xff]  }
 0xf54   : > { %5999 = vmatpush3.bf16.msra.mxu1 %v6377_v60  ;;  %6027 = vmatpush3.bf16.msra.mxu0 %v6378_v55  ;;  %v6394_v60 = vld [vmem:[%s6704_s29 + $0x3b8] sm:$0xff]   ;;  %v6395_v55 = vld [vmem:[%s6704_s29 + $0x370] sm:$0xff]  }
 0xf55   : > { %6000 = vmatprep.subr.bf16.mxu1 %v6379_v46  ;;  %6028 = vmatprep.subr.bf16.mxu0 %v6380_v21  ;;  %v3715_v46 = vpack.c.bf16 %v3683_v3, %v3667_v28  ;;  %v3612_v21 = vadd.f32 %v3611_v42, %v7409_v11  ;;  %v6409_v3 = vld [vmem:[%s6704_s29 + $0x318] sm:$0xff]   ;;  %v6413_v28 = vld [vmem:[%s6704_s29 + $0x310] sm:$0xff]  }
 0xf57   : > { %v3655_v41 = vmax.f32 %v3612_v21, 0.0  ;;  %v6419_v21 = vld [vmem:[%s6704_s29 + $0x340] sm:$0xff]  }
 0xf58   : > { %6001 = vmatpush3.bf16.msra.mxu1 %v6381_v32  ;;  %6029 = vmatpush3.bf16.msra.mxu0 %v6382_v15  ;;  %v3510_v32 = vadd.f32 %v7339_v33, %v2837_v16  ;;  %v3680_v15 = vmax.f32 %v3461_v10, 0.0  ;;  %v3664_v33 = vmax.f32 %v3457_v5, 0.0  ;;  %v6400_v16 = vld [vmem:[%s6704_s29 + $0x3e8] sm:$0xff]   ;;  %v6414_v10 = vld [vmem:[%s6704_s29 + $0x390] sm:$0xff]  }
 0xf59   : > { %6002 = vmatprep.subr.bf16.mxu1 %v6383_v52  ;;  %6030 = vmatprep.subr.bf16.mxu0 %v6384_v63  ;;  %v3608_v52 = vadd.f32 %v3607_v49, %v7409_v11  ;;  %v3682_v63 = vmax.f32 %v3514_v1, 0.0  ;;  %v2845_v1 = vrot.slane %v7313_v23, %v2812_v27  ;;  %v3606_v23 = vadd.f32 %v7367_v30, %v2853_v54 }
 0xf5a   : > { %v3712_v49 = vpack.c.bf16 %v3680_v15, %v3664_v33 }
 0xf5b   : > { %v3639_v35 = vmax.f32 %v3608_v52, 0.0  ;;  %v3557_v5 = vadd.f32 %v7387_v56, %v2845_v1  ;;  %v3553_v38 = vadd.f32 %v7365_v25, %v2845_v1  ;;  %v6421_v56 = vld [vmem:[%s6704_s29 + $0x300] sm:$0xff]   ;;  %v3618_v52 = vadd.f32 %v3617_v2, %v7409_v11 }
 0xf5c   : > { %6003 = vmatpush3.bf16.msra.mxu1 %v6385_v0  ;;  %6031 = vmatpush3.bf16.msra.mxu0 %v6386_v51  ;;  %v6398_v0 = vld [vmem:[%s6704_s29 + $0x3b0] sm:$0xff]   ;;  %v3666_v51 = vmax.f32 %v3510_v32, 0.0  ;;  %v6420_v32 = vld [vmem:[%s6704_s29 + $0x3c0] sm:$0xff]   ;;  %v3638_v25 = vmax.f32 %v3606_v23, 0.0 }
 0xf5d   : > { %6004 = vmatprep.subr.bf16.mxu1 %v6387_v53  ;;  %6032 = vmatprep.subr.bf16.mxu0 %v6388_v34  ;;  %v3637_v53 = vmax.f32 %v3555_v6, 0.0  ;;  %v3703_v43 = vpack.c.bf16 %v3655_v41, %v3639_v35  ;;  %v3652_v15 = vmax.f32 %v3557_v5, 0.0  ;;  %v3671_v30 = vmax.f32 %v3618_v52, 0.0 }
 0xf5e   : > { %v3714_v34 = vpack.c.bf16 %v3682_v63, %v3666_v51 }
 0xf5f   : > { %v3701_v19 = vpack.c.bf16 %v3653_v17, %v3637_v53  ;;  %v3636_v17 = vmax.f32 %v3553_v38, 0.0 }
 0xf60   : > { %6005 = vmatpush3.bf16.msra.mxu1 %v6389_v24  ;;  %6033 = vmatpush3.bf16.msra.mxu0 %v6390_v31  ;;  %v6404_v24 = vld [vmem:[%s6704_s29 + $0x3e0] sm:$0xff]  }
 0xf61   : > { %6046 = vmatprep.subr.bf16.mxu1 %v6391_v48  ;;  %6074 = vmatprep.subr.bf16.mxu0 %v6392_v62  ;;  %v6405_v31 = vld [vmem:[%s6704_s29 + $0x320] sm:$0xff]   ;;  %v3564_v62 = vpop.f32.mrf.mxu1  ;;  %v3700_v33 = vpack.c.bf16 %v3652_v15, %v3636_v17 }
 0xf62   : > { %v6406_v48 = vld [vmem:[%s6704_s29 + $0x3a0] sm:$0xff]   ;;  %v3565_v6 = vadd.f32 %v3564_v62, %v7403_v4 }
 0xf63   : > { %4980 = vmatmul.mubr.bf16.vlgmr.msra.gmra.mxu1 %v3696_v59  ;;  %5029 = vmatmul.mubr.bf16.vlgmr.msra.gmra.mxu0 %v3698_v13  ;;  %v3566_v42 = vpop.f32.mrf.mxu1  ;;  %v3619_v59 = vpop.f32.mrf.mxu0  ;;  %v6416_v13 = vld [vmem:[%s6704_s29 + $0x3c8] sm:$0xff]   ;;  %v5666_v17 = vld [vmem:[%s706_s18] ss:$0 sm:$0xff] }
 0xf64   : > { %4987 = vmatprep.mubr.bf16.mxu1 %v3713_v14  ;;  %5036 = vmatprep.mubr.bf16.mxu0 %v3715_v46  ;;  %v6418_v46 = vld [vmem:[%s6704_s29 + $0x388] sm:$0xff]   ;;  %v3567_v41 = vadd.f32 %v3566_v42, %v2845_v1 }
 0xf65   : > { %6047 = vmatpush3.bf16.msra.mxu1 %v6393_v12  ;;  %6075 = vmatpush3.bf16.msra.mxu0 %v6394_v60  ;;  %v6415_v12 = vld [vmem:[%s6704_s29 + $0x348] sm:$0xff]   ;;  %v3568_v14 = vpop.f32.mrf.mxu1  ;;  %v3621_v60 = vpop.f32.mrf.mxu0 }
 0xf66   : > { %6048 = vmatprep.subr.bf16.mxu1 %v6395_v55  ;;  %6076 = vmatprep.subr.bf16.mxu0 %v6396_v36  ;;  %v6417_v55 = vld [vmem:[%s6704_s29 + $0x308] sm:$0xff]   ;;  %v3610_v36 = vadd.f32 %v7392_v57, %v2853_v54  ;;  %v3569_v27 = vadd.f32 %v3568_v14, %v7403_v4  ;;  %v3622_v29 = vadd.f32 %v3621_v60, %v7409_v11  ;;  %v6422_v57 = vld [vmem:[%s6704_s29 + $0x380] sm:$0xff]   ;;  %v3684_v35 = vmax.f32 %v3567_v41, 0.0 }
 0xf67   : > { %v3563_v11 = vadd.f32 %v7430_v40, %v2845_v1 }
 0xf68   : > { %v3685_v63 = vmax.f32 %v3569_v27, 0.0 }
 0xf69   : > { %6049 = vmatpush3.bf16.msra.mxu1 %v6397_v44  ;;  %6077 = vmatpush3.bf16.msra.mxu0 %v6398_v0  ;;  %v3654_v44 = vmax.f32 %v3610_v36, 0.0  ;;  %v3687_v0 = vmax.f32 %v3622_v29, 0.0 }
 0xf6a   : > { %6050 = vmatprep.subr.bf16.mxu1 %v6399_v50  ;;  %6078 = vmatprep.subr.bf16.mxu0 %v6400_v16  ;;  %v3669_v50 = vmax.f32 %v3565_v6, 0.0  ;;  %v3620_v16 = vadd.f32 %v3619_v59, %v2853_v54 }
 0xf6b   : > { %4988 = vmatmul.mubr.bf16.gmra.mxu1 %v3712_v49  ;;  %5037 = vmatmul.mubr.bf16.gmra.mxu0 %v3714_v34  ;;  %v3702_v4 = vpack.c.bf16 %v3654_v44, %v3638_v25  ;;  %v3719_v53 = vpack.c.bf16 %v3687_v0, %v3671_v30  ;;  %v3616_v49 = vadd.f32 %v7432_v58, %v2853_v54  ;;  %v3668_v34 = vmax.f32 %v3563_v11, 0.0 }
 0xf6c   : > { %5077 = vmatprep.mubr.bf16.mxu1 %v3701_v19  ;;  %5126 = vmatprep.mubr.bf16.mxu0 %v3703_v43  ;;  %v3717_v51 = vpack.c.bf16 %v3685_v63, %v3669_v50 }
 0xf6d   : > { %6051 = vmatpush3.bf16.msra.mxu1 %v6401_v39  ;;  %6079 = vmatpush3.bf16.msra.mxu0 %v6402_v37  ;;  %v3686_v39 = vmax.f32 %v3620_v16, 0.0  ;;  %v3670_v19 = vmax.f32 %v3616_v49, 0.0  ;;  %v3716_v37 = vpack.c.bf16 %v3684_v35, %v3668_v34 }
 0xf6e   : > { %6052 = vmatprep.subr.bf16.mxu1 %v6403_v9  ;;  %6080 = vmatprep.subr.bf16.mxu0 %v6404_v24 }
 0xf6f   : > { %v3718_v9 = vpack.c.bf16 %v3686_v39, %v3670_v19 }
 0xf71   : > { %6053 = vmatpush3.bf16.msra.mxu1 %v6405_v31  ;;  %6081 = vmatpush3.bf16.msra.mxu0 %v6406_v48 }
 0xf72   : > { %6054 = vmatprep.subr.bf16.mxu1 %v6407_v61  ;;  %6082 = vmatprep.subr.bf16.mxu0 %v6408_v47 }
 0xf75   : > { %6055 = vmatpush3.bf16.msra.mxu1 %v6409_v3  ;;  %6083 = vmatpush3.bf16.msra.mxu0 %v6410_v20 }
 0xf76   : > { %6056 = vmatprep.subr.bf16.mxu1 %v6411_v45  ;;  %6084 = vmatprep.subr.bf16.mxu0 %v6412_v26 }
 0xf79   : > { %6057 = vmatpush3.bf16.msra.mxu1 %v6413_v28  ;;  %6085 = vmatpush3.bf16.msra.mxu0 %v6414_v10 }
 0xf7a   : > { %6058 = vmatprep.subr.bf16.mxu1 %v6415_v12  ;;  %6086 = vmatprep.subr.bf16.mxu0 %v6416_v13 }
 0xf7d   : > { %6059 = vmatpush3.bf16.msra.mxu1 %v6417_v55  ;;  %6087 = vmatpush3.bf16.msra.mxu0 %v6418_v46 }
 0xf7e   : > { %6060 = vmatprep.subr.bf16.mxu1 %v6419_v21  ;;  %6088 = vmatprep.subr.bf16.mxu0 %v6420_v32 }
 0xf81   : > { %6061 = vmatpush3.bf16.msra.mxu1 %v6421_v56  ;;  %6089 = vmatpush3.bf16.msra.mxu0 %v6422_v57 }
 0xf84   : > { %5078 = vmatmul.mubr.bf16.vlgmr.msra.gmra.mxu1 %v3700_v33  ;;  %5127 = vmatmul.mubr.bf16.vlgmr.msra.gmra.mxu0 %v3702_v4 }
 0xf85   : > { %5085 = vmatprep.mubr.bf16.mxu1 %v3717_v51  ;;  %5134 = vmatprep.mubr.bf16.mxu0 %v3719_v53 }
 0xf8c   : > { %5086 = vmatmul.mubr.bf16.gmra.mxu1 %v3716_v37  ;;  %5135 = vmatmul.mubr.bf16.gmra.mxu0 %v3718_v9 }
 0xfe2   : > { %v5894_v43 = vpop.f32.mrf.mxu1  ;;  %v5922_v24 = vpop.f32.mrf.mxu0 }
 0xfe4   : > { %v5895_v31 = vpop.f32.mrf.mxu1  ;;  %v5923_v48 = vpop.f32.mrf.mxu0 }
 0xfe5   : > { %v5896_v44 = vadd.f32 %v5895_v31, %v5894_v43  ;;  %v5924_v30 = vadd.f32 %v5923_v48, %v5922_v24 }
 0xfe6   : > { %v5897_v40 = vpop.f32.mrf.mxu1  ;;  %v5925_v61 = vpop.f32.mrf.mxu0 }
 0xfe7   : > { %v4786_v25 = vadd.f32 %v5896_v44, %v5666_v17 }
 0xfe8   : > { %v5898_v47 = vpop.f32.mrf.mxu1  ;;  %v5926_v62 = vpop.f32.mrf.mxu0 }
 0xfe9   : > { %v5899_v50 = vadd.f32 %v5898_v47, %v5897_v40  ;;  %v4835_v51 = vadd.f32 %v5924_v30, %v4786_v25  ;;  %v5927_v49 = vadd.f32 %v5926_v62, %v5925_v61 }
 0xfea   : > { %v5900_v58 = vpop.f32.mrf.mxu1  ;;  %v5928_v2 = vpop.f32.mrf.mxu0 }
 0xfeb   : > { %v4789_v11 = vadd.f32 %v5899_v50, %v5666_v17 }
 0xfec   : > { %v5901_v3 = vpop.f32.mrf.mxu1  ;;  %v5929_v20 = vpop.f32.mrf.mxu0 }
 0xfed   : > { %v5902_v4 = vadd.f32 %v5901_v3, %v5900_v58  ;;  %v4838_v37 = vadd.f32 %v5927_v49, %v4789_v11  ;;  %v5930_v44 = vadd.f32 %v5929_v20, %v5928_v2 }
 0xfee   : > { %v5903_v45 = vpop.f32.mrf.mxu1  ;;  %v7468_v26 = vpop.f32.mrf.mxu0 }
 0xfef   : > { %v4794_v34 = vadd.f32 %v5902_v4, %v5666_v17 }
 0xff0   : > { %v5904_v42 = vpop.f32.mrf.mxu1  ;;  %v5932_v59 = vpop.f32.mrf.mxu0 }
 0xff1   : > { %v5905_v9 = vadd.f32 %v5904_v42, %v5903_v45  ;;  %v4843_v48 = vadd.f32 %v5930_v44, %v4794_v34 }
 0xff3   : > { %v4797_v3 = vadd.f32 %v5905_v9, %v5666_v17 }
0x1002   : > { %v5950_v28 = vpop.f32.mrf.mxu1  ;;  %v5978_v10 = vpop.f32.mrf.mxu0 }
0x1004   : > { %v5951_v12 = vpop.f32.mrf.mxu1  ;;  %v5979_v13 = vpop.f32.mrf.mxu0 }
0x1005   : > { %v5952_v41 = vadd.f32 %v5951_v12, %v5950_v28  ;;  %v5980_v43 = vadd.f32 %v5979_v13, %v5978_v10 }
0x1006   : > { %v5953_v1 = vpop.f32.mrf.mxu1  ;;  %v5981_v14 = vpop.f32.mrf.mxu0 }
0x1007   : > { %v4884_v35 = vadd.f32 %v5952_v41, %v4835_v51 }
0x1008   : > { %v5954_v54 = vpop.f32.mrf.mxu1  ;;  %v5982_v60 = vpop.f32.mrf.mxu0 }
0x1009   : > { %v5955_v39 = vadd.f32 %v5954_v54, %v5953_v1  ;;  %v4933_v47 = vadd.f32 %v5980_v43, %v4884_v35  ;;  %v5983_v28 = vadd.f32 %v5982_v60, %v5981_v14  ;;  %v5933_v54 = vadd.f32 %v5932_v59, %v7468_v26 }
0x100a   : > { %v5956_v55 = vpop.f32.mrf.mxu1  ;;  %v5984_v5 = vpop.f32.mrf.mxu0 }
0x100b   : > { %v4887_v24 = vadd.f32 %v5955_v39, %v4838_v37 }
0x100c   : > { %v5957_v46 = vpop.f32.mrf.mxu1  ;;  %v5985_v21 = vpop.f32.mrf.mxu0 }
0x100d   : > { %v5958_v40 = vadd.f32 %v5957_v46, %v5956_v55  ;;  %v4936_v50 = vadd.f32 %v5983_v28, %v4887_v24  ;;  %v5986_v13 = vadd.f32 %v5985_v21, %v5984_v5  ;;  %v4846_v55 = vadd.f32 %v5933_v54, %v4797_v3 }
0x100e   : > { %v5959_v36 = vpop.f32.mrf.mxu1  ;;  %v7470_v27 = vpop.f32.mrf.mxu0 }
0x100f   : > { %v4892_v62 = vadd.f32 %v5958_v40, %v4843_v48 }
0x1010   : > { %v5960_v32 = vpop.f32.mrf.mxu1  ;;  %v7472_v38 = vpop.f32.mrf.mxu0 }
0x1011   : > { %v5961_v45 = vadd.f32 %v5960_v32, %v5959_v36  ;;  %v4941_v14 = vadd.f32 %v5986_v13, %v4892_v62  ;;  %v5989_v26 = vadd.f32 %v7472_v38, %v7470_v27 }
0x1023   : > { %v6006_v29 = vpop.f32.mrf.mxu1  ;;  %v6034_v23 = vpop.f32.mrf.mxu0 }
0x1025   : > { %v6007_v6 = vpop.f32.mrf.mxu1  ;;  %v6035_v56 = vpop.f32.mrf.mxu0 }
0x1026   : > { %v6008_v31 = vadd.f32 %v6007_v6, %v6006_v29  ;;  %v6036_v42 = vadd.f32 %v6035_v56, %v6034_v23 }
0x1027   : > { %v6009_v15 = vpop.f32.mrf.mxu1  ;;  %v6037_v52 = vpop.f32.mrf.mxu0 }
0x1028   : > { %v4982_v12 = vadd.f32 %v6008_v31, %v4933_v47 }
0x1029   : > { %v6010_v57 = vpop.f32.mrf.mxu1  ;;  %v6038_v63 = vpop.f32.mrf.mxu0 }
0x102a   : > { %v6011_v25 = vadd.f32 %v6010_v57, %v6009_v15  ;;  %v5031_v46 = vadd.f32 %v6036_v42, %v4982_v12  ;;  %v4895_v15 = vadd.f32 %v5961_v45, %v4846_v55  ;;  %v6039_v57 = vadd.f32 %v6038_v63, %v6037_v52 }
0x102b   : > { %v6012_v0 = vpop.f32.mrf.mxu1  ;;  %v6040_v33 = vpop.f32.mrf.mxu0 }
0x102c   : > { %v4985_v29 = vadd.f32 %v6011_v25, %v4936_v50  ;;  %v4944_v51 = vadd.f32 %v5989_v26, %v4895_v15 }
0x102d   : > { %v6013_v16 = vpop.f32.mrf.mxu1  ;;  %v6041_v53 = vpop.f32.mrf.mxu0 }
0x102e   : > { %v6014_v2 = vadd.f32 %v6013_v16, %v6012_v0  ;;  %v5034_v5 = vadd.f32 %v6039_v57, %v4985_v29  ;;  %v6042_v0 = vadd.f32 %v6041_v53, %v6040_v33 }
0x102f   : > { %v6015_v19 = vpop.f32.mrf.mxu1  ;;  %v6043_v18 = vpop.f32.mrf.mxu0 }
0x1030   : > { %v4990_v59 = vadd.f32 %v6014_v2, %v4941_v14 }
0x1031   : > { %v6016_v58 = vpop.f32.mrf.mxu1  ;;  %v6044_v61 = vpop.f32.mrf.mxu0 }
0x1032   : > { %v6017_v21 = vadd.f32 %v6016_v58, %v6015_v19  ;;  %v5039_v63 = vadd.f32 %v6042_v0, %v4990_v59  ;;  %v6045_v43 = vadd.f32 %v6044_v61, %v6043_v18  ;;  %v7597_v61 = vld [vmem:[#allocation9_spill] sm:$0xff] }
0x1034   : > { %v4993_v34 = vadd.f32 %v6017_v21, %v4944_v51 }
0x1036   : > { %v5042_v47 = vadd.f32 %v6045_v43, %v4993_v34 }
0x1044   : > { %v6062_v1 = vpop.f32.mrf.mxu1  ;;  %v6090_v10 = vpop.f32.mrf.mxu0 }
0x1046   : > { %v6063_v20 = vpop.f32.mrf.mxu1  ;;  %v6091_v17 = vpop.f32.mrf.mxu0 }
0x1047   : > { %v6064_v6 = vadd.f32 %v6063_v20, %v6062_v1  ;;  %v6092_v41 = vadd.f32 %v6091_v17, %v6090_v10 }
0x1048   : > { %v6065_v60 = vpop.f32.mrf.mxu1  ;;  %v6093_v4 = vpop.f32.mrf.mxu0 }
0x1049   : > { %v5080_v30 = vadd.f32 %v6064_v6, %v5031_v46 }
0x104a   : > { %v6066_v36 = vpop.f32.mrf.mxu1  ;;  %v6094_v56 = vpop.f32.mrf.mxu0 }
0x104b   : > { %v5129_v32 = vadd.f32 %v6092_v41, %v5080_v30  ;;  %v6067_v23 = vadd.f32 %v6066_v36, %v6065_v60  ;;  %v6095_v49 = vadd.f32 %v6094_v56, %v6093_v4 }
0x104c   : > { %v6068_v16 = vpop.f32.mrf.mxu1  ;;  %v6096_v35 = vpop.f32.mrf.mxu0 }
0x104d   : > { %v5083_v11 = vadd.f32 %v6067_v23, %v5034_v5  ;;  %v5143_v52 = vadd.f32 %v5129_v32, %v7070_v7 }
0x104e   : > { %v6069_v39 = vpop.f32.mrf.mxu1  ;;  %v6097_v38 = vpop.f32.mrf.mxu0 }
0x104f   : > { %v5132_v37 = vadd.f32 %v6095_v49, %v5083_v11  ;;  %v6070_v27 = vadd.f32 %v6069_v39, %v6068_v16  ;;  %v5149_v9 = vsel %vm829_vm1, %v5143_v52, 0.0  ;;  %v6098_v33 = vadd.f32 %v6097_v38, %v6096_v35  ;;  %v5795_v11 = vld [vmem:[%s709_s28] ss:$0 sm:$0xff] }
0x1050   : > { %v6071_v19 = vpop.f32.mrf.mxu1  ;;  %5150 = vadd.xlane.f32.xlu1 %v5149_v9  ;;  %v6099_v53 = vpop.f32.mrf.mxu0  ;;  %v5796_v35 = vld [vmem:[%s712_s23] ss:$0 sm:$0xff]  ;;  %s7598_s23 = sld [smem:[#allocation15_spill]] (!%p5797_p5) }
0x1051   : > { %v5088_v31 = vadd.f32 %v6070_v27, %v5039_v63  ;;  %v5144_v44 = vadd.f32 %v5132_v37, %v7073_v8 }
0x1052   : > { %v6072_v40 = vpop.f32.mrf.mxu1  ;;  %v6100_v48 = vpop.f32.mrf.mxu0 }
0x1053   : > { %v5137_v24 = vadd.f32 %v6098_v33, %v5088_v31  ;;  %v6073_v7 = vadd.f32 %v6072_v40, %v6071_v19  ;;  %v5152_v58 = vsel %vm829_vm1, %v5144_v44, 0.0  ;;  %v6101_v28 = vadd.f32 %v6100_v48, %v6099_v53 }
0x1054   : > { %5153 = vadd.xlane.f32.xlu0 %v5152_v58 }
0x1055   : > { %v5091_v3 = vadd.f32 %v6073_v7, %v5042_v47  ;;  %v5145_v12 = vadd.f32 %v5137_v24, %v7095_v22 }
0x1057   : > { %v5140_v25 = vadd.f32 %v6101_v28, %v5091_v3  ;;  %v5155_v18 = vsel %vm829_vm1, %v5145_v12, 0.0 }
0x1058   : > { %5156 = vadd.xlane.f32.xlu1 %v5155_v18 }
0x1059   : > { %v5146_v62 = vadd.f32 %v5140_v25, %v7597_v61 }
0x105b   : > { %v5158_v8 = vsel %vm829_vm1, %v5146_v62, 0.0 }
0x105c   : > { %5159 = vadd.xlane.f32.xlu0 %v5158_v8 }
0x10d9   : > { %v5151_v1 = vpop.xlane.xlu1 %5150 }
0x10da   : > { %v5161_v54 = vmul.f32 0.015625, %v5151_v1 }
0x10dc   : > { %v5165_v50 = vsub.f32 %v5143_v52, %v5161_v54 }
0x10dd   : > { %v5154_v45 = vpop.xlane.xlu0 %5153 }
0x10de   : > { %v5162_v42 = vmul.f32 0.015625, %v5154_v45  ;;  %v5169_v10 = vmul.f32 %v5165_v50, %v5165_v50 }
0x10e0   : > { %v5166_v13 = vsub.f32 %v5144_v44, %v5162_v42  ;;  %v5173_v2 = vsel %vm829_vm1, %v5169_v10, 0.0 }
0x10e1   : > { %5174 = vadd.xlane.f32.xlu1 %v5173_v2  ;;  %v5157_v22 = vpop.xlane.xlu1 %5156 }
0x10e2   : > { %v5163_v20 = vmul.f32 0.015625, %v5157_v22  ;;  %v5170_v55 = vmul.f32 %v5166_v13, %v5166_v13 }
0x10e4   : > { %v5167_v46 = vsub.f32 %v5145_v12, %v5163_v20  ;;  %v5176_v29 = vsel %vm829_vm1, %v5170_v55, 0.0 }
0x10e5   : > { %5177 = vadd.xlane.f32.xlu0 %v5176_v29  ;;  %v5160_v6 = vpop.xlane.xlu0 %5159 }
0x10e6   : > { %v5164_v17 = vmul.f32 0.015625, %v5160_v6  ;;  %v5171_v14 = vmul.f32 %v5167_v46, %v5167_v46 }
0x10e8   : > { %v5168_v60 = vsub.f32 %v5146_v62, %v5164_v17  ;;  %v5179_v15 = vsel %vm829_vm1, %v5171_v14, 0.0 }
0x10e9   : > { %5180 = vadd.xlane.f32.xlu1 %v5179_v15 }
0x10ea   : > { %v5172_v57 = vmul.f32 %v5168_v60, %v5168_v60 }
0x10ec   : > { %v5182_v30 = vsel %vm829_vm1, %v5172_v57, 0.0 }
0x10ed   : > { %5183 = vadd.xlane.f32.xlu0 %v5182_v30 }
0x116a   : > { %v5175_v41 = vpop.xlane.xlu1 %5174 }
0x116b   : > { %v5185_v4 = vmul.f32 0.015625, %v5175_v41 }
0x116d   : > { %v5189_v26 = vadd.f32 1e-05, %v5185_v4 }
0x116e   : > { %v5178_v59 = vpop.xlane.xlu0 %5177 }
0x116f   : > { %6495 = vrsqrt.f32 %v5189_v26  ;;  %v5186_v36 = vmul.f32 0.015625, %v5178_v59 }
0x1171   : > { %v5190_v5 = vadd.f32 1e-05, %v5186_v36 }
0x1172   : > { %v5181_v21 = vpop.xlane.xlu1 %5180 }
0x1173   : > { %6497 = vrsqrt.f32 %v5190_v5  ;;  %v5187_v32 = vmul.f32 0.015625, %v5181_v21 }
0x1175   : > { %v5191_v23 = vadd.f32 1e-05, %v5187_v32 }
0x1176   : > { %v5184_v56 = vpop.xlane.xlu0 %5183 }
0x1177   : > { %6499 = vrsqrt.f32 %v5191_v23  ;;  %v5188_v0 = vmul.f32 0.015625, %v5184_v56 }
0x1179   : > { %v5192_v16 = vadd.f32 1e-05, %v5188_v0 }
0x117b   : > { %6501 = vrsqrt.f32 %v5192_v16 }
0x117c   : > { %v6496_v51 = vpop.eup %6495 }
0x117d   : > { %v5197_v49 = vmul.f32 %v6496_v51, %v5165_v50 }
0x117f   : > { %v5207_v52 = vmul.f32 %v5795_v11, %v5197_v49 }
0x1180   : > { %v6498_v63 = vpop.eup %6497 }
0x1181   : > { %v5217_v39 = vadd.f32 %v5796_v35, %v5207_v52  ;;  %v5198_v34 = vmul.f32 %v6498_v63, %v5166_v13 }
0x1183   : > { %5221 = vst.msk [vmem:[#allocation2] sm:$0xff] %vm829_vm1, %v5217_v39  ;;  %v5208_v37 = vmul.f32 %v5795_v11, %v5198_v34 }
0x1184   : > { %v6500_v27 = vpop.eup %6499 }
0x1185   : > { %v5218_v38 = vadd.f32 %v5796_v35, %v5208_v37  ;;  %v5199_v9 = vmul.f32 %v6500_v27, %v5167_v46 }
0x1187   : > { %5222 = vst.msk [vmem:[#allocation2 + $0x8] sm:$0xff] %vm829_vm1, %v5218_v38  ;;  %v5209_v19 = vmul.f32 %v5795_v11, %v5199_v9 }
0x1188   : > { %v6502_v43 = vpop.eup %6501 }
0x1189   : > { %v5219_v31 = vadd.f32 %v5796_v35, %v5209_v19  ;;  %v5200_v33 = vmul.f32 %v6502_v43, %v5168_v60 }
0x118b   : > { %5223 = vst.msk [vmem:[#allocation2 + $0x10] sm:$0xff] %vm829_vm1, %v5219_v31  ;;  %v5210_v53 = vmul.f32 %v5795_v11, %v5200_v33  ;;  %5228 = sbr.rel (%p5797_p5) target bundleno = 4711 (0x1267), region = 96 }
0x118d   : > { %v5220_v44 = vadd.f32 %v5796_v35, %v5210_v53 }
0x118f   : > { %5224 = vst.msk [vmem:[#allocation2 + $0x18] sm:$0xff] %vm829_vm1, %v5220_v44 }
0x1190   : > { %v5257_v40 = vld [vmem:[%s7598_s23 + $0x38] sm:$0xff]  ;;  %v5229_v47 = vsel %vm829_vm1, %v5217_v39, 0.0  ;;  %v6551_v24 = vmov 0.0   ;;  %v5256_v7 = vld [vmem:[%s7598_s23 + $0x30] sm:$0xff]  ;;  %vm6552_vm6 = vmmov 0   ;;  %v5230_v48 = vsel %vm829_vm1, %v5218_v38, 0.0 }
0x1191   : > { %6235 = vmatprep.subr.mxu0 %v6551_v24  ;;  %6251 = vmatprep.mubr.msk.f32.mxu0 %vm6552_vm6, %v6551_v24  ;;  %v5238_v58 = vsel %vm829_vm1, %v5219_v31, 0.0  ;;  %v5239_v3 = vsel %vm829_vm1, %v5220_v44, 0.0  ;;  %v5231_v28 = vadd.f32 %v5230_v48, %v5229_v47  ;;  %v5255_v25 = vld [vmem:[%s7598_s23 + $0x28] sm:$0xff]  ;;  %v5254_v62 = vld [vmem:[%s7598_s23 + $0x20] sm:$0xff]  ;;  %v5253_v54 = vld [vmem:[%s7598_s23 + $0x18] sm:$0xff]  ;;  %vm5267_vm7 = vcmask 1041409  }
0x1192   : > { %6236 = vmatpush3.msra.mxu0 %v5257_v40  ;;  %v5240_v12 = vadd.f32 %v5239_v3, %v5238_v58  ;;  %v5252_v42 = vld [vmem:[%s7598_s23 + $0x10] sm:$0xff]  ;;  %v5251_v2 = vld [vmem:[%s7598_s23 + $0x8] sm:$0xff]  ;;  %v5250_v55 = vld [vmem:[%s7598_s23] sm:$0xff]  ;;  %vm5341_vm8 = vcmask 9216  }
0x1193   : > { %6237 = vmatprep.subr.mxu0 %v6551_v24  ;;  %v5232_v18 = vrot.slane %v5231_v28, 4  ;;  %v5798_v60 = vld [vmem:[%s7599_s27] ss:$0 sm:$0xff] }
0x1194   : > { %6238 = vmatpush3.msra.mxu0 %v5256_v7  ;;  %v5241_v61 = vrot.slane %v5240_v12, 4 }
0x1195   : > { %6239 = vmatprep.subr.mxu0 %v6551_v24  ;;  %v5233_v8 = vadd.f32 %v5232_v18, %v5231_v28 }
0x1196   : > { %6240 = vmatpush3.msra.mxu0 %v5255_v25  ;;  %v5242_v1 = vadd.f32 %v5241_v61, %v5240_v12 }
0x1197   : > { %6241 = vmatprep.subr.mxu0 %v6551_v24  ;;  %v5234_v50 = vrot.slane %v5233_v8, 2 }
0x1198   : > { %6242 = vmatpush3.msra.mxu0 %v5254_v62  ;;  %v5243_v45 = vrot.slane %v5242_v1, 2 }
0x1199   : > { %6243 = vmatprep.subr.mxu0 %v6551_v24  ;;  %v5235_v10 = vadd.f32 %v5234_v50, %v5233_v8 }
0x119a   : > { %6244 = vmatpush3.msra.mxu0 %v5253_v54  ;;  %v5244_v13 = vadd.f32 %v5243_v45, %v5242_v1 }
0x119b   : > { %6245 = vmatprep.subr.mxu0 %v6551_v24  ;;  %v5236_v22 = vrot.slane %v5235_v10, 1 }
0x119c   : > { %6246 = vmatpush3.msra.mxu0 %v5252_v42  ;;  %v5245_v20 = vrot.slane %v5244_v13, 1 }
0x119d   : > { %6247 = vmatprep.subr.mxu0 %v6551_v24  ;;  %v5237_v46 = vadd.f32 %v5236_v22, %v5235_v10 }
0x119e   : > { %6248 = vmatpush3.msra.mxu0 %v5251_v2  ;;  %v5246_v29 = vadd.f32 %v5245_v20, %v5244_v13 }
0x119f   : > { %6249 = vmatprep.subr.mxu0 %v6551_v24  ;;  %v5248_v6 = vmul.f32 0.0625, %v5237_v46 }
0x11a0   : > { %6250 = vmatpush3.msra.mxu0 %v5250_v55  ;;  %v5249_v17 = vmul.f32 0.0625, %v5246_v29 }
0x11a2   : > { %v5268_v14 = vsel %vm5267_vm7, %v5249_v17, %v5248_v6 }
0x11a3   : > { %6252 = vmatmul.mubr.msk.f32.vlgmr.msra.gmra.mxu0 %vm829_vm1, %v5268_v14 }
0x1263   : > { %v5337_v15 = vpop.f32.mrf.mxu0 }
0x1264   : > { %v5338_v57 = vadd.f32 %v5798_v60, %v5337_v15 }
0x1265   : > { %v6253_v30 = vpop.f32.mrf.mxu0 }
0x1266   : > { %5342 = vst.msk [vmem:[#allocation4] sm:$0x3] %vm5341_vm8, %v5338_v57 }
0x1267 PF: > { %p6258_p6 = scmp.eq.s32.totalorder %s6650_s25, 1  ;;  %s6553_s26 = smov [#allocation4]  }
0x1268   : > { %s5350_s28 = sshll.u32 %s6553_s26, 4  ;;  %s5351_s28 = int_to_ptr.vmem [resolvable:$true] %s5350_s28 }
0x1269   : > { %s6507_s5 = scalar_lea.vmem %s5351_s28, 32  ;;  %p6514_p10 = scmp.lt.s32.totalorder %s5351_s28, %s5351_s28 }
0x126a   : > { %p6508_p7 = scmp.ne.s32.totalorder %s5351_s28, %s6507_s5  ;;  %p6515_p11 = scmp.lt.s32.totalorder %s6507_s5, %s6507_s5 }
0x126c   : > { %p6509_p8 = pnand %p6508_p7, %p6258_p6  ;;  %p6516_p12 = por %p6515_p11, %p6514_p10 }
0x126e   : > { %p6510_p9 = pneg %p6509_p8 }
0x1270   : > { %p6517_p13 = pnand %p6516_p12, %p6510_p9 }
0x1272   : > { %6520 = shalt.err (!%p6517_p13)
}
0x1273   : > { %s7600_s15 = sld [smem:[#allocation17_spill]] }
0x1279   : > { %6255 = dma.vmem_to_hbm [thread:$0]  (%p6258_p6), %s5351_s28, 32, %s7600_s15, [#allocation5]  }
0x127a   : > { %6536 = dma.done.wait (%p6258_p6), [#allocation5], 32  }
0x127b   : > { %6538 = vsyncadd (%p6258_p6), [#allocation5], 4294967264 }
0x127c PF: > { %s7601_s3 = sld [smem:[#allocation7_spill]] }
0x1282   : > { %s28_s24 = sadd.s32 1, %s7601_s3  }
0x1283   : > { %p25_p0 = scmp.ge.s32.totalorder %s28_s24, 4  }
0x1285   :  { %27 = sbr.rel (!%p25_p0) target bundleno = 10 (0xa), region = 156 }
0x128a   :  { %5363 = vsyncpa [#allocation5], 1 }
0x128b   :  { %5365 = vsyncpa [#allocation5 + $0x1], 1 }

</bundles_post_ra>
